<compile_context>
chip_gen: v6e
topology: v6e:2x2x1
jax: 0.10.0
libtpu: 0.0.40
codegen_flags: <defaults>
</compile_context>

<pallas_src>
import functools

import numpy as np
import jax
import jax.numpy as jnp
from jax import lax
from jax.experimental import pallas as pl
from jax.experimental.pallas import tpu as pltpu


def _sss_kernel(yt_ref, ytn_ref, yp_ref, ypn_ref, basis_ref,
                num_ref, den_ref, log_ref, *,
                tile_t, f_pad, n_freq, n_frames, phases, inv_norm, eps):
    """One (batch, frame-chunk) grid step of the single-scale spectral loss."""
    c = pl.program_id(1)

    @pl.when(c == 0)
    def _init():
        num_ref[...] = jnp.zeros_like(num_ref)
        den_ref[...] = jnp.zeros_like(den_ref)
        log_ref[...] = jnp.zeros_like(log_ref)

    halo = phases - 1
    if halo > 0:
        # Append the first `halo` hop-rows of the next chunk so every frame of
        # this chunk has all of its phases available.
        yt = jnp.concatenate([yt_ref[...], ytn_ref[0:halo, :]], axis=0)
        yp = jnp.concatenate([yp_ref[...], ypn_ref[0:halo, :]], axis=0)
    else:
        yt = yt_ref[...]
        yp = yp_ref[...]
    # f32 working copies: arbitrary-offset row slices stay in a plain layout;
    # cast back to bf16 right before the MXU.
    yt = yt.astype(jnp.float32)
    yp = yp.astype(jnp.float32)

    # Windowed real-DFT of all frames of both signals:
    #   frame t = [row t | row t+1 | ... | row t+phases-1]  (hop samples each)
    # so  frames @ basis  ==  sum_p  rows[p : p+Tc] @ basis[p].
    acc = jnp.zeros((2 * tile_t, 2 * f_pad), jnp.float32)
    for p in range(phases):
        lhs = jnp.concatenate([yt[p:p + tile_t, :], yp[p:p + tile_t, :]],
                              axis=0).astype(jnp.bfloat16)
        acc = acc + jnp.dot(lhs, basis_ref[p],
                            preferred_element_type=jnp.float32)

    re_t = acc[0:tile_t, 0:f_pad]
    im_t = acc[0:tile_t, f_pad:2 * f_pad]
    re_p = acc[tile_t:2 * tile_t, 0:f_pad]
    im_p = acc[tile_t:2 * tile_t, f_pad:2 * f_pad]

    # torchaudio.Spectrogram(power=1, normalized=True): |STFT| / sqrt(sum w^2)
    s_t = jnp.sqrt(re_t * re_t + im_t * im_t) * inv_norm + eps
    s_p = jnp.sqrt(re_p * re_p + im_p * im_p) * inv_norm + eps

    # Mask padded frequency lanes (>= n_freq) and padded frames (>= n_frames).
    t_idx = lax.broadcasted_iota(jnp.int32, (tile_t, f_pad), 0) + c * tile_t
    f_idx = lax.broadcasted_iota(jnp.int32, (tile_t, f_pad), 1)
    mask = ((t_idx < n_frames) & (f_idx < n_freq)).astype(jnp.float32)

    diff = s_t - s_p
    summ = s_t + s_p
    log_abs = jnp.abs(jnp.log(s_t * pl.reciprocal(s_p, approx=False)))

    num_ref[...] += jnp.sum(diff * diff * mask, keepdims=True)
    den_ref[...] += jnp.sum(summ * summ * mask, keepdims=True)
    log_ref[...] += jnp.sum(log_abs * mask, keepdims=True)


def _dft_basis(n_fft, phases, hop, f_pad):
    """Hann-windowed real-DFT basis, lane-padded & split per hop-phase."""
    n = np.arange(n_fft, dtype=np.float64)
    n_freq = n_fft // 2 + 1
    f = np.arange(n_freq, dtype=np.float64)
    ang = 2.0 * np.pi * np.outer(n, f) / n_fft
    win = 0.5 * (1.0 - np.cos(2.0 * np.pi * n / n_fft))   # periodic Hann
    basis = np.zeros((n_fft, 2 * f_pad), dtype=np.float32)
    basis[:, :n_freq] = win[:, None] * np.cos(ang)
    basis[:, f_pad:f_pad + n_freq] = -win[:, None] * np.sin(ang)
    inv_norm = float(1.0 / np.sqrt(np.sum(win ** 2)))
    basis = basis.reshape(phases, hop, 2 * f_pad)
    return jnp.asarray(basis, dtype=jnp.bfloat16), inv_norm


def _hop_chunks(x, hop, tile_t, n_chunks):
    """(B, L) waveform -> (B, n_chunks+1, tile_t, hop) bf16 hop-row chunks."""
    b, length = x.shape
    rows_total = (n_chunks + 1) * tile_t       # +1 all-zero chunk = halo source
    rows_data = min(length // hop, rows_total)
    xr = x[:, : rows_data * hop].astype(jnp.bfloat16).reshape(b, rows_data, hop)
    xr = jnp.pad(xr, ((0, 0), (0, rows_total - rows_data), (0, 0)))
    return xr.reshape(b, n_chunks + 1, tile_t, hop)


def sss_loss(x_true, x_pred, n_fft, alpha=1.0, overlap=0.75, eps=1e-7):
    batch, length = x_true.shape
    x_pred = x_pred[..., :length]
    hop = int(n_fft * (1 - overlap))
    if hop <= 0:
        raise ValueError("overlap too large")
    if n_fft % hop != 0:
        # TODO(synk): support hops that do not divide n_fft (e.g. odd n_fft
        # with overlap=0.75) -- needs a per-frame gather path.
        raise ValueError(f"n_fft={n_fft} must be a multiple of hop={hop}")
    if length < n_fft:
        raise ValueError("signal shorter than n_fft")
    phases = n_fft // hop
    n_frames = 1 + (length - n_fft) // hop
    n_freq = n_fft // 2 + 1
    f_pad = ((n_freq + 127) // 128) * 128

    # Frame tile bounded so the f32 (2*tile_t, 2*f_pad) accumulator stays ~2MiB.
    tile_t = min(512, max(16, (131072 // f_pad) // 16 * 16))
    tile_t = min(tile_t, ((n_frames + 15) // 16) * 16)
    n_chunks = -(-n_frames // tile_t)

    basis, inv_norm = _dft_basis(n_fft, phases, hop, f_pad)
    yt = _hop_chunks(x_true, hop, tile_t, n_chunks)
    yp = _hop_chunks(x_pred, hop, tile_t, n_chunks)

    kernel = functools.partial(
        _sss_kernel,
        tile_t=tile_t, f_pad=f_pad, n_freq=n_freq, n_frames=n_frames,
        phases=phases, inv_norm=inv_norm, eps=float(eps))

    data_spec = pl.BlockSpec((None, None, tile_t, hop),
                             lambda b, c: (b, c, 0, 0))
    next_spec = pl.BlockSpec((None, None, tile_t, hop),
                             lambda b, c: (b, c + 1, 0, 0))
    basis_spec = pl.BlockSpec((phases, hop, 2 * f_pad),
                              lambda b, c: (0, 0, 0))
    acc_spec = pl.BlockSpec((None, 1, 1), lambda b, c: (b, 0, 0))
    acc_shape = jax.ShapeDtypeStruct((batch, 1, 1), jnp.float32)

    num, den, logs = pl.pallas_call(
        kernel,
        out_shape=(acc_shape, acc_shape, acc_shape),
        grid=(batch, n_chunks),
        in_specs=[data_spec, next_spec, data_spec, next_spec, basis_spec],
        out_specs=(acc_spec, acc_spec, acc_spec),
        compiler_params=pltpu.CompilerParams(
            dimension_semantics=("parallel", "arbitrary"),
            vmem_limit_bytes=32 * 1024 * 1024),
    )(yt, yt, yp, yp, basis)

    num = num.reshape(batch)
    den = den.reshape(batch)
    logs = logs.reshape(batch)
    converge_term = jnp.mean(jnp.sqrt(num / den))
    log_term = jnp.sum(logs) / (batch * n_frames * n_freq)
    return converge_term + alpha * log_term


def mss_loss(x_pred, x_true, n_ffts, alpha=1.0, overlap=0.75, eps=1e-7):
    """MSSLoss.forward: truncate prediction, sum single-scale losses."""
    x_pred = x_pred[..., : x_true.shape[-1]]
    value = jnp.float32(0.0)
    for n_fft in n_ffts:
        value = value + sss_loss(x_true, x_pred, n_fft, alpha, overlap, eps)
    return value


def _reference_mss_loss(x_pred, x_true, n_ffts, alpha, overlap, eps):
    """Pure-JAX f32 reference (same math as torchaudio Spectrogram path)."""
    x_pred = x_pred[..., : x_true.shape[-1]]
    length = x_true.shape[-1]
    total = jnp.float32(0.0)
    for n_fft in n_ffts:
        hop = int(n_fft * (1 - overlap))
        n_frames = 1 + (length - n_fft) // hop
        n_freq = n_fft // 2 + 1
        n = np.arange(n_fft, dtype=np.float64)
        win = 0.5 * (1.0 - np.cos(2.0 * np.pi * n / n_fft))
        ang = 2.0 * np.pi * np.outer(n, np.arange(n_freq, dtype=np.float64)) / n_fft
        cos_b = jnp.asarray(win[:, None] * np.cos(ang), jnp.float32)
        sin_b = jnp.asarray(-win[:, None] * np.sin(ang), jnp.float32)
        inv_norm = 1.0 / np.sqrt(np.sum(win ** 2))
        idx = np.arange(n_frames)[:, None] * hop + np.arange(n_fft)[None, :]

        def spec(x):
            frames = x[:, idx]
            re = jnp.einsum("btn,nf->btf", frames, cos_b,
                            precision=lax.Precision.HIGHEST)
            im = jnp.einsum("btn,nf->btf", frames, sin_b,
                            precision=lax.Precision.HIGHEST)
            return jnp.sqrt(re * re + im * im) * inv_norm + eps

        s_t, s_p = spec(x_true), spec(x_pred)
        num = jnp.sqrt(jnp.sum((s_t - s_p) ** 2, axis=(1, 2)))
        den = jnp.sqrt(jnp.sum((s_t + s_p) ** 2, axis=(1, 2)))
        converge = jnp.mean(num / den)
        log_term = jnp.mean(jnp.abs(jnp.log(s_t) - jnp.log(s_p)))
        total = total + converge + alpha * log_term
    return total


if __name__ == "__main__":
    key = jax.random.PRNGKey(0)
    k1, k2 = jax.random.split(key)
    batch, length = 2, 2048
    x_true = jax.random.normal(k1, (batch, length), dtype=jnp.float32)
    # longer prediction exercises MSSLoss' truncation
    x_pred = jax.random.normal(k2, (batch, length + 64), dtype=jnp.float32)
    n_ffts = (256, 128)

    loss_fn = jax.jit(functools.partial(
        mss_loss, n_ffts=n_ffts, alpha=1.0, overlap=0.75, eps=1e-7))
    loss = loss_fn(x_pred, x_true)
    jax.block_until_ready(loss)
    assert loss.shape == () and bool(jnp.isfinite(loss))

    ref = _reference_mss_loss(x_pred, x_true, n_ffts, 1.0, 0.75, 1e-7)
    rel = abs(float(loss) - float(ref)) / max(abs(float(ref)), 1e-6)
    assert rel < 5e-2, f"kernel={float(loss)} ref={float(ref)} rel={rel}"
    print("KERNEL_OK")
</pallas_src>

<mosaic_0001>
module attributes {stable_mosaic.version = 11 : i64} {
  func.func @_sss_kernel(%arg0: i32, %arg1: i32, %arg2: memref<1x1x32x64xbf16, #tpu.memory_space<vmem>>, %arg3: memref<1x1x32x64xbf16, #tpu.memory_space<vmem>>, %arg4: memref<1x1x32x64xbf16, #tpu.memory_space<vmem>>, %arg5: memref<1x1x32x64xbf16, #tpu.memory_space<vmem>>, %arg6: memref<4x64x512xbf16, #tpu.memory_space<vmem>>, %arg7: memref<1x1x1xf32, #tpu.memory_space<vmem>>, %arg8: memref<1x1x1xf32, #tpu.memory_space<vmem>>, %arg9: memref<1x1x1xf32, #tpu.memory_space<vmem>>) attributes {dimension_semantics = [#tpu.dimension_semantics<parallel>, #tpu.dimension_semantics<arbitrary>], iteration_bounds = array<i64: 2, 1>, scalar_prefetch = 0 : i64, scratch_operands = 0 : i64, tpu.core_type = #tpu.core_type<tc>, window_params = [{transform_indices = @transform_0, window_bounds = array<i64: 1, 1, 32, 64>}, {transform_indices = @transform_1, window_bounds = array<i64: 1, 1, 32, 64>}, {transform_indices = @transform_2, window_bounds = array<i64: 1, 1, 32, 64>}, {transform_indices = @transform_3, window_bounds = array<i64: 1, 1, 32, 64>}, {pipeline_mode = #tpu.pipeline_mode<synchronous>, transform_indices = @transform_4, window_bounds = array<i64: 4, 64, 512>}, {transform_indices = @transform_5, window_bounds = array<i64: 1, 1, 1>}, {transform_indices = @transform_6, window_bounds = array<i64: 1, 1, 1>}, {transform_indices = @transform_7, window_bounds = array<i64: 1, 1, 1>}]} {
    %c0_i32 = arith.constant 0 : i32
    %0 = arith.cmpi eq, %arg1, %c0_i32 : i32
    %1 = arith.extui %0 : i1 to i32
    %c0_i32_0 = arith.constant 0 : i32
    %2 = arith.cmpi ne, %1, %c0_i32_0 : i32
    scf.if %2 {
      %cst_54 = arith.constant 0.000000e+00 : f32
      %124 = vector.broadcast %cst_54 : f32 to vector<1x1xf32>
      %c0_55 = arith.constant 0 : index
      %c0_56 = arith.constant 0 : index
      %c0_57 = arith.constant 0 : index
      %125 = vector.load %arg7[%c0_55, %c0_56, %c0_57] : memref<1x1x1xf32, #tpu.memory_space<vmem>>, vector<1x1x1xf32>
      %126 = vector.shape_cast %125 : vector<1x1x1xf32> to vector<1x1xf32>
      %127 = vector.shape_cast %124 : vector<1x1xf32> to vector<1x1x1xf32>
      tpu.vector_store %arg7[%c0_55, %c0_56, %c0_57], %127 {strides = array<i32>} : memref<1x1x1xf32, #tpu.memory_space<vmem>>, vector<1x1x1xf32>,
      %cst_58 = arith.constant 0.000000e+00 : f32
      %128 = vector.broadcast %cst_58 : f32 to vector<1x1xf32>
      %c0_59 = arith.constant 0 : index
      %c0_60 = arith.constant 0 : index
      %c0_61 = arith.constant 0 : index
      %129 = vector.load %arg8[%c0_59, %c0_60, %c0_61] : memref<1x1x1xf32, #tpu.memory_space<vmem>>, vector<1x1x1xf32>
      %130 = vector.shape_cast %129 : vector<1x1x1xf32> to vector<1x1xf32>
      %131 = vector.shape_cast %128 : vector<1x1xf32> to vector<1x1x1xf32>
      tpu.vector_store %arg8[%c0_59, %c0_60, %c0_61], %131 {strides = array<i32>} : memref<1x1x1xf32, #tpu.memory_space<vmem>>, vector<1x1x1xf32>,
      %cst_62 = arith.constant 0.000000e+00 : f32
      %132 = vector.broadcast %cst_62 : f32 to vector<1x1xf32>
      %c0_63 = arith.constant 0 : index
      %c0_64 = arith.constant 0 : index
      %c0_65 = arith.constant 0 : index
      %133 = vector.load %arg9[%c0_63, %c0_64, %c0_65] : memref<1x1x1xf32, #tpu.memory_space<vmem>>, vector<1x1x1xf32>
      %134 = vector.shape_cast %133 : vector<1x1x1xf32> to vector<1x1xf32>
      %135 = vector.shape_cast %132 : vector<1x1xf32> to vector<1x1x1xf32>
      tpu.vector_store %arg9[%c0_63, %c0_64, %c0_65], %135 {strides = array<i32>} : memref<1x1x1xf32, #tpu.memory_space<vmem>>, vector<1x1x1xf32>,
    } else {
    }
    %c0 = arith.constant 0 : index
    %c0_1 = arith.constant 0 : index
    %c0_2 = arith.constant 0 : index
    %c0_3 = arith.constant 0 : index
    %3 = vector.load %arg2[%c0, %c0_1, %c0_2, %c0_3] : memref<1x1x32x64xbf16, #tpu.memory_space<vmem>>, vector<1x1x32x64xbf16>
    %4 = vector.shape_cast %3 : vector<1x1x32x64xbf16> to vector<32x64xbf16>
    %c0_4 = arith.constant 0 : index
    %c0_5 = arith.constant 0 : index
    %c0_6 = arith.constant 0 : index
    %c0_7 = arith.constant 0 : index
    %5 = vector.load %arg3[%c0_4, %c0_5, %c0_6, %c0_7] : memref<1x1x32x64xbf16, #tpu.memory_space<vmem>>, vector<1x1x3x64xbf16>
    %6 = vector.shape_cast %5 : vector<1x1x3x64xbf16> to vector<3x64xbf16>
    %7 = tpu.concatenate %4, %6 in 0 : vector<32x64xbf16>, vector<3x64xbf16> -> vector<35x64xbf16>
    %c0_8 = arith.constant 0 : index
    %c0_9 = arith.constant 0 : index
    %c0_10 = arith.constant 0 : index
    %c0_11 = arith.constant 0 : index
    %8 = vector.load %arg4[%c0_8, %c0_9, %c0_10, %c0_11] : memref<1x1x32x64xbf16, #tpu.memory_space<vmem>>, vector<1x1x32x64xbf16>
    %9 = vector.shape_cast %8 : vector<1x1x32x64xbf16> to vector<32x64xbf16>
    %c0_12 = arith.constant 0 : index
    %c0_13 = arith.constant 0 : index
    %c0_14 = arith.constant 0 : index
    %c0_15 = arith.constant 0 : index
    %10 = vector.load %arg5[%c0_12, %c0_13, %c0_14, %c0_15] : memref<1x1x32x64xbf16, #tpu.memory_space<vmem>>, vector<1x1x3x64xbf16>
    %11 = vector.shape_cast %10 : vector<1x1x3x64xbf16> to vector<3x64xbf16>
    %12 = tpu.concatenate %9, %11 in 0 : vector<32x64xbf16>, vector<3x64xbf16> -> vector<35x64xbf16>
    %13 = arith.extf %7 : vector<35x64xbf16> to vector<35x64xf32>
    %14 = arith.extf %12 : vector<35x64xbf16> to vector<35x64xf32>
    %cst = arith.constant 0.000000e+00 : f32
    %15 = vector.broadcast %cst : f32 to vector<64x512xf32>
    %16 = vector.extract_strided_slice %13 {offsets = [0, 0], sizes = [32, 64], strides = [1, 1]} : vector<35x64xf32> to vector<32x64xf32>
    %17 = vector.extract_strided_slice %14 {offsets = [0, 0], sizes = [32, 64], strides = [1, 1]} : vector<35x64xf32> to vector<32x64xf32>
    %18 = tpu.concatenate %16, %17 in 0 : vector<32x64xf32>, vector<32x64xf32> -> vector<64x64xf32>
    %19 = arith.truncf %18 : vector<64x64xf32> to vector<64x64xbf16>
    %c0_16 = arith.constant 0 : index
    %c0_17 = arith.constant 0 : index
    %c0_18 = arith.constant 0 : index
    %20 = vector.load %arg6[%c0_16, %c0_17, %c0_18] : memref<4x64x512xbf16, #tpu.memory_space<vmem>>, vector<1x64x512xbf16>
    %21 = vector.shape_cast %20 : vector<1x64x512xbf16> to vector<64x512xbf16>
    %cst_19 = arith.constant dense<0.000000e+00> : vector<64x512xf32>
    %22 = tpu.matmul %19, %21, %cst_19 {dimension_numbers = #tpu.dot_dimension_numbers<[1], [0], [0], [1], [0, 0, 1, 1], [], []>} : vector<64x64xbf16>, vector<64x512xbf16>, vector<64x512xf32> -> vector<64x512xf32>
    %23 = arith.addf %15, %22 : vector<64x512xf32>
    %24 = vector.extract_strided_slice %13 {offsets = [1, 0], sizes = [32, 64], strides = [1, 1]} : vector<35x64xf32> to vector<32x64xf32>
    %25 = vector.extract_strided_slice %14 {offsets = [1, 0], sizes = [32, 64], strides = [1, 1]} : vector<35x64xf32> to vector<32x64xf32>
    %26 = tpu.concatenate %24, %25 in 0 : vector<32x64xf32>, vector<32x64xf32> -> vector<64x64xf32>
    %27 = arith.truncf %26 : vector<64x64xf32> to vector<64x64xbf16>
    %c1 = arith.constant 1 : index
    %c0_20 = arith.constant 0 : index
    %c0_21 = arith.constant 0 : index
    %28 = vector.load %arg6[%c1, %c0_20, %c0_21] : memref<4x64x512xbf16, #tpu.memory_space<vmem>>, vector<1x64x512xbf16>
    %29 = vector.shape_cast %28 : vector<1x64x512xbf16> to vector<64x512xbf16>
    %cst_22 = arith.constant dense<0.000000e+00> : vector<64x512xf32>
    %30 = tpu.matmul %27, %29, %cst_22 {dimension_numbers = #tpu.dot_dimension_numbers<[1], [0], [0], [1], [0, 0, 1, 1], [], []>} : vector<64x64xbf16>, vector<64x512xbf16>, vector<64x512xf32> -> vector<64x512xf32>
    %31 = arith.addf %23, %30 : vector<64x512xf32>
    %32 = vector.extract_strided_slice %13 {offsets = [2, 0], sizes = [32, 64], strides = [1, 1]} : vector<35x64xf32> to vector<32x64xf32>
    %33 = vector.extract_strided_slice %14 {offsets = [2, 0], sizes = [32, 64], strides = [1, 1]} : vector<35x64xf32> to vector<32x64xf32>
    %34 = tpu.concatenate %32, %33 in 0 : vector<32x64xf32>, vector<32x64xf32> -> vector<64x64xf32>
    %35 = arith.truncf %34 : vector<64x64xf32> to vector<64x64xbf16>
    %c2 = arith.constant 2 : index
    %c0_23 = arith.constant 0 : index
    %c0_24 = arith.constant 0 : index
    %36 = vector.load %arg6[%c2, %c0_23, %c0_24] : memref<4x64x512xbf16, #tpu.memory_space<vmem>>, vector<1x64x512xbf16>
    %37 = vector.shape_cast %36 : vector<1x64x512xbf16> to vector<64x512xbf16>
    %cst_25 = arith.constant dense<0.000000e+00> : vector<64x512xf32>
    %38 = tpu.matmul %35, %37, %cst_25 {dimension_numbers = #tpu.dot_dimension_numbers<[1], [0], [0], [1], [0, 0, 1, 1], [], []>} : vector<64x64xbf16>, vector<64x512xbf16>, vector<64x512xf32> -> vector<64x512xf32>
    %39 = arith.addf %31, %38 : vector<64x512xf32>
    %40 = vector.extract_strided_slice %13 {offsets = [3, 0], sizes = [32, 64], strides = [1, 1]} : vector<35x64xf32> to vector<32x64xf32>
    %41 = vector.extract_strided_slice %14 {offsets = [3, 0], sizes = [32, 64], strides = [1, 1]} : vector<35x64xf32> to vector<32x64xf32>
    %42 = tpu.concatenate %40, %41 in 0 : vector<32x64xf32>, vector<32x64xf32> -> vector<64x64xf32>
    %43 = arith.truncf %42 : vector<64x64xf32> to vector<64x64xbf16>
    %c3 = arith.constant 3 : index
    %c0_26 = arith.constant 0 : index
    %c0_27 = arith.constant 0 : index
    %44 = vector.load %arg6[%c3, %c0_26, %c0_27] : memref<4x64x512xbf16, #tpu.memory_space<vmem>>, vector<1x64x512xbf16>
    %45 = vector.shape_cast %44 : vector<1x64x512xbf16> to vector<64x512xbf16>
    %cst_28 = arith.constant dense<0.000000e+00> : vector<64x512xf32>
    %46 = tpu.matmul %43, %45, %cst_28 {dimension_numbers = #tpu.dot_dimension_numbers<[1], [0], [0], [1], [0, 0, 1, 1], [], []>} : vector<64x64xbf16>, vector<64x512xbf16>, vector<64x512xf32> -> vector<64x512xf32>
    %47 = arith.addf %39, %46 : vector<64x512xf32>
    %48 = vector.extract_strided_slice %47 {offsets = [0, 0], sizes = [32, 256], strides = [1, 1]} : vector<64x512xf32> to vector<32x256xf32>
    %49 = vector.extract_strided_slice %47 {offsets = [0, 256], sizes = [32, 256], strides = [1, 1]} : vector<64x512xf32> to vector<32x256xf32>
    %50 = vector.extract_strided_slice %47 {offsets = [32, 0], sizes = [32, 256], strides = [1, 1]} : vector<64x512xf32> to vector<32x256xf32>
    %51 = vector.extract_strided_slice %47 {offsets = [32, 256], sizes = [32, 256], strides = [1, 1]} : vector<64x512xf32> to vector<32x256xf32>
    %52 = arith.mulf %48, %48 : vector<32x256xf32>
    %53 = arith.mulf %49, %49 : vector<32x256xf32>
    %54 = arith.addf %52, %53 : vector<32x256xf32>
    %55 = math.sqrt %54 : vector<32x256xf32>
    %cst_29 = arith.constant 0.102062076 : f32
    %56 = vector.broadcast %cst_29 : f32 to vector<32x256xf32>
    %57 = arith.mulf %55, %56 : vector<32x256xf32>
    %cst_30 = arith.constant 1.000000e-07 : f32
    %58 = vector.broadcast %cst_30 : f32 to vector<32x256xf32>
    %59 = arith.addf %57, %58 : vector<32x256xf32>
    %60 = arith.mulf %50, %50 : vector<32x256xf32>
    %61 = arith.mulf %51, %51 : vector<32x256xf32>
    %62 = arith.addf %60, %61 : vector<32x256xf32>
    %63 = math.sqrt %62 : vector<32x256xf32>
    %cst_31 = arith.constant 0.102062076 : f32
    %64 = vector.broadcast %cst_31 : f32 to vector<32x256xf32>
    %65 = arith.mulf %63, %64 : vector<32x256xf32>
    %cst_32 = arith.constant 1.000000e-07 : f32
    %66 = vector.broadcast %cst_32 : f32 to vector<32x256xf32>
    %67 = arith.addf %65, %66 : vector<32x256xf32>
    %68 = tpu.iota {dimensions = array<i32: 0>} : vector<32x256xi32>
    %c32_i32 = arith.constant 32 : i32
    %69 = arith.muli %arg1, %c32_i32 : i32
    %70 = vector.broadcast %69 : i32 to vector<32x256xi32>
    %71 = arith.addi %68, %70 : vector<32x256xi32>
    %72 = tpu.iota {dimensions = array<i32: 1>} : vector<32x256xi32>
    %c29_i32 = arith.constant 29 : i32
    %73 = vector.broadcast %c29_i32 : i32 to vector<32x256xi32>
    %74 = arith.cmpi slt, %71, %73 : vector<32x256xi32>
    %c129_i32 = arith.constant 129 : i32
    %75 = vector.broadcast %c129_i32 : i32 to vector<32x256xi32>
    %76 = arith.cmpi slt, %72, %75 : vector<32x256xi32>
    %77 = arith.andi %74, %76 : vector<32x256xi1>
    %78 = arith.extui %77 : vector<32x256xi1> to vector<32x256xi32>
    %79 = arith.sitofp %78 : vector<32x256xi32> to vector<32x256xf32>
    %80 = arith.subf %59, %67 : vector<32x256xf32>
    %81 = arith.addf %59, %67 : vector<32x256xf32>
    %82 = tpu.reciprocal %67 : vector<32x256xf32> -> vector<32x256xf32>
    %83 = arith.mulf %59, %82 : vector<32x256xf32>
    %84 = math.log %83 : vector<32x256xf32>
    %85 = math.absf %84 : vector<32x256xf32>
    %c0_33 = arith.constant 0 : index
    %c0_34 = arith.constant 0 : index
    %c0_35 = arith.constant 0 : index
    %86 = vector.load %arg7[%c0_33, %c0_34, %c0_35] : memref<1x1x1xf32, #tpu.memory_space<vmem>>, vector<1x1x1xf32>
    %87 = vector.shape_cast %86 : vector<1x1x1xf32> to vector<1x1xf32>
    %88 = arith.mulf %80, %80 : vector<32x256xf32>
    %89 = arith.mulf %88, %79 : vector<32x256xf32>
    %90 = vector.shape_cast %89 : vector<32x256xf32> to vector<1x32x256xf32>
    %cst_36 = arith.constant dense<0.000000e+00> : vector<1xf32>
    %91 = vector.multi_reduction <add>, %90, %cst_36 [1, 2] : vector<1x32x256xf32> to vector<1xf32>
    %92 = vector.shape_cast %91 : vector<1xf32> to vector<1x1x1xf32>
    %93 = vector.extract %92[0, 0, 0] : f32 from vector<1x1x1xf32>
    %94 = vector.broadcast %93 : f32 to vector<1x1xf32>
    %95 = arith.addf %87, %94 : vector<1x1xf32>
    %c0_37 = arith.constant 0 : index
    %c0_38 = arith.constant 0 : index
    %c0_39 = arith.constant 0 : index
    %96 = vector.load %arg7[%c0_37, %c0_38, %c0_39] : memref<1x1x1xf32, #tpu.memory_space<vmem>>, vector<1x1x1xf32>
    %97 = vector.shape_cast %96 : vector<1x1x1xf32> to vector<1x1xf32>
    %98 = vector.shape_cast %95 : vector<1x1xf32> to vector<1x1x1xf32>
    tpu.vector_store %arg7[%c0_37, %c0_38, %c0_39], %98 {strides = array<i32>} : memref<1x1x1xf32, #tpu.memory_space<vmem>>, vector<1x1x1xf32>,
    %c0_40 = arith.constant 0 : index
    %c0_41 = arith.constant 0 : index
    %c0_42 = arith.constant 0 : index
    %99 = vector.load %arg8[%c0_40, %c0_41, %c0_42] : memref<1x1x1xf32, #tpu.memory_space<vmem>>, vector<1x1x1xf32>
    %100 = vector.shape_cast %99 : vector<1x1x1xf32> to vector<1x1xf32>
    %101 = arith.mulf %81, %81 : vector<32x256xf32>
    %102 = arith.mulf %101, %79 : vector<32x256xf32>
    %103 = vector.shape_cast %102 : vector<32x256xf32> to vector<1x32x256xf32>
    %cst_43 = arith.constant dense<0.000000e+00> : vector<1xf32>
    %104 = vector.multi_reduction <add>, %103, %cst_43 [1, 2] : vector<1x32x256xf32> to vector<1xf32>
    %105 = vector.shape_cast %104 : vector<1xf32> to vector<1x1x1xf32>
    %106 = vector.extract %105[0, 0, 0] : f32 from vector<1x1x1xf32>
    %107 = vector.broadcast %106 : f32 to vector<1x1xf32>
    %108 = arith.addf %100, %107 : vector<1x1xf32>
    %c0_44 = arith.constant 0 : index
    %c0_45 = arith.constant 0 : index
    %c0_46 = arith.constant 0 : index
    %109 = vector.load %arg8[%c0_44, %c0_45, %c0_46] : memref<1x1x1xf32, #tpu.memory_space<vmem>>, vector<1x1x1xf32>
    %110 = vector.shape_cast %109 : vector<1x1x1xf32> to vector<1x1xf32>
    %111 = vector.shape_cast %108 : vector<1x1xf32> to vector<1x1x1xf32>
    tpu.vector_store %arg8[%c0_44, %c0_45, %c0_46], %111 {strides = array<i32>} : memref<1x1x1xf32, #tpu.memory_space<vmem>>, vector<1x1x1xf32>,
    %c0_47 = arith.constant 0 : index
    %c0_48 = arith.constant 0 : index
    %c0_49 = arith.constant 0 : index
    %112 = vector.load %arg9[%c0_47, %c0_48, %c0_49] : memref<1x1x1xf32, #tpu.memory_space<vmem>>, vector<1x1x1xf32>
    %113 = vector.shape_cast %112 : vector<1x1x1xf32> to vector<1x1xf32>
    %114 = arith.mulf %85, %79 : vector<32x256xf32>
    %115 = vector.shape_cast %114 : vector<32x256xf32> to vector<1x32x256xf32>
    %cst_50 = arith.constant dense<0.000000e+00> : vector<1xf32>
    %116 = vector.multi_reduction <add>, %115, %cst_50 [1, 2] : vector<1x32x256xf32> to vector<1xf32>
    %117 = vector.shape_cast %116 : vector<1xf32> to vector<1x1x1xf32>
    %118 = vector.extract %117[0, 0, 0] : f32 from vector<1x1x1xf32>
    %119 = vector.broadcast %118 : f32 to vector<1x1xf32>
    %120 = arith.addf %113, %119 : vector<1x1xf32>
    %c0_51 = arith.constant 0 : index
    %c0_52 = arith.constant 0 : index
    %c0_53 = arith.constant 0 : index
    %121 = vector.load %arg9[%c0_51, %c0_52, %c0_53] : memref<1x1x1xf32, #tpu.memory_space<vmem>>, vector<1x1x1xf32>
    %122 = vector.shape_cast %121 : vector<1x1x1xf32> to vector<1x1xf32>
    %123 = vector.shape_cast %120 : vector<1x1xf32> to vector<1x1x1xf32>
    tpu.vector_store %arg9[%c0_51, %c0_52, %c0_53], %123 {strides = array<i32>} : memref<1x1x1xf32, #tpu.memory_space<vmem>>, vector<1x1x1xf32>,
    return
  }
  func.func @transform_0(%arg0: i32, %arg1: i32) -> (i32, i32, i32, i32) {
    %c0_i32 = arith.constant 0 : i32
    %c0_i32_0 = arith.constant 0 : i32
    %c0_i32_1 = arith.constant 0 : i32
    return %arg0, %arg1, %c0_i32, %c0_i32_0 : i32, i32, i32, i32
  }
  func.func @transform_1(%arg0: i32, %arg1: i32) -> (i32, i32, i32, i32) {
    %c1_i32 = arith.constant 1 : i32
    %0 = arith.addi %arg1, %c1_i32 : i32
    %c0_i32 = arith.constant 0 : i32
    %c0_i32_0 = arith.constant 0 : i32
    %c0_i32_1 = arith.constant 0 : i32
    return %arg0, %0, %c0_i32, %c0_i32_0 : i32, i32, i32, i32
  }
  func.func @transform_2(%arg0: i32, %arg1: i32) -> (i32, i32, i32, i32) {
    %c0_i32 = arith.constant 0 : i32
    %c0_i32_0 = arith.constant 0 : i32
    %c0_i32_1 = arith.constant 0 : i32
    return %arg0, %arg1, %c0_i32, %c0_i32_0 : i32, i32, i32, i32
  }
  func.func @transform_3(%arg0: i32, %arg1: i32) -> (i32, i32, i32, i32) {
    %c1_i32 = arith.constant 1 : i32
    %0 = arith.addi %arg1, %c1_i32 : i32
    %c0_i32 = arith.constant 0 : i32
    %c0_i32_0 = arith.constant 0 : i32
    %c0_i32_1 = arith.constant 0 : i32
    return %arg0, %0, %c0_i32, %c0_i32_0 : i32, i32, i32, i32
  }
  func.func @transform_4(%arg0: i32, %arg1: i32) -> (i32, i32, i32) {
    %c0_i32 = arith.constant 0 : i32
    %c0_i32_0 = arith.constant 0 : i32
    %c0_i32_1 = arith.constant 0 : i32
    %c0_i32_2 = arith.constant 0 : i32
    return %c0_i32, %c0_i32_0, %c0_i32_1 : i32, i32, i32
  }
  func.func @transform_5(%arg0: i32, %arg1: i32) -> (i32, i32, i32) {
    %c0_i32 = arith.constant 0 : i32
    %c0_i32_0 = arith.constant 0 : i32
    %c0_i32_1 = arith.constant 0 : i32
    return %arg0, %c0_i32, %c0_i32_0 : i32, i32, i32
  }
  func.func @transform_6(%arg0: i32, %arg1: i32) -> (i32, i32, i32) {
    %c0_i32 = arith.constant 0 : i32
    %c0_i32_0 = arith.constant 0 : i32
    %c0_i32_1 = arith.constant 0 : i32
    return %arg0, %c0_i32, %c0_i32_0 : i32, i32, i32
  }
  func.func @transform_7(%arg0: i32, %arg1: i32) -> (i32, i32, i32) {
    %c0_i32 = arith.constant 0 : i32
    %c0_i32_0 = arith.constant 0 : i32
    %c0_i32_1 = arith.constant 0 : i32
    return %arg0, %c0_i32, %c0_i32_0 : i32, i32, i32
  }
}

module attributes {stable_mosaic.version = 11 : i64} {
  func.func @_sss_kernel(%arg0: i32, %arg1: i32, %arg2: memref<1x1x64x32xbf16, #tpu.memory_space<vmem>>, %arg3: memref<1x1x64x32xbf16, #tpu.memory_space<vmem>>, %arg4: memref<1x1x64x32xbf16, #tpu.memory_space<vmem>>, %arg5: memref<1x1x64x32xbf16, #tpu.memory_space<vmem>>, %arg6: memref<4x32x256xbf16, #tpu.memory_space<vmem>>, %arg7: memref<1x1x1xf32, #tpu.memory_space<vmem>>, %arg8: memref<1x1x1xf32, #tpu.memory_space<vmem>>, %arg9: memref<1x1x1xf32, #tpu.memory_space<vmem>>) attributes {dimension_semantics = [#tpu.dimension_semantics<parallel>, #tpu.dimension_semantics<arbitrary>], iteration_bounds = array<i64: 2, 1>, scalar_prefetch = 0 : i64, scratch_operands = 0 : i64, tpu.core_type = #tpu.core_type<tc>, window_params = [{transform_indices = @transform_0, window_bounds = array<i64: 1, 1, 64, 32>}, {transform_indices = @transform_1, window_bounds = array<i64: 1, 1, 64, 32>}, {transform_indices = @transform_2, window_bounds = array<i64: 1, 1, 64, 32>}, {transform_indices = @transform_3, window_bounds = array<i64: 1, 1, 64, 32>}, {pipeline_mode = #tpu.pipeline_mode<synchronous>, transform_indices = @transform_4, window_bounds = array<i64: 4, 32, 256>}, {transform_indices = @transform_5, window_bounds = array<i64: 1, 1, 1>}, {transform_indices = @transform_6, window_bounds = array<i64: 1, 1, 1>}, {transform_indices = @transform_7, window_bounds = array<i64: 1, 1, 1>}]} {
    %c0_i32 = arith.constant 0 : i32
    %0 = arith.cmpi eq, %arg1, %c0_i32 : i32
    %1 = arith.extui %0 : i1 to i32
    %c0_i32_0 = arith.constant 0 : i32
    %2 = arith.cmpi ne, %1, %c0_i32_0 : i32
    scf.if %2 {
      %cst_54 = arith.constant 0.000000e+00 : f32
      %124 = vector.broadcast %cst_54 : f32 to vector<1x1xf32>
      %c0_55 = arith.constant 0 : index
      %c0_56 = arith.constant 0 : index
      %c0_57 = arith.constant 0 : index
      %125 = vector.load %arg7[%c0_55, %c0_56, %c0_57] : memref<1x1x1xf32, #tpu.memory_space<vmem>>, vector<1x1x1xf32>
      %126 = vector.shape_cast %125 : vector<1x1x1xf32> to vector<1x1xf32>
      %127 = vector.shape_cast %124 : vector<1x1xf32> to vector<1x1x1xf32>
      tpu.vector_store %arg7[%c0_55, %c0_56, %c0_57], %127 {strides = array<i32>} : memref<1x1x1xf32, #tpu.memory_space<vmem>>, vector<1x1x1xf32>,
      %cst_58 = arith.constant 0.000000e+00 : f32
      %128 = vector.broadcast %cst_58 : f32 to vector<1x1xf32>
      %c0_59 = arith.constant 0 : index
      %c0_60 = arith.constant 0 : index
      %c0_61 = arith.constant 0 : index
      %129 = vector.load %arg8[%c0_59, %c0_60, %c0_61] : memref<1x1x1xf32, #tpu.memory_space<vmem>>, vector<1x1x1xf32>
      %130 = vector.shape_cast %129 : vector<1x1x1xf32> to vector<1x1xf32>
      %131 = vector.shape_cast %128 : vector<1x1xf32> to vector<1x1x1xf32>
      tpu.vector_store %arg8[%c0_59, %c0_60, %c0_61], %131 {strides = array<i32>} : memref<1x1x1xf32, #tpu.memory_space<vmem>>, vector<1x1x1xf32>,
      %cst_62 = arith.constant 0.000000e+00 : f32
      %132 = vector.broadcast %cst_62 : f32 to vector<1x1xf32>
      %c0_63 = arith.constant 0 : index
      %c0_64 = arith.constant 0 : index
      %c0_65 = arith.constant 0 : index
      %133 = vector.load %arg9[%c0_63, %c0_64, %c0_65] : memref<1x1x1xf32, #tpu.memory_space<vmem>>, vector<1x1x1xf32>
      %134 = vector.shape_cast %133 : vector<1x1x1xf32> to vector<1x1xf32>
      %135 = vector.shape_cast %132 : vector<1x1xf32> to vector<1x1x1xf32>
      tpu.vector_store %arg9[%c0_63, %c0_64, %c0_65], %135 {strides = array<i32>} : memref<1x1x1xf32, #tpu.memory_space<vmem>>, vector<1x1x1xf32>,
    } else {
    }
    %c0 = arith.constant 0 : index
    %c0_1 = arith.constant 0 : index
    %c0_2 = arith.constant 0 : index
    %c0_3 = arith.constant 0 : index
    %3 = vector.load %arg2[%c0, %c0_1, %c0_2, %c0_3] : memref<1x1x64x32xbf16, #tpu.memory_space<vmem>>, vector<1x1x64x32xbf16>
    %4 = vector.shape_cast %3 : vector<1x1x64x32xbf16> to vector<64x32xbf16>
    %c0_4 = arith.constant 0 : index
    %c0_5 = arith.constant 0 : index
    %c0_6 = arith.constant 0 : index
    %c0_7 = arith.constant 0 : index
    %5 = vector.load %arg3[%c0_4, %c0_5, %c0_6, %c0_7] : memref<1x1x64x32xbf16, #tpu.memory_space<vmem>>, vector<1x1x3x32xbf16>
    %6 = vector.shape_cast %5 : vector<1x1x3x32xbf16> to vector<3x32xbf16>
    %7 = tpu.concatenate %4, %6 in 0 : vector<64x32xbf16>, vector<3x32xbf16> -> vector<67x32xbf16>
    %c0_8 = arith.constant 0 : index
    %c0_9 = arith.constant 0 : index
    %c0_10 = arith.constant 0 : index
    %c0_11 = arith.constant 0 : index
    %8 = vector.load %arg4[%c0_8, %c0_9, %c0_10, %c0_11] : memref<1x1x64x32xbf16, #tpu.memory_space<vmem>>, vector<1x1x64x32xbf16>
    %9 = vector.shape_cast %8 : vector<1x1x64x32xbf16> to vector<64x32xbf16>
    %c0_12 = arith.constant 0 : index
    %c0_13 = arith.constant 0 : index
    %c0_14 = arith.constant 0 : index
    %c0_15 = arith.constant 0 : index
    %10 = vector.load %arg5[%c0_12, %c0_13, %c0_14, %c0_15] : memref<1x1x64x32xbf16, #tpu.memory_space<vmem>>, vector<1x1x3x32xbf16>
    %11 = vector.shape_cast %10 : vector<1x1x3x32xbf16> to vector<3x32xbf16>
    %12 = tpu.concatenate %9, %11 in 0 : vector<64x32xbf16>, vector<3x32xbf16> -> vector<67x32xbf16>
    %13 = arith.extf %7 : vector<67x32xbf16> to vector<67x32xf32>
    %14 = arith.extf %12 : vector<67x32xbf16> to vector<67x32xf32>
    %cst = arith.constant 0.000000e+00 : f32
    %15 = vector.broadcast %cst : f32 to vector<128x256xf32>
    %16 = vector.extract_strided_slice %13 {offsets = [0, 0], sizes = [64, 32], strides = [1, 1]} : vector<67x32xf32> to vector<64x32xf32>
    %17 = vector.extract_strided_slice %14 {offsets = [0, 0], sizes = [64, 32], strides = [1, 1]} : vector<67x32xf32> to vector<64x32xf32>
    %18 = tpu.concatenate %16, %17 in 0 : vector<64x32xf32>, vector<64x32xf32> -> vector<128x32xf32>
    %19 = arith.truncf %18 : vector<128x32xf32> to vector<128x32xbf16>
    %c0_16 = arith.constant 0 : index
    %c0_17 = arith.constant 0 : index
    %c0_18 = arith.constant 0 : index
    %20 = vector.load %arg6[%c0_16, %c0_17, %c0_18] : memref<4x32x256xbf16, #tpu.memory_space<vmem>>, vector<1x32x256xbf16>
    %21 = vector.shape_cast %20 : vector<1x32x256xbf16> to vector<32x256xbf16>
    %cst_19 = arith.constant dense<0.000000e+00> : vector<128x256xf32>
    %22 = tpu.matmul %19, %21, %cst_19 {dimension_numbers = #tpu.dot_dimension_numbers<[1], [0], [0], [1], [0, 0, 1, 1], [], []>} : vector<128x32xbf16>, vector<32x256xbf16>, vector<128x256xf32> -> vector<128x256xf32>
    %23 = arith.addf %15, %22 : vector<128x256xf32>
    %24 = vector.extract_strided_slice %13 {offsets = [1, 0], sizes = [64, 32], strides = [1, 1]} : vector<67x32xf32> to vector<64x32xf32>
    %25 = vector.extract_strided_slice %14 {offsets = [1, 0], sizes = [64, 32], strides = [1, 1]} : vector<67x32xf32> to vector<64x32xf32>
    %26 = tpu.concatenate %24, %25 in 0 : vector<64x32xf32>, vector<64x32xf32> -> vector<128x32xf32>
    %27 = arith.truncf %26 : vector<128x32xf32> to vector<128x32xbf16>
    %c1 = arith.constant 1 : index
    %c0_20 = arith.constant 0 : index
    %c0_21 = arith.constant 0 : index
    %28 = vector.load %arg6[%c1, %c0_20, %c0_21] : memref<4x32x256xbf16, #tpu.memory_space<vmem>>, vector<1x32x256xbf16>
    %29 = vector.shape_cast %28 : vector<1x32x256xbf16> to vector<32x256xbf16>
    %cst_22 = arith.constant dense<0.000000e+00> : vector<128x256xf32>
    %30 = tpu.matmul %27, %29, %cst_22 {dimension_numbers = #tpu.dot_dimension_numbers<[1], [0], [0], [1], [0, 0, 1, 1], [], []>} : vector<128x32xbf16>, vector<32x256xbf16>, vector<128x256xf32> -> vector<128x256xf32>
    %31 = arith.addf %23, %30 : vector<128x256xf32>
    %32 = vector.extract_strided_slice %13 {offsets = [2, 0], sizes = [64, 32], strides = [1, 1]} : vector<67x32xf32> to vector<64x32xf32>
    %33 = vector.extract_strided_slice %14 {offsets = [2, 0], sizes = [64, 32], strides = [1, 1]} : vector<67x32xf32> to vector<64x32xf32>
    %34 = tpu.concatenate %32, %33 in 0 : vector<64x32xf32>, vector<64x32xf32> -> vector<128x32xf32>
    %35 = arith.truncf %34 : vector<128x32xf32> to vector<128x32xbf16>
    %c2 = arith.constant 2 : index
    %c0_23 = arith.constant 0 : index
    %c0_24 = arith.constant 0 : index
    %36 = vector.load %arg6[%c2, %c0_23, %c0_24] : memref<4x32x256xbf16, #tpu.memory_space<vmem>>, vector<1x32x256xbf16>
    %37 = vector.shape_cast %36 : vector<1x32x256xbf16> to vector<32x256xbf16>
    %cst_25 = arith.constant dense<0.000000e+00> : vector<128x256xf32>
    %38 = tpu.matmul %35, %37, %cst_25 {dimension_numbers = #tpu.dot_dimension_numbers<[1], [0], [0], [1], [0, 0, 1, 1], [], []>} : vector<128x32xbf16>, vector<32x256xbf16>, vector<128x256xf32> -> vector<128x256xf32>
    %39 = arith.addf %31, %38 : vector<128x256xf32>
    %40 = vector.extract_strided_slice %13 {offsets = [3, 0], sizes = [64, 32], strides = [1, 1]} : vector<67x32xf32> to vector<64x32xf32>
    %41 = vector.extract_strided_slice %14 {offsets = [3, 0], sizes = [64, 32], strides = [1, 1]} : vector<67x32xf32> to vector<64x32xf32>
    %42 = tpu.concatenate %40, %41 in 0 : vector<64x32xf32>, vector<64x32xf32> -> vector<128x32xf32>
    %43 = arith.truncf %42 : vector<128x32xf32> to vector<128x32xbf16>
    %c3 = arith.constant 3 : index
    %c0_26 = arith.constant 0 : index
    %c0_27 = arith.constant 0 : index
    %44 = vector.load %arg6[%c3, %c0_26, %c0_27] : memref<4x32x256xbf16, #tpu.memory_space<vmem>>, vector<1x32x256xbf16>
    %45 = vector.shape_cast %44 : vector<1x32x256xbf16> to vector<32x256xbf16>
    %cst_28 = arith.constant dense<0.000000e+00> : vector<128x256xf32>
    %46 = tpu.matmul %43, %45, %cst_28 {dimension_numbers = #tpu.dot_dimension_numbers<[1], [0], [0], [1], [0, 0, 1, 1], [], []>} : vector<128x32xbf16>, vector<32x256xbf16>, vector<128x256xf32> -> vector<128x256xf32>
    %47 = arith.addf %39, %46 : vector<128x256xf32>
    %48 = vector.extract_strided_slice %47 {offsets = [0, 0], sizes = [64, 128], strides = [1, 1]} : vector<128x256xf32> to vector<64x128xf32>
    %49 = vector.extract_strided_slice %47 {offsets = [0, 128], sizes = [64, 128], strides = [1, 1]} : vector<128x256xf32> to vector<64x128xf32>
    %50 = vector.extract_strided_slice %47 {offsets = [64, 0], sizes = [64, 128], strides = [1, 1]} : vector<128x256xf32> to vector<64x128xf32>
    %51 = vector.extract_strided_slice %47 {offsets = [64, 128], sizes = [64, 128], strides = [1, 1]} : vector<128x256xf32> to vector<64x128xf32>
    %52 = arith.mulf %48, %48 : vector<64x128xf32>
    %53 = arith.mulf %49, %49 : vector<64x128xf32>
    %54 = arith.addf %52, %53 : vector<64x128xf32>
    %55 = math.sqrt %54 : vector<64x128xf32>
    %cst_29 = arith.constant 0.144337565 : f32
    %56 = vector.broadcast %cst_29 : f32 to vector<64x128xf32>
    %57 = arith.mulf %55, %56 : vector<64x128xf32>
    %cst_30 = arith.constant 1.000000e-07 : f32
    %58 = vector.broadcast %cst_30 : f32 to vector<64x128xf32>
    %59 = arith.addf %57, %58 : vector<64x128xf32>
    %60 = arith.mulf %50, %50 : vector<64x128xf32>
    %61 = arith.mulf %51, %51 : vector<64x128xf32>
    %62 = arith.addf %60, %61 : vector<64x128xf32>
    %63 = math.sqrt %62 : vector<64x128xf32>
    %cst_31 = arith.constant 0.144337565 : f32
    %64 = vector.broadcast %cst_31 : f32 to vector<64x128xf32>
    %65 = arith.mulf %63, %64 : vector<64x128xf32>
    %cst_32 = arith.constant 1.000000e-07 : f32
    %66 = vector.broadcast %cst_32 : f32 to vector<64x128xf32>
    %67 = arith.addf %65, %66 : vector<64x128xf32>
    %68 = tpu.iota {dimensions = array<i32: 0>} : vector<64x128xi32>
    %c64_i32 = arith.constant 64 : i32
    %69 = arith.muli %arg1, %c64_i32 : i32
    %70 = vector.broadcast %69 : i32 to vector<64x128xi32>
    %71 = arith.addi %68, %70 : vector<64x128xi32>
    %72 = tpu.iota {dimensions = array<i32: 1>} : vector<64x128xi32>
    %c61_i32 = arith.constant 61 : i32
    %73 = vector.broadcast %c61_i32 : i32 to vector<64x128xi32>
    %74 = arith.cmpi slt, %71, %73 : vector<64x128xi32>
    %c65_i32 = arith.constant 65 : i32
    %75 = vector.broadcast %c65_i32 : i32 to vector<64x128xi32>
    %76 = arith.cmpi slt, %72, %75 : vector<64x128xi32>
    %77 = arith.andi %74, %76 : vector<64x128xi1>
    %78 = arith.extui %77 : vector<64x128xi1> to vector<64x128xi32>
    %79 = arith.sitofp %78 : vector<64x128xi32> to vector<64x128xf32>
    %80 = arith.subf %59, %67 : vector<64x128xf32>
    %81 = arith.addf %59, %67 : vector<64x128xf32>
    %82 = tpu.reciprocal %67 : vector<64x128xf32> -> vector<64x128xf32>
    %83 = arith.mulf %59, %82 : vector<64x128xf32>
    %84 = math.log %83 : vector<64x128xf32>
    %85 = math.absf %84 : vector<64x128xf32>
    %c0_33 = arith.constant 0 : index
    %c0_34 = arith.constant 0 : index
    %c0_35 = arith.constant 0 : index
    %86 = vector.load %arg7[%c0_33, %c0_34, %c0_35] : memref<1x1x1xf32, #tpu.memory_space<vmem>>, vector<1x1x1xf32>
    %87 = vector.shape_cast %86 : vector<1x1x1xf32> to vector<1x1xf32>
    %88 = arith.mulf %80, %80 : vector<64x128xf32>
    %89 = arith.mulf %88, %79 : vector<64x128xf32>
    %90 = vector.shape_cast %89 : vector<64x128xf32> to vector<1x64x128xf32>
    %cst_36 = arith.constant dense<0.000000e+00> : vector<1xf32>
    %91 = vector.multi_reduction <add>, %90, %cst_36 [1, 2] : vector<1x64x128xf32> to vector<1xf32>
    %92 = vector.shape_cast %91 : vector<1xf32> to vector<1x1x1xf32>
    %93 = vector.extract %92[0, 0, 0] : f32 from vector<1x1x1xf32>
    %94 = vector.broadcast %93 : f32 to vector<1x1xf32>
    %95 = arith.addf %87, %94 : vector<1x1xf32>
    %c0_37 = arith.constant 0 : index
    %c0_38 = arith.constant 0 : index
    %c0_39 = arith.constant 0 : index
    %96 = vector.load %arg7[%c0_37, %c0_38, %c0_39] : memref<1x1x1xf32, #tpu.memory_space<vmem>>, vector<1x1x1xf32>
    %97 = vector.shape_cast %96 : vector<1x1x1xf32> to vector<1x1xf32>
    %98 = vector.shape_cast %95 : vector<1x1xf32> to vector<1x1x1xf32>
    tpu.vector_store %arg7[%c0_37, %c0_38, %c0_39], %98 {strides = array<i32>} : memref<1x1x1xf32, #tpu.memory_space<vmem>>, vector<1x1x1xf32>,
    %c0_40 = arith.constant 0 : index
    %c0_41 = arith.constant 0 : index
    %c0_42 = arith.constant 0 : index
    %99 = vector.load %arg8[%c0_40, %c0_41, %c0_42] : memref<1x1x1xf32, #tpu.memory_space<vmem>>, vector<1x1x1xf32>
    %100 = vector.shape_cast %99 : vector<1x1x1xf32> to vector<1x1xf32>
    %101 = arith.mulf %81, %81 : vector<64x128xf32>
    %102 = arith.mulf %101, %79 : vector<64x128xf32>
    %103 = vector.shape_cast %102 : vector<64x128xf32> to vector<1x64x128xf32>
    %cst_43 = arith.constant dense<0.000000e+00> : vector<1xf32>
    %104 = vector.multi_reduction <add>, %103, %cst_43 [1, 2] : vector<1x64x128xf32> to vector<1xf32>
    %105 = vector.shape_cast %104 : vector<1xf32> to vector<1x1x1xf32>
    %106 = vector.extract %105[0, 0, 0] : f32 from vector<1x1x1xf32>
    %107 = vector.broadcast %106 : f32 to vector<1x1xf32>
    %108 = arith.addf %100, %107 : vector<1x1xf32>
    %c0_44 = arith.constant 0 : index
    %c0_45 = arith.constant 0 : index
    %c0_46 = arith.constant 0 : index
    %109 = vector.load %arg8[%c0_44, %c0_45, %c0_46] : memref<1x1x1xf32, #tpu.memory_space<vmem>>, vector<1x1x1xf32>
    %110 = vector.shape_cast %109 : vector<1x1x1xf32> to vector<1x1xf32>
    %111 = vector.shape_cast %108 : vector<1x1xf32> to vector<1x1x1xf32>
    tpu.vector_store %arg8[%c0_44, %c0_45, %c0_46], %111 {strides = array<i32>} : memref<1x1x1xf32, #tpu.memory_space<vmem>>, vector<1x1x1xf32>,
    %c0_47 = arith.constant 0 : index
    %c0_48 = arith.constant 0 : index
    %c0_49 = arith.constant 0 : index
    %112 = vector.load %arg9[%c0_47, %c0_48, %c0_49] : memref<1x1x1xf32, #tpu.memory_space<vmem>>, vector<1x1x1xf32>
    %113 = vector.shape_cast %112 : vector<1x1x1xf32> to vector<1x1xf32>
    %114 = arith.mulf %85, %79 : vector<64x128xf32>
    %115 = vector.shape_cast %114 : vector<64x128xf32> to vector<1x64x128xf32>
    %cst_50 = arith.constant dense<0.000000e+00> : vector<1xf32>
    %116 = vector.multi_reduction <add>, %115, %cst_50 [1, 2] : vector<1x64x128xf32> to vector<1xf32>
    %117 = vector.shape_cast %116 : vector<1xf32> to vector<1x1x1xf32>
    %118 = vector.extract %117[0, 0, 0] : f32 from vector<1x1x1xf32>
    %119 = vector.broadcast %118 : f32 to vector<1x1xf32>
    %120 = arith.addf %113, %119 : vector<1x1xf32>
    %c0_51 = arith.constant 0 : index
    %c0_52 = arith.constant 0 : index
    %c0_53 = arith.constant 0 : index
    %121 = vector.load %arg9[%c0_51, %c0_52, %c0_53] : memref<1x1x1xf32, #tpu.memory_space<vmem>>, vector<1x1x1xf32>
    %122 = vector.shape_cast %121 : vector<1x1x1xf32> to vector<1x1xf32>
    %123 = vector.shape_cast %120 : vector<1x1xf32> to vector<1x1x1xf32>
    tpu.vector_store %arg9[%c0_51, %c0_52, %c0_53], %123 {strides = array<i32>} : memref<1x1x1xf32, #tpu.memory_space<vmem>>, vector<1x1x1xf32>,
    return
  }
  func.func @transform_0(%arg0: i32, %arg1: i32) -> (i32, i32, i32, i32) {
    %c0_i32 = arith.constant 0 : i32
    %c0_i32_0 = arith.constant 0 : i32
    %c0_i32_1 = arith.constant 0 : i32
    return %arg0, %arg1, %c0_i32, %c0_i32_0 : i32, i32, i32, i32
  }
  func.func @transform_1(%arg0: i32, %arg1: i32) -> (i32, i32, i32, i32) {
    %c1_i32 = arith.constant 1 : i32
    %0 = arith.addi %arg1, %c1_i32 : i32
    %c0_i32 = arith.constant 0 : i32
    %c0_i32_0 = arith.constant 0 : i32
    %c0_i32_1 = arith.constant 0 : i32
    return %arg0, %0, %c0_i32, %c0_i32_0 : i32, i32, i32, i32
  }
  func.func @transform_2(%arg0: i32, %arg1: i32) -> (i32, i32, i32, i32) {
    %c0_i32 = arith.constant 0 : i32
    %c0_i32_0 = arith.constant 0 : i32
    %c0_i32_1 = arith.constant 0 : i32
    return %arg0, %arg1, %c0_i32, %c0_i32_0 : i32, i32, i32, i32
  }
  func.func @transform_3(%arg0: i32, %arg1: i32) -> (i32, i32, i32, i32) {
    %c1_i32 = arith.constant 1 : i32
    %0 = arith.addi %arg1, %c1_i32 : i32
    %c0_i32 = arith.constant 0 : i32
    %c0_i32_0 = arith.constant 0 : i32
    %c0_i32_1 = arith.constant 0 : i32
    return %arg0, %0, %c0_i32, %c0_i32_0 : i32, i32, i32, i32
  }
  func.func @transform_4(%arg0: i32, %arg1: i32) -> (i32, i32, i32) {
    %c0_i32 = arith.constant 0 : i32
    %c0_i32_0 = arith.constant 0 : i32
    %c0_i32_1 = arith.constant 0 : i32
    %c0_i32_2 = arith.constant 0 : i32
    return %c0_i32, %c0_i32_0, %c0_i32_1 : i32, i32, i32
  }
  func.func @transform_5(%arg0: i32, %arg1: i32) -> (i32, i32, i32) {
    %c0_i32 = arith.constant 0 : i32
    %c0_i32_0 = arith.constant 0 : i32
    %c0_i32_1 = arith.constant 0 : i32
    return %arg0, %c0_i32, %c0_i32_0 : i32, i32, i32
  }
  func.func @transform_6(%arg0: i32, %arg1: i32) -> (i32, i32, i32) {
    %c0_i32 = arith.constant 0 : i32
    %c0_i32_0 = arith.constant 0 : i32
    %c0_i32_1 = arith.constant 0 : i32
    return %arg0, %c0_i32, %c0_i32_0 : i32, i32, i32
  }
  func.func @transform_7(%arg0: i32, %arg1: i32) -> (i32, i32, i32) {
    %c0_i32 = arith.constant 0 : i32
    %c0_i32_0 = arith.constant 0 : i32
    %c0_i32_1 = arith.constant 0 : i32
    return %arg0, %c0_i32, %c0_i32_0 : i32, i32, i32
  }
}

</mosaic_0001>

<bundles_post_ra>
// kernel: mss_loss.3
= control target key start
LH: loop header
LB: loop body
LE: loop exit
PB: predicated region body
PF: predicated region fallthrough
CT: control target
= control target key end

     0   :  { %s2315_s24 = smov 0   ;;  %s2317_s25 = smov 0   ;;  %s3154_s0 = inlined_call_operand.vmem [shape: bf16[2,2,64,32], index: 0, kind: input, shape index: {}, may-alias: {0,1}]   ;;  %s3155_s1 = inlined_call_operand.vmem [shape: bf16[2,2,64,32], index: 1, kind: input, shape index: {}, may-alias: {0,1}]   ;;  %s3156_s2 = inlined_call_operand.vmem [shape: bf16[2,2,64,32], index: 2, kind: input, shape index: {}, may-alias: {2,3}]   ;;  %s3157_s3 = inlined_call_operand.vmem [shape: bf16[2,2,64,32], index: 3, kind: input, shape index: {}, may-alias: {2,3}]   ;;  %s3158_s4 = inlined_call_operand.vmem [shape: bf16[4,32,256], index: 4, kind: input, shape index: {}]   ;;  %s3159_s5 = inlined_call_operand.vmem [shape: f32[2,1,1], index: 5, kind: output, shape index: {0}]   ;;  %s3160_s6 = inlined_call_operand.vmem [shape: f32[2,1,1], index: 6, kind: output, shape index: {1}]   ;;  %s3161_s7 = inlined_call_operand.vmem [shape: f32[2,1,1], index: 7, kind: output, shape index: {2}]  }
   0x1   :  { %s2319_s26 = smov 0  }
   0x2 LB: > { %s30_s27 = sadd.s32 1, %s2267_s25  ;;  %p2026_p0 = scmp.ge.s32.totalorder %s2271_s26, 1  ;;  %s2271_s26 = sphi %s2319_s26, %s18_s26   ;;  %s2267_s25 = sphi %s2317_s25, %s3163_s25   ;;  %s2263_s24 = sphi %s2315_s24, %s3162_s24  }
   0x3   : > { %p32_p1 = scmp.ge.s32.totalorder %s30_s27, 2  ;;  %p316_p2 = scmp.lt.s32.totalorder %s2271_s26, 3 }
   0x5   : > { %s3165_s27 = smov (%p32_p1, %s30_s27), 0  ;;  %p317_p3 = pnand %p2026_p0, %p316_p2 }
   0x6   : > { %p385_p4 = scmp.lt.s32.totalorder (!%p317_p3), %s2263_s24, 1 }
   0x7   : > { %320 = sbr.rel (%p317_p3) target bundleno = 617 (0x269), region = 40 }
   0xc   : > { %v2153_v0 = vld [vmem:[%s3158_s4 + $0x14] ss:$8 sps:$4 sm:$0xff]   ;;  %v2155_v1 = vld [vmem:[%s3158_s4 + $0x10] ss:$8 sps:$4 sm:$0xff]   ;;  %v2273_v2 = vmov 0   ;;  %s3167_s24 = smov (!%p385_p4, %s2263_s24), 1 }
   0xd   : > { %855 = vmatprep.mubr.bf16.mxu1 %v2273_v2  ;;  %698 = vmatprep.mubr.bf16.mxu0 %v2273_v2  ;;  %v2156_v3 = vld [vmem:[%s3158_s4 + $0x34] ss:$8 sps:$4 sm:$0xff]   ;;  %v2158_v4 = vld [vmem:[%s3158_s4 + $0x30] ss:$8 sps:$4 sm:$0xff]   ;;  %v2159_v5 = vld [vmem:[%s3158_s4 + $0x4] ss:$8 sps:$4 sm:$0xff]   ;;  %s3113_s15 = scalar_lea.vmem %s3159_s5, %s3167_s24  ;;  %s3122_s18 = scalar_lea.vmem %s3160_s6, %s3167_s24 }
   0xe   : > { %835 = vmatprep.subr.bf16.mxu1 %v2153_v0  ;;  %v2161_v6 = vld [vmem:[%s3158_s4] ss:$8 sps:$4 sm:$0xff]   ;;  %678 = vmatprep.subr.bf16.mxu0 %v2156_v3  ;;  %v2162_v7 = vld [vmem:[%s3158_s4 + $0x24] ss:$8 sps:$4 sm:$0xff]   ;;  %s2359_s19 = sshll.u32 %s3167_s24, 6  ;;  %vm641_vm0 = vcmask 261120   ;;  %s3131_s22 = scalar_lea.vmem %s3161_s7, %s3167_s24 }
   0xf   : > { %836 = vmatpush1.bf16.msra.mxu1 %v2155_v1  ;;  %679 = vmatpush1.bf16.msra.mxu0 %v2158_v4  ;;  %v2164_v8 = vld [vmem:[%s3158_s4 + $0x20] ss:$8 sps:$4 sm:$0xff]   ;;  %s2368_s28 = scalar_lea.vmem %s3154_s0, %s2359_s19  ;;  %v2168_v10 = vld [vmem:[%s3158_s4 + $0x54] ss:$8 sps:$4 sm:$0xff]   ;;  %v2170_v14 = vld [vmem:[%s3158_s4 + $0x70] ss:$8 sps:$4 sm:$0xff]   ;;  %s2400_s14 = scalar_lea.vmem %s3156_s2, %s2359_s19 }
  0x10   : > { %837 = vmatprep.subr.bf16.mxu1 %v2159_v5  ;;  %680 = vmatprep.subr.bf16.mxu0 %v2162_v7  ;;  %v2165_v9 = vld [vmem:[%s2368_s28] sm:$0xff]   ;;  %v2169_v13 = vld [vmem:[%s2368_s28 + $0x8] sm:$0xff]   ;;  %v2172_v15 = vld [vmem:[%s3158_s4 + $0x74] ss:$8 sps:$4 sm:$0xff]   ;;  %vm936_vm1 = vcmask 1045504   ;;  %vm548_vm2 = vcmask 1046528  }
  0x11   : > { %v2374_v11 = vunpack.c.l.bf16 %v2165_v9  ;;  %v2376_v12 = vunpack.c.h.bf16 %v2165_v9  ;;  %v2388_v18 = vunpack.c.l.bf16 %v2169_v13  ;;  %v2173_v21 = vld [vmem:[%s2368_s28 + $0x10] sm:$0xff]   ;;  %v2394_v22 = vunpack.c.h.bf16 %v2169_v13  ;;  %v2174_v30 = vld [vmem:[%s2368_s28 + $0x18] sm:$0xff]   ;;  %v2178_v33 = vld [vmem:[%s3158_s4 + $0x44] ss:$8 sps:$4 sm:$0xff]   ;;  %s2115_s20 = sadd.s32 32, %s2359_s19 }
  0x12   : > { %v2407_v26 = vunpack.c.l.bf16 %v2173_v21  ;;  %v2166_v27 = vld [vmem:[%s3158_s4 + $0x50] ss:$8 sps:$4 sm:$0xff]   ;;  %v2180_v34 = vld [vmem:[%s3158_s4 + $0x60] ss:$8 sps:$4 sm:$0xff]   ;;  %v2182_v35 = vld [vmem:[%s3158_s4 + $0x64] ss:$8 sps:$4 sm:$0xff]   ;;  %v2431_v38 = vunpack.c.h.bf16 %v2173_v21  ;;  %v2433_v39 = vunpack.c.l.bf16 %v2174_v30  ;;  %s403_s10 = scalar_lea.vmem %s3155_s1, %s2115_s20  ;;  %v2447_v46 = vunpack.c.h.bf16 %v2174_v30  ;;  %s423_s13 = scalar_lea.vmem %s3157_s3, %s2115_s20 }
  0x13   : > { %838 = vmatpush1.bf16.msra.mxu1 %v2161_v6  ;;  %681 = vmatpush1.bf16.msra.mxu0 %v2164_v8  ;;  %v937_v16 = vrot.slane %v2374_v11, 2  ;;  %v938_v17 = vrot.slane %v2376_v12, 2  ;;  %v549_v19 = vrot.slane %v2374_v11, 1  ;;  %v550_v20 = vrot.slane %v2376_v12, 1  ;;  %v2176_v40 = vld [vmem:[%s3158_s4 + $0x40] ss:$8 sps:$4 sm:$0xff]  }
  0x14   : > { %1056 = vmatprep.subr.bf16.mxu0 %v2168_v10  ;;  %1309 = vmatprep.subr.bf16.mxu1 %v2172_v15  ;;  %v552_v25 = vrot.slane %v2388_v18, 1  ;;  %v554_v29 = vrot.slane %v2394_v22, 1  ;;  %v556_v32 = vrot.slane %v2407_v26, 1  ;;  %v940_v42 = vrot.slane %v2388_v18, 2  ;;  %v451_v45 = vld [vmem:[%s403_s10] sm:$0x3] }
  0x15   : > { %v2403_v23 = vsel %vm936_vm1, %v937_v16, %v938_v17  ;;  %v551_v24 = vsel %vm548_vm2, %v549_v19, %v550_v20  ;;  %v558_v43 = vrot.slane %v2431_v38, 1  ;;  %v560_v44 = vrot.slane %v2433_v39, 1  ;;  %v2175_v54 = vld [vmem:[%s2400_s14] sm:$0xff]   ;;  %v2467_v57 = vld [vmem:[%s2400_s14 + $0x8] sm:$0xff]   ;;  %v2479_v63 = vld [vmem:[%s2400_s14 + $0x10] sm:$0xff]  }
  0x16   : > { %2063 = vmatmul.mubr.msk.bf16.vlgmr.msra.gmra.mxu1 %vm641_vm0, %v2165_v9  ;;  %v553_v28 = vsel %vm548_vm2, %v550_v20, %v552_v25  ;;  %v555_v36 = vsel %vm548_vm2, %v552_v25, %v554_v29  ;;  %v557_v37 = vsel %vm548_vm2, %v554_v29, %v556_v32  ;;  %v2455_v49 = vunpack.c.l.bf16 %v451_v45  ;;  %v2523_v20 = vld [vmem:[%s2400_s14 + $0x18] sm:$0xff]  }
  0x17   : > { %865 = vmatprep.mubr.bf16.mxu1 %v2273_v2  ;;  %1310 = vmatpush1.bf16.msra.mxu1 %v2170_v14  ;;  %v608_v31 = vpack.c.bf16 %v553_v28, %v551_v24  ;;  %v609_v41 = vpack.c.bf16 %v557_v37, %v555_v36  ;;  %v559_v47 = vsel %vm548_vm2, %v556_v32, %v558_v43  ;;  %v942_v52 = vrot.slane %v2394_v22, 2 }
  0x18   : > { %1311 = vmatprep.subr.bf16.mxu1 %v2182_v35  ;;  %v561_v48 = vsel %vm548_vm2, %v558_v43, %v560_v44  ;;  %v2458_v50 = vsel %vm936_vm1, %v938_v17, %v940_v42  ;;  %v562_v53 = vrot.slane %v2447_v46, 1  ;;  %v944_v55 = vrot.slane %v2407_v26, 2 }
  0x19   : > { %2051 = vmatmul.mubr.msk.bf16.vlgmr.msra.gmra.mxu0 %vm641_vm0, %v608_v31  ;;  %v987_v51 = vpack.c.bf16 %v2458_v50, %v2403_v23  ;;  %v610_v56 = vpack.c.bf16 %v561_v48, %v559_v47  ;;  %v2470_v58 = vsel %vm936_vm1, %v940_v42, %v942_v52  ;;  %v946_v59 = vrot.slane %v2431_v38, 2  ;;  %v484_v31 = vld [vmem:[%s423_s13] sm:$0x3] }
  0x1a   : > { %1057 = vmatpush1.bf16.msra.mxu0 %v2166_v27  ;;  %708 = vmatprep.mubr.bf16.mxu0 %v2273_v2  ;;  %v948_v60 = vrot.slane %v2433_v39, 2  ;;  %v564_v61 = vrot.slane %v2455_v49, 1  ;;  %v2476_v62 = vsel %vm936_vm1, %v942_v52, %v944_v55  ;;  %v2489_v4 = vunpack.c.l.bf16 %v2175_v54 }
  0x1b   : > { %1058 = vmatprep.subr.bf16.mxu0 %v2178_v33  ;;  %1312 = vmatpush1.bf16.msra.mxu1 %v2180_v34  ;;  %v988_v0 = vpack.c.bf16 %v2476_v62, %v2470_v58  ;;  %v2484_v1 = vsel %vm936_vm1, %v944_v55, %v946_v59  ;;  %v2491_v5 = vunpack.c.h.bf16 %v2175_v54  ;;  %v950_v7 = vrot.slane %v2447_v46, 2 }
  0x1c   : > { %v2487_v3 = vsel %vm936_vm1, %v946_v59, %v948_v60  ;;  %v563_v8 = vsel %vm548_vm2, %v560_v44, %v562_v53  ;;  %v2500_v9 = vunpack.c.l.bf16 %v2467_v57  ;;  %v952_v10 = vrot.slane %v2455_v49, 2 }
  0x1d   : > { %v989_v6 = vpack.c.bf16 %v2487_v3, %v2484_v1  ;;  %v2512_v14 = vsel %vm936_vm1, %v948_v60, %v950_v7  ;;  %v962_v15 = vrot.slane %v2489_v4, 2  ;;  %v963_v16 = vrot.slane %v2491_v5, 2 }
  0x1e   : > { %2064 = vmatmul.mubr.msk.bf16.gmra.mxu1 %vm641_vm0, %v2169_v13  ;;  %1059 = vmatpush1.bf16.msra.mxu0 %v2176_v40  ;;  %v565_v13 = vsel %vm548_vm2, %v562_v53, %v564_v61  ;;  %v2517_v17 = vunpack.c.h.bf16 %v2467_v57  ;;  %v2520_v19 = vunpack.c.l.bf16 %v2479_v63  ;;  %v2529_v24 = vunpack.c.h.bf16 %v2479_v63 }
  0x1f   : > { %875 = vmatprep.mubr.bf16.mxu1 %v2273_v2  ;;  %v2534_v27 = vsel %vm936_vm1, %v962_v15, %v963_v16  ;;  %v965_v28 = vrot.slane %v2500_v9, 2  ;;  %v611_v29 = vpack.c.bf16 %v565_v13, %v563_v8  ;;  %v584_v34 = vrot.slane %v2491_v5, 1 }
  0x20   : > { %v967_v32 = vrot.slane %v2517_v17, 2  ;;  %v969_v33 = vrot.slane %v2520_v19, 2  ;;  %v586_v35 = vrot.slane %v2500_v9, 1  ;;  %v971_v37 = vrot.slane %v2529_v24, 2 }
  0x21   : > { %2052 = vmatmul.mubr.msk.bf16.gmra.mxu0 %vm641_vm0, %v609_v41  ;;  %v2543_v36 = vsel %vm936_vm1, %v963_v16, %v965_v28  ;;  %v2547_v40 = vunpack.c.l.bf16 %v2523_v20  ;;  %v2555_v43 = vunpack.c.h.bf16 %v2523_v20  ;;  %v2557_v44 = vunpack.c.l.bf16 %v484_v31 }
  0x22   : > { %718 = vmatprep.mubr.bf16.mxu0 %v2273_v2  ;;  %v991_v41 = vpack.c.bf16 %v2543_v36, %v2534_v27  ;;  %v2552_v42 = vsel %vm936_vm1, %v965_v28, %v967_v32  ;;  %v2560_v45 = vsel %vm936_vm1, %v967_v32, %v969_v33  ;;  %v2567_v48 = vsel %vm936_vm1, %v969_v33, %v971_v37 }
  0x23   : > { %v992_v47 = vpack.c.bf16 %v2560_v45, %v2552_v42  ;;  %v973_v52 = vrot.slane %v2547_v40, 2  ;;  %v587_v55 = vsel %vm548_vm2, %v584_v34, %v586_v35  ;;  %v590_v13 = vrot.slane %v2520_v19, 1 }
  0x24   : > { %v594_v31 = vrot.slane %v2547_v40, 1  ;;  %v1190_v33 = vrot.slane %v2374_v11, 3  ;;  %vm1189_vm3 = vcmask 1044480  }
  0x25   : > { %v2577_v59 = vsel %vm936_vm1, %v971_v37, %v973_v52  ;;  %v1193_v37 = vrot.slane %v2388_v18, 3 }
  0x26   : > { %2065 = vmatmul.mubr.msk.bf16.gmra.mxu1 %vm641_vm0, %v2173_v21  ;;  %v2526_v21 = vsel %vm936_vm1, %v950_v7, %v952_v10  ;;  %v993_v60 = vpack.c.bf16 %v2577_v59, %v2567_v48  ;;  %v588_v10 = vrot.slane %v2517_v17, 1 }
  0x27   : > { %885 = vmatprep.mubr.bf16.mxu1 %v2273_v2  ;;  %v990_v25 = vpack.c.bf16 %v2526_v21, %v2512_v14 }
  0x28   : > { %v589_v16 = vsel %vm548_vm2, %v586_v35, %v588_v10  ;;  %v591_v28 = vsel %vm548_vm2, %v588_v10, %v590_v13 }
  0x29   : > { %2053 = vmatmul.mubr.msk.bf16.gmra.mxu0 %vm641_vm0, %v610_v56  ;;  %v975_v56 = vrot.slane %v2555_v43, 2 }
  0x2a   : > { %728 = vmatprep.mubr.bf16.mxu0 %v2273_v2 }
  0x2b   : > { %v2582_v61 = vsel %vm936_vm1, %v973_v52, %v975_v56  ;;  %v596_v52 = vrot.slane %v2555_v43, 1 }
  0x2d   : > { %v597_v11 = vsel %vm548_vm2, %v594_v31, %v596_v52 }
  0x2e   : > { %2066 = vmatmul.mubr.msk.bf16.gmra.mxu1 %vm641_vm0, %v2174_v30  ;;  %v583_v30 = vrot.slane %v2489_v4, 1 }
  0x2f   : > { %895 = vmatprep.mubr.bf16.mxu1 %v2273_v2 }
  0x30   : > { %v585_v53 = vsel %vm548_vm2, %v583_v30, %v584_v34  ;;  %v592_v30 = vrot.slane %v2529_v24, 1  ;;  %v1191_v34 = vrot.slane %v2376_v12, 3 }
  0x31   : > { %2054 = vmatmul.mubr.msk.bf16.gmra.mxu0 %vm641_vm0, %v611_v29  ;;  %v612_v7 = vpack.c.bf16 %v587_v55, %v585_v53  ;;  %v613_v29 = vpack.c.bf16 %v591_v28, %v589_v16  ;;  %v598_v53 = vrot.slane %v2557_v44, 1  ;;  %v1199_v16 = vrot.slane %v2431_v38, 3 }
  0x32   : > { %738 = vmatprep.mubr.bf16.mxu0 %v2273_v2  ;;  %v595_v32 = vsel %vm548_vm2, %v592_v30, %v594_v31  ;;  %v1194_v18 = vsel %vm1189_vm3, %v1191_v34, %v1193_v37  ;;  %v1201_v28 = vrot.slane %v2433_v39, 3  ;;  %v1203_v38 = vrot.slane %v2447_v46, 3 }
  0x33   : > { %v599_v12 = vsel %vm548_vm2, %v596_v52, %v598_v53  ;;  %v1205_v39 = vrot.slane %v2455_v49, 3  ;;  %v1215_v46 = vrot.slane %v2489_v4, 3  ;;  %v1216_v49 = vrot.slane %v2491_v5, 3 }
  0x34   : > { %v615_v55 = vpack.c.bf16 %v599_v12, %v597_v11  ;;  %v1204_v23 = vsel %vm1189_vm3, %v1201_v28, %v1203_v38  ;;  %v1220_v4 = vrot.slane %v2517_v17, 3  ;;  %v1222_v5 = vrot.slane %v2520_v19, 3 }
  0x35   : > { %v1206_v50 = vsel %vm1189_vm3, %v1203_v38, %v1205_v39  ;;  %v1217_v58 = vsel %vm1189_vm3, %v1215_v46, %v1216_v49  ;;  %v1226_v17 = vrot.slane %v2547_v40, 3 }
  0x36   : > { %2067 = vmatmul.mubr.msk.bf16.gmra.mxu1 %vm641_vm0, %v2175_v54  ;;  %v977_v54 = vrot.slane %v2557_v44, 2  ;;  %v1223_v3 = vsel %vm1189_vm3, %v1220_v4, %v1222_v5 }
  0x37   : > { %905 = vmatprep.mubr.bf16.mxu1 %v2273_v2 }
  0x38   : > { %v2585_v8 = vsel %vm936_vm1, %v975_v56, %v977_v54  ;;  %v1195_v54 = vrot.slane %v2394_v22, 3 }
  0x39   : > { %v994_v15 = vpack.c.bf16 %v2585_v8, %v2582_v61  ;;  %2055 = vmatmul.mubr.msk.bf16.gmra.mxu0 %vm641_vm0, %v612_v7  ;;  %v1197_v7 = vrot.slane %v2407_v26, 3  ;;  %v1202_v26 = vsel %vm1189_vm3, %v1199_v16, %v1201_v28 }
  0x3a   : > { %748 = vmatprep.mubr.bf16.mxu0 %v2273_v2 }
  0x3b   : > { %v1198_v10 = vsel %vm1189_vm3, %v1195_v54, %v1197_v7  ;;  %v1200_v22 = vsel %vm1189_vm3, %v1197_v7, %v1199_v16 }
  0x3e   : > { %2068 = vmatmul.mubr.msk.bf16.gmra.mxu1 %vm641_vm0, %v2467_v57  ;;  %v593_v57 = vsel %vm548_vm2, %v590_v13, %v592_v30  ;;  %v1218_v30 = vrot.slane %v2500_v9, 3  ;;  %v1224_v9 = vrot.slane %v2529_v24, 3  ;;  %v1228_v24 = vrot.slane %v2555_v43, 3 }
  0x3f   : > { %915 = vmatprep.mubr.bf16.mxu1 %v2273_v2  ;;  %v614_v35 = vpack.c.bf16 %v595_v32, %v593_v57 }
  0x40   : > { %v1219_v62 = vsel %vm1189_vm3, %v1216_v49, %v1218_v30  ;;  %v1221_v1 = vsel %vm1189_vm3, %v1218_v30, %v1220_v4  ;;  %v1225_v14 = vsel %vm1189_vm3, %v1222_v5, %v1224_v9  ;;  %v1227_v19 = vsel %vm1189_vm3, %v1224_v9, %v1226_v17 }
  0x41   : > { %2056 = vmatmul.mubr.msk.bf16.gmra.mxu0 %vm641_vm0, %v613_v29  ;;  %v1242_v29 = vpack.c.bf16 %v1202_v26, %v1200_v22  ;;  %v1246_v21 = vpack.c.bf16 %v1227_v19, %v1225_v14  ;;  %v1229_v27 = vsel %vm1189_vm3, %v1226_v17, %v1228_v24 }
  0x42   : > { %758 = vmatprep.mubr.bf16.mxu0 %v2273_v2 }
  0x46   : > { %2069 = vmatmul.mubr.msk.bf16.gmra.mxu1 %vm641_vm0, %v2479_v63  ;;  %v1192_v63 = vsel %vm1189_vm3, %v1190_v33, %v1191_v34 }
  0x47   : > { %925 = vmatprep.mubr.bf16.mxu1 %v2273_v2  ;;  %v1240_v56 = vpack.c.bf16 %v1194_v18, %v1192_v63 }
  0x49   : > { %2057 = vmatmul.mubr.msk.bf16.gmra.mxu0 %vm641_vm0, %v614_v35 }
  0x4a   : > { %768 = vmatprep.mubr.bf16.mxu0 %v2273_v2 }
  0x4e   : > { %2070 = vmatmul.mubr.msk.bf16.gmra.mxu1 %vm641_vm0, %v2523_v20  ;;  %v1196_v20 = vsel %vm1189_vm3, %v1193_v37, %v1195_v54 }
  0x4f   : > { %1329 = vmatprep.mubr.bf16.mxu1 %v2273_v2  ;;  %v1241_v13 = vpack.c.bf16 %v1198_v10, %v1196_v20 }
  0x51   : > { %2058 = vmatmul.mubr.msk.bf16.gmra.mxu0 %vm641_vm0, %v615_v55 }
  0x52   : > { %1076 = vmatprep.mubr.bf16.mxu0 %v2273_v2 }
  0x56   : > { %2095 = vmatmul.mubr.msk.bf16.vlgmr.msra.gmra.mxu1 %vm641_vm0, %v1240_v56 }
  0x57   : > { %1339 = vmatprep.mubr.bf16.mxu1 %v2273_v2 }
  0x59   : > { %2079 = vmatmul.mubr.msk.bf16.vlgmr.msra.gmra.mxu0 %vm641_vm0, %v987_v51  ;;  %v1243_v51 = vpack.c.bf16 %v1206_v50, %v1204_v23 }
  0x5a   : > { %1086 = vmatprep.mubr.bf16.mxu0 %v2273_v2 }
  0x5e   : > { %2096 = vmatmul.mubr.msk.bf16.gmra.mxu1 %vm641_vm0, %v1241_v13 }
  0x5f   : > { %1349 = vmatprep.mubr.bf16.mxu1 %v2273_v2 }
  0x61   : > { %2080 = vmatmul.mubr.msk.bf16.gmra.mxu0 %vm641_vm0, %v988_v0  ;;  %v1244_v0 = vpack.c.bf16 %v1219_v62, %v1217_v58 }
  0x62   : > { %1096 = vmatprep.mubr.bf16.mxu0 %v2273_v2 }
  0x66   : > { %2097 = vmatmul.mubr.msk.bf16.gmra.mxu1 %vm641_vm0, %v1242_v29 }
  0x67   : > { %1359 = vmatprep.mubr.bf16.mxu1 %v2273_v2 }
  0x69   : > { %2081 = vmatmul.mubr.msk.bf16.gmra.mxu0 %vm641_vm0, %v989_v6  ;;  %v1245_v6 = vpack.c.bf16 %v1223_v3, %v1221_v1 }
  0x6a   : > { %1106 = vmatprep.mubr.bf16.mxu0 %v2273_v2 }
  0x6e   : > { %2098 = vmatmul.mubr.msk.bf16.gmra.mxu1 %vm641_vm0, %v1243_v51 }
  0x6f   : > { %1369 = vmatprep.mubr.bf16.mxu1 %v2273_v2 }
  0x71   : > { %2082 = vmatmul.mubr.msk.bf16.gmra.mxu0 %vm641_vm0, %v990_v25  ;;  %v1230_v25 = vrot.slane %v2557_v44, 3 }
  0x72   : > { %1116 = vmatprep.mubr.bf16.mxu0 %v2273_v2 }
  0x73   : > { %v1231_v36 = vsel %vm1189_vm3, %v1228_v24, %v1230_v25 }
  0x74   : > { %v1247_v40 = vpack.c.bf16 %v1231_v36, %v1229_v27 }
  0x76   : > { %2099 = vmatmul.mubr.msk.bf16.gmra.mxu1 %vm641_vm0, %v1244_v0 }
  0x77   : > { %1379 = vmatprep.mubr.bf16.mxu1 %v2273_v2 }
  0x79   : > { %2083 = vmatmul.mubr.msk.bf16.gmra.mxu0 %vm641_vm0, %v991_v41 }
  0x7a   : > { %1126 = vmatprep.mubr.bf16.mxu0 %v2273_v2 }
  0x7e   : > { %2100 = vmatmul.mubr.msk.bf16.gmra.mxu1 %vm641_vm0, %v1245_v6 }
  0x7f   : > { %1389 = vmatprep.mubr.bf16.mxu1 %v2273_v2 }
  0x81   : > { %2084 = vmatmul.mubr.msk.bf16.gmra.mxu0 %vm641_vm0, %v992_v47 }
  0x82   : > { %1136 = vmatprep.mubr.bf16.mxu0 %v2273_v2 }
  0x86   : > { %2101 = vmatmul.mubr.msk.bf16.gmra.mxu1 %vm641_vm0, %v1246_v21 }
  0x87   : > { %1399 = vmatprep.mubr.bf16.mxu1 %v2273_v2 }
  0x89   : > { %2085 = vmatmul.mubr.msk.bf16.gmra.mxu0 %vm641_vm0, %v993_v60 }
  0x8a   : > { %1146 = vmatprep.mubr.bf16.mxu0 %v2273_v2 }
  0x8e   : > { %2102 = vmatmul.mubr.msk.bf16.gmra.mxu1 %vm641_vm0, %v1247_v40 }
  0x91   : > { %2086 = vmatmul.mubr.msk.bf16.gmra.mxu0 %vm641_vm0, %v994_v15 }
  0xd6   : > { %v857_v41 = vpop.f32.mrf.mxu1 }
  0xd8   : > { %v859_v42 = vpop.f32.mrf.mxu1 }
  0xd9   : > { %v700_v45 = vpop.f32.mrf.mxu0 }
  0xda   : > { %v861_v43 = vpop.f32.mrf.mxu1  ;;  %v2706_v31 = vadd.f32 %v857_v41, %v700_v45 }
  0xdb   : > { %v702_v48 = vpop.f32.mrf.mxu0 }
  0xdc   : > { %v863_v44 = vpop.f32.mrf.mxu1  ;;  %v2708_v60 = vadd.f32 %v859_v42, %v702_v48 }
  0xdd   : > { %v704_v57 = vpop.f32.mrf.mxu0 }
  0xde   : > { %v867_v47 = vpop.f32.mrf.mxu1  ;;  %v2710_v2 = vadd.f32 %v861_v43, %v704_v57 }
  0xdf   : > { %v706_v33 = vpop.f32.mrf.mxu0 }
  0xe0   : > { %v869_v59 = vpop.f32.mrf.mxu1  ;;  %v2712_v8 = vadd.f32 %v863_v44, %v706_v33 }
  0xe1   : > { %v710_v15 = vpop.f32.mrf.mxu0 }
  0xe2   : > { %v871_v32 = vpop.f32.mrf.mxu1  ;;  %v2714_v35 = vadd.f32 %v867_v47, %v710_v15 }
  0xe3   : > { %v712_v37 = vpop.f32.mrf.mxu0 }
  0xe4   : > { %v873_v61 = vpop.f32.mrf.mxu1  ;;  %v2716_v53 = vadd.f32 %v869_v59, %v712_v37 }
  0xe5   : > { %v714_v63 = vpop.f32.mrf.mxu0 }
  0xe6   : > { %v877_v34 = vpop.f32.mrf.mxu1  ;;  %v2718_v12 = vadd.f32 %v871_v32, %v714_v63 }
  0xe7   : > { %v716_v18 = vpop.f32.mrf.mxu0 }
  0xe8   : > { %v879_v52 = vpop.f32.mrf.mxu1  ;;  %v2720_v56 = vadd.f32 %v873_v61, %v716_v18 }
  0xe9   : > { %v720_v54 = vpop.f32.mrf.mxu0 }
  0xea   : > { %v881_v11 = vpop.f32.mrf.mxu1  ;;  %v2722_v20 = vadd.f32 %v877_v34, %v720_v54 }
  0xeb   : > { %v722_v10 = vpop.f32.mrf.mxu0 }
  0xec   : > { %v883_v55 = vpop.f32.mrf.mxu1  ;;  %v2724_v16 = vadd.f32 %v879_v52, %v722_v10 }
  0xed   : > { %v724_v28 = vpop.f32.mrf.mxu0 }
  0xee   : > { %v887_v7 = vpop.f32.mrf.mxu1  ;;  %v2726_v26 = vadd.f32 %v881_v11, %v724_v28 }
  0xef   : > { %v726_v29 = vpop.f32.mrf.mxu0 }
  0xf0   : > { %v889_v13 = vpop.f32.mrf.mxu1  ;;  %v2728_v39 = vadd.f32 %v883_v55, %v726_v29 }
  0xf1   : > { %v730_v23 = vpop.f32.mrf.mxu0 }
  0xf2   : > { %v891_v22 = vpop.f32.mrf.mxu1  ;;  %v2730_v51 = vadd.f32 %v887_v7, %v730_v23 }
  0xf3   : > { %v732_v46 = vpop.f32.mrf.mxu0 }
  0xf4   : > { %v893_v38 = vpop.f32.mrf.mxu1  ;;  %v2732_v30 = vadd.f32 %v889_v13, %v732_v46 }
  0xf5   : > { %v734_v58 = vpop.f32.mrf.mxu0 }
  0xf6   : > { %v897_v50 = vpop.f32.mrf.mxu1  ;;  %v2734_v0 = vadd.f32 %v891_v22, %v734_v58 }
  0xf7   : > { %v736_v4 = vpop.f32.mrf.mxu0 }
  0xf8   : > { %v899_v49 = vpop.f32.mrf.mxu1  ;;  %v2736_v1 = vadd.f32 %v893_v38, %v736_v4 }
  0xf9   : > { %v740_v3 = vpop.f32.mrf.mxu0 }
  0xfa   : > { %v901_v62 = vpop.f32.mrf.mxu1  ;;  %v2738_v9 = vadd.f32 %v897_v50, %v740_v3 }
  0xfb   : > { %v742_v17 = vpop.f32.mrf.mxu0 }
  0xfc   : > { %v903_v5 = vpop.f32.mrf.mxu1  ;;  %v2740_v19 = vadd.f32 %v899_v49, %v742_v17 }
  0xfd   : > { %v744_v21 = vpop.f32.mrf.mxu0 }
  0xfe   : > { %v907_v6 = vpop.f32.mrf.mxu1  ;;  %v2742_v25 = vadd.f32 %v901_v62, %v744_v21 }
  0xff   : > { %v746_v27 = vpop.f32.mrf.mxu0 }
 0x100   : > { %v909_v14 = vpop.f32.mrf.mxu1  ;;  %v2744_v40 = vadd.f32 %v903_v5, %v746_v27 }
 0x101   : > { %v750_v41 = vpop.f32.mrf.mxu0 }
 0x102   : > { %v911_v24 = vpop.f32.mrf.mxu1  ;;  %v2746_v43 = vadd.f32 %v907_v6, %v750_v41 }
 0x103   : > { %v752_v44 = vpop.f32.mrf.mxu0 }
 0x104   : > { %v913_v36 = vpop.f32.mrf.mxu1  ;;  %v2748_v47 = vadd.f32 %v909_v14, %v752_v44 }
 0x105   : > { %v754_v48 = vpop.f32.mrf.mxu0 }
 0x106   : > { %v917_v42 = vpop.f32.mrf.mxu1  ;;  %v2750_v57 = vadd.f32 %v911_v24, %v754_v48 }
 0x107   : > { %v756_v32 = vpop.f32.mrf.mxu0 }
 0x108   : > { %v919_v45 = vpop.f32.mrf.mxu1  ;;  %v2752_v61 = vadd.f32 %v913_v36, %v756_v32 }
 0x109   : > { %v760_v15 = vpop.f32.mrf.mxu0 }
 0x10a   : > { %v921_v59 = vpop.f32.mrf.mxu1  ;;  %v2754_v37 = vadd.f32 %v917_v42, %v760_v15 }
 0x10b   : > { %v762_v52 = vpop.f32.mrf.mxu0 }
 0x10c   : > { %v923_v33 = vpop.f32.mrf.mxu1  ;;  %v2758_v11 = vadd.f32 %v919_v45, %v762_v52 }
 0x10d   : > { %v764_v18 = vpop.f32.mrf.mxu0 }
 0x10e   : > { %v927_v34 = vpop.f32.mrf.mxu1  ;;  %v2762_v54 = vadd.f32 %v921_v59, %v764_v18 }
 0x10f   : > { %v766_v7 = vpop.f32.mrf.mxu0 }
 0x110   : > { %v2756_v63 = vpop.f32.mrf.mxu1  ;;  %v2766_v13 = vadd.f32 %v923_v33, %v766_v7 }
 0x111   : > { %v770_v28 = vpop.f32.mrf.mxu0 }
 0x112   : > { %v2760_v55 = vpop.f32.mrf.mxu1  ;;  %v2768_v29 = vadd.f32 %v927_v34, %v770_v28 }
 0x113   : > { %v2770_v38 = vpop.f32.mrf.mxu0 }
 0x114   : > { %v2764_v10 = vpop.f32.mrf.mxu1 }
 0x115   : > { %v2772_v50 = vpop.f32.mrf.mxu0 }
 0x116   : > { %v1331_v22 = vpop.f32.mrf.mxu1 }
 0x117   : > { %v2774_v49 = vpop.f32.mrf.mxu0 }
 0x118   : > { %v1333_v23 = vpop.f32.mrf.mxu1 }
 0x119   : > { %v1078_v62 = vpop.f32.mrf.mxu0 }
 0x11a   : > { %v1335_v46 = vpop.f32.mrf.mxu1  ;;  %v1157_v5 = vadd.f32 %v1078_v62, %v2706_v31 }
 0x11b   : > { %v1080_v3 = vpop.f32.mrf.mxu0 }
 0x11c   : > { %v1337_v58 = vpop.f32.mrf.mxu1  ;;  %v1410_v17 = vadd.f32 %v1331_v22, %v1157_v5  ;;  %v1158_v14 = vadd.f32 %v1080_v3, %v2708_v60 }
 0x11d   : > { %v1082_v21 = vpop.f32.mrf.mxu0 }
 0x11e   : > { %v1341_v4 = vpop.f32.mrf.mxu1  ;;  %v1411_v27 = vadd.f32 %v1333_v23, %v1158_v14  ;;  %v1159_v36 = vadd.f32 %v1082_v21, %v2710_v2  ;;  %v1442_v44 = vmul.f32 %v1410_v17, %v1410_v17 }
 0x11f   : > { %v1084_v41 = vpop.f32.mrf.mxu0 }
 0x120   : > { %v1343_v6 = vpop.f32.mrf.mxu1  ;;  %v1450_v45 = vmul.f32 %v1411_v27, %v1411_v27  ;;  %v1160_v48 = vadd.f32 %v1084_v41, %v2712_v8  ;;  %v1412_v59 = vadd.f32 %v1335_v46, %v1159_v36 }
 0x121   : > { %v1088_v32 = vpop.f32.mrf.mxu0 }
 0x122   : > { %v1345_v24 = vpop.f32.mrf.mxu1  ;;  %v2780_v31 = vadd.f32 %v1450_v45, %v1442_v44  ;;  %v1413_v15 = vadd.f32 %v1337_v58, %v1160_v48  ;;  %v1161_v34 = vadd.f32 %v1088_v32, %v2714_v35  ;;  %v1443_v18 = vmul.f32 %v1412_v59, %v1412_v59 }
 0x123   : > { %v1090_v60 = vpop.f32.mrf.mxu0 }
 0x124   : > { %v1347_v42 = vpop.f32.mrf.mxu1  ;;  %v1451_v7 = vmul.f32 %v1413_v15, %v1413_v15  ;;  %v1162_v2 = vadd.f32 %v1090_v60, %v2716_v53  ;;  %v1414_v23 = vadd.f32 %v1341_v4, %v1161_v34  ;;  %2185 = vrsqrt.f32 %v2780_v31 }
 0x125   : > { %v1092_v28 = vpop.f32.mrf.mxu0  ;;  %vm1468_vm5 = vcmp.eq.f32.partialorder %v2780_v31, inf  ;;  %vm1470_vm6 = vcmp.eq.f32.partialorder %v2780_v31, 0.0 }
 0x126   : > { %v1351_v33 = vpop.f32.mrf.mxu1  ;;  %v1163_v62 = vadd.f32 %v1092_v28, %v2718_v12  ;;  %v2786_v8 = vadd.f32 %v1451_v7, %v1443_v18  ;;  %v1415_v46 = vadd.f32 %v1343_v6, %v1162_v2  ;;  %v1444_v21 = vmul.f32 %v1414_v23, %v1414_v23 }
 0x127   : > { %v1094_v5 = vpop.f32.mrf.mxu0  ;;  %v1634_v12 = vlaneseq }
 0x128   : > { %v1353_v52 = vpop.f32.mrf.mxu1  ;;  %v1416_v3 = vadd.f32 %v1345_v24, %v1163_v62  ;;  %v1164_v35 = vadd.f32 %v1094_v5, %v2720_v56  ;;  %v1452_v27 = vmul.f32 %v1415_v46, %v1415_v46  ;;  %2187 = vrsqrt.f32 %v2786_v8 }
 0x129   : > { %v1098_v17 = vpop.f32.mrf.mxu0  ;;  %v2798_v60 = vand.u32 127, %v1634_v12  ;;  %vm1475_vm7 = vcmp.eq.f32.partialorder %v2786_v8, inf  ;;  %vm1477_vm8 = vcmp.eq.f32.partialorder %v2786_v8, 0.0 }
 0x12a   : > { %v1355_v22 = vpop.f32.mrf.mxu1  ;;  %v1417_v53 = vadd.f32 %v1347_v42, %v1164_v35  ;;  %v1165_v36 = vadd.f32 %v1098_v17, %v2722_v20  ;;  %v2790_v44 = vadd.f32 %v1452_v27, %v1444_v21  ;;  %v1445_v45 = vmul.f32 %v1416_v3, %v1416_v3 }
 0x12b   : > { %v1100_v4 = vpop.f32.mrf.mxu0  ;;  %vm1663_vm4 = vcmp.lt.s32.totalorder %v2798_v60, 65 }
 0x12c   : > { %v1357_v58 = vpop.f32.mrf.mxu1  ;;  %v1453_v48 = vmul.f32 %v1417_v53, %v1417_v53  ;;  %v1166_v6 = vadd.f32 %v1100_v4, %v2724_v16  ;;  %v1418_v59 = vadd.f32 %v1351_v33, %v1165_v36  ;;  %2189 = vrsqrt.f32 %v2790_v44 }
 0x12d   : > { %v1102_v24 = vpop.f32.mrf.mxu0  ;;  %vm1482_vm9 = vcmp.eq.f32.partialorder %v2790_v44, inf  ;;  %vm1484_vm10 = vcmp.eq.f32.partialorder %v2790_v44, 0.0 }
 0x12e   : > { %v1361_v14 = vpop.f32.mrf.mxu1  ;;  %v2794_v56 = vadd.f32 %v1453_v48, %v1445_v45  ;;  %v1419_v42 = vadd.f32 %v1353_v52, %v1166_v6  ;;  %v1167_v20 = vadd.f32 %v1102_v24, %v2726_v26  ;;  %v1446_v33 = vmul.f32 %v1418_v59, %v1418_v59 }
 0x12f   : > { %v1104_v15 = vpop.f32.mrf.mxu0  ;;  %v2274_v6 = vmov 0.0   ;;  %v2825_v59 = vadd.f32 %v2760_v55, %v2772_v50  ;;  %v2829_v24 = vadd.f32 %v2764_v10, %v2774_v49  ;;  %v1471_v10 = vand.u32 2147483648, %v2780_v31 }
 0x130   : > { %v1363_v41 = vpop.f32.mrf.mxu1  ;;  %2191 = vrsqrt.f32 %v2794_v56  ;;  %v1168_v16 = vadd.f32 %v1104_v15, %v2728_v39  ;;  %v1454_v18 = vmul.f32 %v1419_v42, %v1419_v42  ;;  %v1420_v7 = vadd.f32 %v1355_v22, %v1167_v20 }
 0x131   : > { %v1108_v2 = vpop.f32.mrf.mxu0  ;;  %v2186_v5 = vpop.eup %2185  ;;  %v1635_v22 = vshrl.u32 %v1634_v12, 7  ;;  %vm1489_vm11 = vcmp.eq.f32.partialorder %v2794_v56, inf  ;;  %vm1491_vm12 = vcmp.eq.f32.partialorder %v2794_v56, 0.0 }
 0x132   : > { %v1365_v32 = vpop.f32.mrf.mxu1  ;;  %v1421_v23 = vadd.f32 %v1357_v58, %v1168_v16  ;;  %v1169_v62 = vadd.f32 %v1108_v2, %v2730_v51  ;;  %v2803_v46 = vadd.f32 %v1454_v18, %v1446_v33  ;;  %v1447_v3 = vmul.f32 %v1420_v7, %v1420_v7 }
 0x133   : > { %v1110_v52 = vpop.f32.mrf.mxu0  ;;  %v1467_v36 = vmul.f32 %v2186_v5, %v2780_v31  ;;  %v2833_v15 = vadd.s32 56, %v1635_v22  ;;  %v1478_v33 = vand.u32 2147483648, %v2786_v8  ;;  %v1485_v7 = vand.u32 2147483648, %v2790_v44 }
 0x134   : > { %v1367_v34 = vpop.f32.mrf.mxu1  ;;  %v1455_v35 = vmul.f32 %v1421_v23, %v1421_v23  ;;  %v1422_v17 = vadd.f32 %v1361_v14, %v1169_v62  ;;  %v1170_v39 = vadd.f32 %v1110_v52, %v2732_v30  ;;  %2193 = vrsqrt.f32 %v2803_v46 }
 0x135   : > { %v1112_v21 = vpop.f32.mrf.mxu0  ;;  %v2815_v30 = vsel %vm1663_vm4, 1.0, %v2274_v6  ;;  %v1469_v55 = vsel %vm1468_vm5, %v2780_v31, %v1467_v36  ;;  %vm1496_vm13 = vcmp.eq.f32.partialorder %v2803_v46, inf  ;;  %vm1498_vm15 = vcmp.eq.f32.partialorder %v2803_v46, 0.0 }
 0x136   : > { %v1371_v28 = vpop.f32.mrf.mxu1  ;;  %v2807_v53 = vadd.f32 %v1455_v35, %v1447_v3  ;;  %v1423_v58 = vadd.f32 %v1363_v41, %v1170_v39  ;;  %v1171_v51 = vadd.f32 %v1112_v21, %v2734_v0  ;;  %v1448_v4 = vmul.f32 %v1422_v17, %v1422_v17 }
 0x137   : > { %v1114_v45 = vpop.f32.mrf.mxu0  ;;  %v2821_v0 = vadd.f32 %v2756_v63, %v2770_v38  ;;  %v2188_v38 = vpop.eup %2187  ;;  %v1472_v17 = vsel %vm1470_vm6, %v1471_v10, %v1469_v55 }
 0x138   : > { %v1373_v26 = vpop.f32.mrf.mxu1  ;;  %2195 = vrsqrt.f32 %v2807_v53  ;;  %v1456_v14 = vmul.f32 %v1423_v58, %v1423_v58  ;;  %v1424_v12 = vadd.f32 %v1365_v32, %v1171_v51  ;;  %v1172_v41 = vadd.f32 %v1114_v45, %v2736_v1 }
 0x139   : > { %v1118_v42 = vpop.f32.mrf.mxu0  ;;  %v2190_v16 = vpop.eup %2189  ;;  %v1474_v5 = vmul.f32 %v2188_v38, %v2786_v8  ;;  %v1522_v45 = vmul.f32 0.14433756, %v1472_v17  ;;  %vm1503_vm14 = vcmp.eq.f32.partialorder %v2807_v53, inf  ;;  %v1506_v38 = vand.u32 2147483648, %v2807_v53 }
 0x13a   : > { %v1375_v27 = vpop.f32.mrf.mxu1  ;;  %v2836_v1 = vadd.f32 %v1456_v14, %v1448_v4  ;;  %v1425_v32 = vadd.f32 %v1367_v34, %v1172_v41  ;;  %v1173_v63 = vadd.f32 %v1118_v42, %v2738_v9  ;;  %v1449_v34 = vmul.f32 %v1424_v12, %v1424_v12 }
 0x13b   : > { %v1120_v50 = vpop.f32.mrf.mxu0  ;;  %v1481_v39 = vmul.f32 %v2190_v16, %v2790_v44  ;;  %v1476_v14 = vsel %vm1475_vm7, %v2786_v8, %v1474_v5  ;;  %vm1505_vm0 = vcmp.eq.f32.partialorder %v2807_v53, 0.0 }
 0x13c   : > { %v1377_v48 = vpop.f32.mrf.mxu1  ;;  %2197 = vrsqrt.f32 %v2836_v1  ;;  %v1457_v9 = vmul.f32 %v1425_v32, %v1425_v32  ;;  %v1426_v2 = vadd.f32 %v1371_v28, %v1173_v63  ;;  %v1174_v23 = vadd.f32 %v1120_v50, %v2740_v19 }
 0x13d   : > { %v2192_v18 = vpop.eup %2191  ;;  %v1122_v62 = vpop.f32.mrf.mxu0  ;;  %v1483_v63 = vsel %vm1482_vm9, %v2790_v44, %v1481_v39  ;;  %vm1510_vm1 = vcmp.eq.f32.partialorder %v2836_v1, inf  ;;  %v1513_v17 = vand.u32 2147483648, %v2836_v1  ;;  %vm1512_vm3 = vcmp.eq.f32.partialorder %v2836_v1, 0.0 }
 0x13e   : > { %v2831_v20 = vpop.f32.mrf.mxu1  ;;  %v2852_v3 = vadd.f32 %v1457_v9, %v1449_v34  ;;  %v1175_v35 = vadd.f32 %v1122_v62, %v2742_v25  ;;  %v1427_v21 = vadd.f32 %v1373_v26, %v1174_v23  ;;  %v1488_v19 = vmul.f32 %v2192_v18, %v2794_v56 }
 0x13f   : > { %v1124_v28 = vpop.f32.mrf.mxu0  ;;  %v1538_v58 = vmul.f32 %v1426_v2, %v1426_v2  ;;  %v1492_v26 = vand.u32 2147483648, %v2794_v56  ;;  %v1479_v2 = vsel %vm1477_vm8, %v1478_v33, %v1476_v14  ;;  %v2889_v23 = vadd.f32 1e-07, %v1522_v45 }
 0x140   : > { %v1383_v49 = vpop.f32.mrf.mxu1  ;;  %2199 = vrsqrt.f32 %v2852_v3  ;;  %v1428_v25 = vadd.f32 %v1375_v27, %v1175_v35  ;;  %v1176_v31 = vadd.f32 %v1124_v28, %v2744_v40  ;;  %v1546_v51 = vmul.f32 %v1427_v21, %v1427_v21 }
 0x141   : > { %v1128_v36 = vpop.f32.mrf.mxu0  ;;  %v1499_v27 = vand.u32 2147483648, %v2803_v46  ;;  %v2194_v55 = vpop.eup %2193  ;;  %v1490_v50 = vsel %vm1489_vm11, %v2794_v56, %v1488_v19  ;;  %vm1517_vm2 = vcmp.eq.f32.partialorder %v2852_v3, inf  ;;  %vm1519_vm5 = vcmp.eq.f32.partialorder %v2852_v3, 0.0 }
 0x142   : > { %v2849_v52 = vpop.f32.mrf.mxu1  ;;  %v1429_v12 = vadd.f32 %v1377_v48, %v1176_v31  ;;  %v1177_v41 = vadd.f32 %v1128_v36, %v2746_v43  ;;  %v2873_v42 = vadd.f32 %v1546_v51, %v1538_v58  ;;  %v1539_v48 = vmul.f32 %v1428_v25, %v1428_v25 }
 0x143   : > { %v1130_v40 = vpop.f32.mrf.mxu0  ;;  %v1493_v8 = vsel %vm1491_vm12, %v1492_v26, %v1490_v50  ;;  %v1495_v33 = vmul.f32 %v2194_v55, %v2803_v46  ;;  %v1520_v31 = vand.u32 2147483648, %v2852_v3 }
 0x144   : > { %v2859_v22 = vpop.f32.mrf.mxu1  ;;  %v1547_v10 = vmul.f32 %v1429_v12, %v1429_v12  ;;  %v1178_v43 = vadd.f32 %v1130_v40, %v2748_v47  ;;  %2201 = vrsqrt.f32 %v2873_v42  ;;  %v1430_v34 = vadd.f32 %v2831_v20, %v1177_v41 }
 0x145   : > { %v2196_v16 = vpop.eup %2195  ;;  %v1132_v9 = vpop.f32.mrf.mxu0  ;;  %v1486_v20 = vsel %vm1484_vm10, %v1485_v7, %v1483_v63  ;;  %v1525_v51 = vmul.f32 0.14433756, %v1493_v8  ;;  %vm1564_vm6 = vcmp.eq.f32.partialorder %v2873_v42, inf  ;;  %vm1566_vm7 = vcmp.eq.f32.partialorder %v2873_v42, 0.0 }
 0x146   : > { %v1391_v4 = vpop.f32.mrf.mxu1  ;;  %v2891_v62 = vadd.f32 %v1547_v10, %v1539_v48  ;;  %v1431_v47 = vadd.f32 %v1383_v49, %v1178_v43  ;;  %v1179_v5 = vadd.f32 %v1132_v9, %v2750_v57  ;;  %v1502_v49 = vmul.f32 %v2196_v16, %v2807_v53 }
 0x147   : > { %v1134_v35 = vpop.f32.mrf.mxu0  ;;  %v1523_v57 = vmul.f32 0.14433756, %v1479_v2  ;;  %v1540_v21 = vmul.f32 %v1430_v34, %v1430_v34  ;;  %v1524_v58 = vmul.f32 0.14433756, %v1486_v20 }
 0x148   : > { %v1393_v32 = vpop.f32.mrf.mxu1  ;;  %2203 = vrsqrt.f32 %v2891_v62  ;;  %v1548_v28 = vmul.f32 %v1431_v47, %v1431_v47  ;;  %v1432_v44 = vadd.f32 %v2849_v52, %v1179_v5  ;;  %v1180_v7 = vadd.f32 %v1134_v35, %v2752_v61 }
 0x149   : > { %v2198_v39 = vpop.eup %2197  ;;  %v1138_v56 = vpop.f32.mrf.mxu0  ;;  %v1497_v61 = vsel %vm1496_vm13, %v2803_v46, %v1495_v33  ;;  %v1504_v41 = vsel %vm1503_vm14, %v2807_v53, %v1502_v49  ;;  %v2925_v10 = vadd.f32 1e-07, %v1523_v57  ;;  %v2933_v50 = vadd.f32 1e-07, %v1524_v58 }
 0x14a   : > { %v1395_v18 = vpop.f32.mrf.mxu1  ;;  %v1181_v25 = vadd.f32 %v1138_v56, %v2754_v37  ;;  %v2911_v36 = vadd.f32 %v1548_v28, %v1540_v21  ;;  %v1433_v26 = vadd.f32 %v2859_v22, %v1180_v7  ;;  %v1509_v52 = vmul.f32 %v2198_v39, %v2836_v1 }
 0x14b   : > { %v1140_v45 = vpop.f32.mrf.mxu0  ;;  %v1567_v37 = vand.u32 2147483648, %v2873_v42  ;;  %v1541_v22 = vmul.f32 %v1432_v44, %v1432_v44  ;;  %vm1571_vm8 = vcmp.eq.f32.partialorder %v2891_v62, inf  ;;  %v1507_v9 = vsel %vm1505_vm0, %v1506_v38, %v1504_v41 }
 0x14c   : > { %v1397_v19 = vpop.f32.mrf.mxu1  ;;  %v1434_v14 = vadd.f32 %v1391_v4, %v1181_v25  ;;  %v1182_v12 = vadd.f32 %v1140_v45, %v2758_v11  ;;  %2205 = vrsqrt.f32 %v2911_v36  ;;  %v1549_v63 = vmul.f32 %v1433_v26, %v1433_v26 }
 0x14d   : > { %v2200_v40 = vpop.eup %2199  ;;  %v1142_v55 = vpop.f32.mrf.mxu0  ;;  %v1500_v11 = vsel %vm1498_vm15, %v1499_v27, %v1497_v61  ;;  %vm1573_vm9 = vcmp.eq.f32.partialorder %v2891_v62, 0.0  ;;  %v1574_v5 = vand.u32 2147483648, %v2891_v62  ;;  %v1527_v44 = vmul.f32 0.14433756, %v1507_v9 }
 0x14e   : > { %v1401_v48 = vpop.f32.mrf.mxu1  ;;  %v1435_v43 = vadd.f32 %v1393_v32, %v1182_v12  ;;  %v1183_v4 = vadd.f32 %v1142_v55, %v2762_v54  ;;  %v2936_v16 = vadd.f32 %v1549_v63, %v1541_v22  ;;  %v1511_v54 = vsel %vm1510_vm1, %v2836_v1, %v1509_v52 }
 0x14f   : > { %v1144_v34 = vpop.f32.mrf.mxu0  ;;  %v1516_v32 = vmul.f32 %v2200_v40, %v2852_v3  ;;  %v1542_v46 = vmul.f32 %v1434_v14, %v1434_v14  ;;  %v1526_v20 = vmul.f32 0.14433756, %v1500_v11  ;;  %vm1578_vm10 = vcmp.eq.f32.partialorder %v2911_v36, inf }
 0x150   : > { %v1550_v27 = vmul.f32 %v1435_v43, %v1435_v43  ;;  %v1436_v2 = vadd.f32 %v1395_v18, %v1183_v4  ;;  %v1184_v47 = vadd.f32 %v1144_v34, %v2766_v13  ;;  %2207 = vrsqrt.f32 %v2936_v16  ;;  %v1403_v35 = vpop.f32.mrf.mxu1 }
 0x151   : > { %v1148_v53 = vpop.f32.mrf.mxu0  ;;  %v1518_v38 = vsel %vm1517_vm2, %v2852_v3, %v1516_v32  ;;  %v2202_v8 = vpop.eup %2201  ;;  %v1514_v13 = vsel %vm1512_vm3, %v1513_v17, %v1511_v54  ;;  %v1581_v17 = vand.u32 2147483648, %v2911_v36  ;;  %v2973_v52 = vadd.f32 1e-07, %v1526_v20 }
 0x152   : > { %v2953_v33 = vadd.f32 %v1550_v27, %v1542_v46  ;;  %v1437_v49 = vadd.f32 %v1397_v19, %v1184_v47  ;;  %v1185_v18 = vadd.f32 %v1148_v53, %v2768_v29  ;;  %v1563_v57 = vmul.f32 %v2202_v8, %v2873_v42  ;;  %v1405_v25 = vpop.f32.mrf.mxu1 }
 0x153   : > { %v1543_v39 = vmul.f32 %v1436_v2, %v1436_v2  ;;  %v1150_v21 = vpop.f32.mrf.mxu0  ;;  %v1521_v28 = vsel %vm1519_vm5, %v1520_v31, %v1518_v38  ;;  %v1528_v3 = vmul.f32 0.14433756, %v1514_v13  ;;  %v2968_v31 = vadd.f32 1e-07, %v1525_v51 }
 0x154   : > { %2209 = vrsqrt.f32 %v2953_v33  ;;  %v1551_v7 = vmul.f32 %v1437_v49, %v1437_v49  ;;  %v1438_v56 = vadd.f32 %v1401_v48, %v1185_v18  ;;  %v1186_v19 = vadd.f32 %v1150_v21, %v2821_v0  ;;  %v1407_v55 = vpop.f32.mrf.mxu1 }
 0x155   : > { %v2204_v29 = vpop.eup %2203  ;;  %v1565_v1 = vsel %vm1564_vm6, %v2873_v42, %v1563_v57  ;;  %v1152_v58 = vpop.f32.mrf.mxu0  ;;  %v1529_v41 = vmul.f32 0.14433756, %v1521_v28  ;;  %v2985_v43 = vadd.f32 1e-07, %v1527_v44  ;;  %vm1580_vm11 = vcmp.eq.f32.partialorder %v2911_v36, 0.0 }
 0x156   : > { %v1570_v26 = vmul.f32 %v2204_v29, %v2891_v62  ;;  %v2971_v45 = vadd.f32 %v1551_v7, %v1543_v39  ;;  %v1439_v61 = vadd.f32 %v1403_v35, %v1186_v19  ;;  %v1544_v0 = vmul.f32 %v1438_v56, %v1438_v56 }
 0x157   : > { %v1187_v14 = vadd.f32 %v1152_v58, %v2825_v59  ;;  %v1154_v12 = vpop.f32.mrf.mxu0  ;;  %v1568_v40 = vsel %vm1566_vm7, %v1567_v37, %v1565_v1  ;;  %v2987_v59 = vadd.f32 1e-07, %v1528_v3  ;;  %vm1585_vm12 = vcmp.eq.f32.partialorder %v2936_v16, inf }
 0x158   : > { %v1572_v51 = vsel %vm1571_vm8, %v2891_v62, %v1570_v26  ;;  %2211 = vrsqrt.f32 %v2971_v45  ;;  %v1552_v22 = vmul.f32 %v1439_v61, %v1439_v61  ;;  %v1188_v63 = vadd.f32 %v1154_v12, %v2829_v24 }
 0x159   : > { %v1440_v48 = vadd.f32 %v1405_v25, %v1187_v14  ;;  %v2206_v4 = vpop.eup %2205  ;;  %v1575_v11 = vsel %vm1573_vm9, %v1574_v5, %v1572_v51  ;;  %vm1587_vm13 = vcmp.eq.f32.partialorder %v2936_v16, 0.0  ;;  %v1588_v24 = vand.u32 2147483648, %v2936_v16 }
 0x15a   : > { %v2990_v42 = vadd.f32 %v1552_v22, %v1544_v0  ;;  %v1441_v37 = vadd.f32 %v1407_v55, %v1188_v63  ;;  %v1577_v34 = vmul.f32 %v2206_v4, %v2911_v36  ;;  %v1618_v9 = vmul.f32 0.14433756, %v1568_v40 }
 0x15b   : > { %v1545_v54 = vmul.f32 %v1440_v48, %v1440_v48  ;;  %v2999_v46 = vadd.f32 1e-07, %v1529_v41  ;;  %vm1592_vm14 = vcmp.eq.f32.partialorder %v2953_v33, inf  ;;  %v1619_v27 = vmul.f32 0.14433756, %v1575_v11 }
 0x15c   : > { %2213 = vrsqrt.f32 %v2990_v42  ;;  %v1553_v32 = vmul.f32 %v1441_v37, %v1441_v37  ;;  %v1579_v62 = vsel %vm1578_vm10, %v2911_v36, %v1577_v34  ;;  %v1626_v2 = vadd.f32 1e-07, %v1618_v9 }
 0x15d   : > { %v2208_v47 = vpop.eup %2207  ;;  %v1582_v35 = vsel %vm1580_vm11, %v1581_v17, %v1579_v62  ;;  %vm1594_vm15 = vcmp.eq.f32.partialorder %v2953_v33, 0.0  ;;  %v1595_v53 = vand.u32 2147483648, %v2953_v33  ;;  %vm1599_vm0 = vcmp.eq.f32.partialorder %v2971_v45, inf }
 0x15e   : > { %v3005_v5 = vadd.f32 %v1553_v32, %v1545_v54  ;;  %v1584_v38 = vmul.f32 %v2208_v47, %v2936_v16  ;;  %v1620_v20 = vmul.f32 0.14433756, %v1582_v35  ;;  %v1627_v8 = vadd.f32 1e-07, %v1619_v27 }
 0x15f   : > { %v1688_v49 = vsub.f32 %v2889_v23, %v1626_v2  ;;  %vm1601_vm1 = vcmp.eq.f32.partialorder %v2971_v45, 0.0  ;;  %v1602_v18 = vand.u32 2147483648, %v2971_v45  ;;  %v1609_v36 = vand.u32 2147483648, %v2990_v42 }
 0x160   : > { %2215 = vrsqrt.f32 %v3005_v5  ;;  %v1616_v13 = vand.u32 2147483648, %v3005_v5  ;;  %v1586_v39 = vsel %vm1585_vm12, %v2936_v16, %v1584_v38  ;;  %v1628_v21 = vadd.f32 1e-07, %v1620_v20 }
 0x161   : > { %v2210_v57 = vpop.eup %2209  ;;  %v1689_v28 = vsub.f32 %v2925_v10, %v1627_v8  ;;  %2217 = vrcp.f32 %v1626_v2  ;;  %v1589_v44 = vsel %vm1587_vm13, %v1588_v24, %v1586_v39  ;;  %v1745_v56 = vmul.f32 %v1688_v49, %v1688_v49 }
 0x162   : > { %v1591_v7 = vmul.f32 %v2210_v57, %v2953_v33  ;;  %2219 = vrcp.f32 %v1627_v8  ;;  %vm1606_vm2 = vcmp.eq.f32.partialorder %v2990_v42, inf  ;;  %v1621_v19 = vmul.f32 0.14433756, %v1589_v44 }
 0x163   : > { %v1690_v29 = vsub.f32 %v2933_v50, %v1628_v21  ;;  %2221 = vrcp.f32 %v1628_v21  ;;  %v1746_v1 = vmul.f32 %v1689_v28, %v1689_v28  ;;  %vm1608_vm3 = vcmp.eq.f32.partialorder %v2990_v42, 0.0 }
 0x164   : > { %v1593_v17 = vsel %vm1592_vm14, %v2953_v33, %v1591_v7  ;;  %v1753_v16 = vmul.f32 %v2815_v30, %v1745_v56  ;;  %v1696_v25 = vadd.f32 %v1626_v2, %v2889_v23  ;;  %v1697_v58 = vadd.f32 %v1627_v8, %v2925_v10 }
 0x165   : > { %v2212_v3 = vpop.eup %2211  ;;  %v1596_v26 = vsel %vm1594_vm15, %v1595_v53, %v1593_v17  ;;  %v1629_v61 = vadd.f32 1e-07, %v1621_v19  ;;  %v1747_v0 = vmul.f32 %v1690_v29, %v1690_v29  ;;  %v1754_v14 = vmul.f32 %v2815_v30, %v1746_v1 }
 0x166   : > { %v1598_v12 = vmul.f32 %v2212_v3, %v2971_v45  ;;  %v1622_v41 = vmul.f32 0.14433756, %v1596_v26  ;;  %v1698_v40 = vadd.f32 %v1628_v21, %v2933_v50  ;;  %v1782_v51 = vmul.f32 %v1696_v25, %v1696_v25 }
 0x167   : > { %vm1613_vm5 = vcmp.eq.f32.partialorder %v3005_v5, inf  ;;  %v1691_v22 = vsub.f32 %v2968_v31, %v1629_v61  ;;  %2223 = vrcp.f32 %v1629_v61  ;;  %v1755_v63 = vmul.f32 %v2815_v30, %v1747_v0 }
 0x168   : > { %v1761_v55 = vadd.f32 %v1754_v14, %v1753_v16  ;;  %v1600_v33 = vsel %vm1599_vm0, %v2971_v45, %v1598_v12  ;;  %vm1615_vm6 = vcmp.eq.f32.partialorder %v3005_v5, 0.0  ;;  %v1630_v48 = vadd.f32 1e-07, %v1622_v41 }
 0x169   : > { %v1699_v4 = vadd.f32 %v1629_v61, %v2968_v31  ;;  %v1783_v37 = vmul.f32 %v1697_v58, %v1697_v58  ;;  %v2214_v11 = vpop.eup %2213  ;;  %v1603_v34 = vsel %vm1601_vm1, %v1602_v18, %v1600_v33  ;;  %vm1662_vm7 = vcmp.lt.s32.totalorder %v2833_v15, 61 }
 0x16a   : > { %v1748_v24 = vmul.f32 %v1691_v22, %v1691_v22  ;;  %v1762_v9 = vadd.f32 %v1761_v55, %v1755_v63  ;;  %v1784_v54 = vmul.f32 %v1698_v40, %v1698_v40  ;;  %v1605_v32 = vmul.f32 %v2214_v11, %v2990_v42  ;;  %vm1671_vm8 = vmand %vm1662_vm7, %vm1663_vm4 }
 0x16b   : > { %v1623_v62 = vmul.f32 0.14433756, %v1603_v34  ;;  %v1692_v27 = vsub.f32 %v2973_v52, %v1630_v48  ;;  %2225 = vrcp.f32 %v1630_v48  ;;  %v1700_v47 = vadd.f32 %v1630_v48, %v2973_v52 }
 0x16c   : > { %v1756_v2 = vmul.f32 %v2815_v30, %v1748_v24  ;;  %v1785_v35 = vmul.f32 %v1699_v4, %v1699_v4  ;;  %v1790_v53 = vmul.f32 %v2815_v30, %v1782_v51  ;;  %v1607_v45 = vsel %vm1606_vm2, %v2990_v42, %v1605_v32 }
 0x16d   : > { %v1631_v38 = vadd.f32 1e-07, %v1623_v62  ;;  %v1749_v20 = vmul.f32 %v1692_v27, %v1692_v27  ;;  %v1791_v8 = vmul.f32 %v2815_v30, %v1783_v37  ;;  %v2216_v49 = vpop.eup %2215  ;;  %v1610_v18 = vsel %vm1608_vm3, %v1609_v36, %v1607_v45 }
 0x16e   : > { %v1763_v57 = vadd.f32 %v1762_v9, %v1756_v2  ;;  %v1786_v39 = vmul.f32 %v1700_v47, %v1700_v47  ;;  %v1792_v21 = vmul.f32 %v2815_v30, %v1784_v54  ;;  %v2218_v28 = vpop.eup %2217  ;;  %v1612_v44 = vmul.f32 %v2216_v49, %v3005_v5 }
 0x16f   : > { %v1624_v7 = vmul.f32 0.14433756, %v1610_v18  ;;  %v1693_v56 = vsub.f32 %v2985_v43, %v1631_v38  ;;  %2227 = vrcp.f32 %v1631_v38  ;;  %v2220_v19 = vpop.eup %2219  ;;  %v1757_v29 = vmul.f32 %v2815_v30, %v1749_v20 }
 0x170   : > { %v1701_v1 = vadd.f32 %v1631_v38, %v2985_v43  ;;  %v1793_v17 = vmul.f32 %v2815_v30, %v1785_v35  ;;  %v1794_v42 = vmul.f32 %v2815_v30, %v1786_v39  ;;  %v2222_v36 = vpop.eup %2221  ;;  %v1614_v16 = vsel %vm1613_vm5, %v3005_v5, %v1612_v44 }
 0x171   : > { %v1632_v25 = vadd.f32 1e-07, %v1624_v7  ;;  %v1750_v58 = vmul.f32 %v1693_v56, %v1693_v56  ;;  %v1798_v3 = vadd.f32 %v1791_v8, %v1790_v53  ;;  %v1617_v26 = vsel %vm1615_vm6, %v1616_v13, %v1614_v16 }
 0x172   : > { %v1764_v61 = vadd.f32 %v1763_v57, %v1757_v29  ;;  %v1787_v0 = vmul.f32 %v1701_v1, %v1701_v1  ;;  %v1712_v14 = vmul.f32 %v2218_v28, %v2889_v23  ;;  %v1625_v12 = vmul.f32 0.14433756, %v1617_v26 }
 0x173   : > { %v1694_v41 = vsub.f32 %v2987_v59, %v1632_v25  ;;  %2229 = vrcp.f32 %v1632_v25  ;;  %v1758_v40 = vmul.f32 %v2815_v30, %v1750_v58  ;;  %v1702_v51 = vadd.f32 %v1632_v25, %v2987_v59 }
 0x174   : > { %v1795_v22 = vmul.f32 %v2815_v30, %v1787_v0  ;;  %v1799_v63 = vadd.f32 %v1798_v3, %v1792_v21  ;;  %v1713_v55 = vmul.f32 %v2220_v19, %v2925_v10  ;;  %v2224_v33 = vpop.eup %2223  ;;  %v1633_v5 = vadd.f32 1e-07, %v1625_v12 }
 0x175   : > { %v1751_v23 = vmul.f32 %v1694_v41, %v1694_v41  ;;  %v1765_v13 = vadd.f32 %v1764_v61, %v1758_v40  ;;  %v1714_v48 = vmul.f32 %v2222_v36, %v2933_v50  ;;  %v1788_v4 = vmul.f32 %v1702_v51, %v1702_v51 }
 0x176   : > { %v1800_v37 = vadd.f32 %v1799_v63, %v1793_v17  ;;  %v1715_v11 = vmul.f32 %v2224_v33, %v2968_v31  ;;  %2231 = vlog2.f32 %v1712_v14  ;;  %v1695_v34 = vsub.f32 %v2999_v46, %v1633_v5 }
 0x177   : > { %2233 = vrcp.f32 %v1633_v5  ;;  %v1759_v10 = vmul.f32 %v2815_v30, %v1751_v23  ;;  %v1703_v24 = vadd.f32 %v1633_v5, %v2999_v46  ;;  %v3092_v15 = vsel %vm1671_vm8, 1.0, %v2274_v6 }
 0x178   : > { %v2226_v60 = vpop.eup %2225  ;;  %v1796_v9 = vmul.f32 %v2815_v30, %v1788_v4  ;;  %v1801_v54 = vadd.f32 %v1800_v37, %v1794_v42  ;;  %2235 = vlog2.f32 %v1713_v55  ;;  %v1752_v50 = vmul.f32 %v1695_v34, %v1695_v34 }
 0x179   : > { %v1766_v32 = vadd.f32 %v1765_v13, %v1759_v10  ;;  %v1789_v62 = vmul.f32 %v1703_v24, %v1703_v24  ;;  %v1716_v31 = vmul.f32 %v2226_v60, %v2973_v52  ;;  %2237 = vlog2.f32 %v1714_v48 }
 0x17a   : > { %v1802_v27 = vadd.f32 %v1801_v54, %v1795_v22  ;;  %v1760_v2 = vmul.f32 %v3092_v15, %v1752_v50  ;;  %2239 = vlog2.f32 %v1715_v11  ;;  %vm439_vm4 = vcmask 0  }
 0x17b   : > { %v1797_v47 = vmul.f32 %v3092_v15, %v1789_v62  ;;  %2241 = vlog2.f32 %v1716_v31  ;;  %440 = vst.msk [vmem:[%s3113_s15] sm:$0x1] %vm439_vm4, %v2274_v6  ;;  %441 = vst.msk [vmem:[%s3122_s18] sm:$0x1] %vm439_vm4, %v2274_v6 }
 0x17c   : > { %v2228_v35 = vpop.eup %2227  ;;  %v1803_v53 = vadd.f32 %v1802_v27, %v1796_v9  ;;  %v1767_v45 = vadd.f32 %v1766_v32, %v1760_v2  ;;  %442 = vst.msk [vmem:[%s3131_s22] sm:$0x1] %vm439_vm4, %v2274_v6 }
 0x17d   : > { %v1717_v38 = vmul.f32 %v2228_v35, %v2985_v43 }
 0x17e   : > { %v1804_v20 = vadd.f32 %v1803_v53, %v1797_v47  ;;  %1768 = vadd.xlane.f32.xlu0 %v1767_v45 }
 0x17f   : > { %2243 = vlog2.f32 %v1717_v38 }
 0x180   : > { %v2230_v8 = vpop.eup %2229 }
 0x181   : > { %v1718_v49 = vmul.f32 %v2230_v8, %v2987_v59 }
 0x182   : > { %1805 = vadd.xlane.f32.xlu0 %v1804_v20  ;;  %v1744_v8 = vld [vmem:[%s3113_s15] sm:$0x1] }
 0x183   : > { %v2232_v52 = vpop.eup %2231  ;;  %2245 = vlog2.f32 %v1718_v49 }
 0x184   : > { %v2234_v18 = vpop.eup %2233  ;;  %v1721_v57 = vmul.f32 0.6931472, %v2232_v52 }
 0x185   : > { %v2236_v39 = vpop.eup %2235  ;;  %v1719_v21 = vmul.f32 %v2234_v18, %v2999_v46  ;;  %v1781_v18 = vld [vmem:[%s3122_s18] sm:$0x1] }
 0x186   : > { %v1723_v28 = vmul.f32 0.6931472, %v2236_v39  ;;  %v1736_v44 = vand.u32 2147483647, %v1721_v57  ;;  %v2238_v7 = vpop.eup %2237 }
 0x187   : > { %2247 = vlog2.f32 %v1719_v21  ;;  %v2240_v56 = vpop.eup %2239  ;;  %v1725_v43 = vmul.f32 0.6931472, %v2238_v7  ;;  %v1817_v21 = vld [vmem:[%s3131_s22] sm:$0x1] }
 0x188   : > { %v1737_v19 = vand.u32 2147483647, %v1723_v28  ;;  %v2242_v29 = vpop.eup %2241  ;;  %v1727_v1 = vmul.f32 0.6931472, %v2240_v56  ;;  %v1818_v59 = vmul.f32 %v2815_v30, %v1736_v44 }
 0x189   : > { %v1729_v17 = vmul.f32 0.6931472, %v2242_v29  ;;  %v1738_v42 = vand.u32 2147483647, %v1725_v43 }
 0x18a   : > { %v1819_v36 = vmul.f32 %v2815_v30, %v1737_v19  ;;  %v1739_v16 = vand.u32 2147483647, %v1727_v1 }
 0x18b   : > { %v1740_v58 = vand.u32 2147483647, %v1729_v17  ;;  %v1820_v46 = vmul.f32 %v2815_v30, %v1738_v42 }
 0x18c   : > { %v2244_v25 = vpop.eup %2243  ;;  %v1826_v3 = vadd.f32 %v1819_v36, %v1818_v59  ;;  %v1821_v61 = vmul.f32 %v2815_v30, %v1739_v16 }
 0x18d   : > { %v1731_v26 = vmul.f32 0.6931472, %v2244_v25  ;;  %v1822_v0 = vmul.f32 %v2815_v30, %v1740_v58 }
 0x18e   : > { %v1827_v14 = vadd.f32 %v1826_v3, %v1820_v46 }
 0x18f   : > { %v1741_v12 = vand.u32 2147483647, %v1731_v26 }
 0x190   : > { %v2246_v41 = vpop.eup %2245  ;;  %v1828_v40 = vadd.f32 %v1827_v14, %v1821_v61 }
 0x191   : > { %v1733_v51 = vmul.f32 0.6931472, %v2246_v41  ;;  %v1823_v22 = vmul.f32 %v2815_v30, %v1741_v12 }
 0x192   : > { %v1829_v63 = vadd.f32 %v1828_v40, %v1822_v0 }
 0x193   : > { %v1742_v55 = vand.u32 2147483647, %v1733_v51 }
 0x194   : > { %v2248_v33 = vpop.eup %2247  ;;  %v1830_v5 = vadd.f32 %v1829_v63, %v1823_v22 }
 0x195   : > { %v1735_v23 = vmul.f32 0.6931472, %v2248_v33  ;;  %v1824_v13 = vmul.f32 %v2815_v30, %v1742_v55 }
 0x197   : > { %v1743_v48 = vand.u32 2147483647, %v1735_v23  ;;  %v1831_v4 = vadd.f32 %v1830_v5, %v1824_v13 }
 0x199   : > { %v1825_v37 = vmul.f32 %v3092_v15, %v1743_v48 }
 0x19b   : > { %v1832_v11 = vadd.f32 %v1831_v4, %v1825_v37 }
 0x19d   : > { %1833 = vadd.xlane.f32.xlu1 %v1832_v11 }
 0x207   : > { %v1769_v30 = vpop.xlane.xlu0 %1768 }
 0x208   : > { %v1770_v34 = vrot.slane %v1769_v30, 4 }
 0x20a   : > { %v1771_v10 = vadd.f32 %v1770_v34, %v1769_v30 }
 0x20b   : > { %v1806_v24 = vpop.xlane.xlu0 %1805 }
 0x20c   : > { %v1772_v60 = vrot.slane %v1771_v10, 2  ;;  %v1807_v15 = vrot.slane %v1806_v24, 4 }
 0x20e   : > { %v1808_v9 = vadd.f32 %v1807_v15, %v1806_v24  ;;  %v1773_v54 = vadd.f32 %v1772_v60, %v1771_v10 }
 0x210   : > { %v1809_v50 = vrot.slane %v1808_v9, 2  ;;  %v1774_v32 = vrot.slane %v1773_v54, 1 }
 0x212   : > { %v1810_v62 = vadd.f32 %v1809_v50, %v1808_v9  ;;  %v1775_v31 = vadd.f32 %v1774_v32, %v1773_v54 }
 0x214   : > { %2121 = vpush %v1775_v31  ;;  %v1811_v27 = vrot.slane %v1810_v62, 1 }
 0x216   : > { %v1812_v2 = vadd.f32 %v1811_v27, %v1810_v62 }
 0x218   : > { %2123 = vpush %v1812_v2 }
 0x226   : > { %v1834_v6 = vpop.xlane.xlu1 %1833 }
 0x227   : > { %v1835_v47 = vrot.slane %v1834_v6, 4 }
 0x229   : > { %v1836_v35 = vadd.f32 %v1835_v47, %v1834_v6 }
 0x22b   : > { %v1837_v53 = vrot.slane %v1836_v35, 2 }
 0x22d   : > { %v1838_v45 = vadd.f32 %v1837_v53, %v1836_v35 }
 0x22f   : > { %v1839_v38 = vrot.slane %v1838_v45, 1 }
 0x231   : > { %v1840_v20 = vadd.f32 %v1839_v38, %v1838_v45 }
 0x233   : > { %2125 = vpush %v1840_v20 }
 0x245   : > { %s2122_s24 = spop %2121 }
 0x246   : > { %v1777_v49 = vstv %s2122_s24 }
 0x247   : > { %v1778_v52 = vadd.f32 %v1777_v49, %v1744_v8 }
 0x249   : > { %1780 = vst.msk [vmem:[%s3113_s15] sm:$0x1] %vm439_vm4, %v1778_v52  ;;  %s2124_s23 = spop %2123 }
 0x24a   : > { %v1814_v57 = vstv %s2124_s23 }
 0x24b   : > { %v1815_v39 = vadd.f32 %v1814_v57, %v1781_v18 }
 0x24d   : > { %1816 = vst.msk [vmem:[%s3122_s18] sm:$0x1] %vm439_vm4, %v1815_v39 }
 0x264   : > { %s2126_s29 = spop %2125 }
 0x265   : > { %v1842_v28 = vstv %s2126_s29 }
 0x266   : > { %v1843_v44 = vadd.f32 %v1842_v28, %v1817_v21 }
 0x268   : > { %1844 = vst.msk [vmem:[%s3131_s22] sm:$0x1] %vm439_vm4, %v1843_v44 }
 0x269 PF: > { %s18_s26 = sadd.s32 1, %s2271_s26   ;;  %s3162_s24 = smov %s2267_s25 }
 0x26a   : > { %p15_p5 = scmp.ge.s32.totalorder %s18_s26, 4   ;;  %s3163_s25 = smov %s3165_s27 }
 0x26c   :  { %17 = sbr.rel (!%p15_p5) target bundleno = 2 (0x2), region = 110 }

// kernel: mss_loss.2
= control target key start
LH: loop header
LB: loop body
LE: loop exit
PB: predicated region body
PF: predicated region fallthrough
CT: control target
= control target key end

     0   :  { %13 = vsyncpa [#allocation3], 0  ;;  %s2714_s24 = smov 0   ;;  %s2716_s25 = smov 0   ;;  %s3491_s0 = inlined_call_operand.vmem [shape: bf16[2,2,32,64], index: 0, kind: input, shape index: {}, may-alias: {0,1}]   ;;  %s3492_s1 = inlined_call_operand.vmem [shape: bf16[2,2,32,64], index: 1, kind: input, shape index: {}, may-alias: {0,1}]   ;;  %s3493_s2 = inlined_call_operand.vmem [shape: bf16[2,2,32,64], index: 2, kind: input, shape index: {}, may-alias: {2,3}]   ;;  %s3494_s3 = inlined_call_operand.vmem [shape: bf16[2,2,32,64], index: 3, kind: input, shape index: {}, may-alias: {2,3}]   ;;  %s3495_s4 = inlined_call_operand.hbm [shape: bf16[4,64,512], index: 4, kind: input, shape index: {}]   ;;  %s3496_s5 = inlined_call_operand.vmem [shape: f32[2,1,1], index: 5, kind: output, shape index: {0}]   ;;  %s3497_s6 = inlined_call_operand.vmem [shape: f32[2,1,1], index: 6, kind: output, shape index: {1}]   ;;  %s3498_s7 = inlined_call_operand.vmem [shape: f32[2,1,1], index: 7, kind: output, shape index: {2}]  }
   0x1   :  { %s2718_s26 = smov 0  }
   0x2 LB: > { %s2276_s27 = sadd.s32 4294967295, %s2667_s26   ;;  %s31_s28 = sadd.s32 1, %s2663_s25  ;;  %s2667_s26 = sphi %s2718_s26, %s19_s26   ;;  %s2663_s25 = sphi %s2716_s25, %s3544_s25   ;;  %s2659_s24 = sphi %s2714_s24, %s3543_s24  }
   0x3   : > { %p33_p0 = scmp.ge.s32.totalorder %s31_s28, 2  ;;  %p2278_p1 = scmp.ge.s32.totalorder %s2667_s26, 1 }
   0x4   : > { %p251_p2 = scmp.lt.s32.totalorder %s2667_s26, 3  ;;  %p2739_p4 = scmp.eq.s32.totalorder %s2276_s27, 0 }
   0x5   : > { %s3546_s28 = smov (%p33_p0, %s31_s28), 0  ;;  %s2669_s8 = smov [#allocation2]  }
   0x6   : > { %p2735_p3 = pnand %p2278_p1, %p251_p2  ;;  %s263_s9 = sshll.u32 %s2669_s8, 4  ;;  %s264_s9 = int_to_ptr.vmem [resolvable:$true] %s263_s9 }
   0x7   : > { %s2626_s10 = scalar_lea.vmem %s264_s9, 8192  ;;  %p2634_p11 = scmp.lt.s32.totalorder %s264_s9, %s264_s9 }
   0x8   : > { %p2416_p5 = pneg %p2735_p3  ;;  %p2627_p8 = scmp.ne.s32.totalorder %s264_s9, %s2626_s10 }
   0x9   : > { %p2635_p12 = scmp.lt.s32.totalorder %s2626_s10, %s2626_s10 }
   0xa   : > { %p2417_p6 = pnand %p2739_p4, %p2416_p5 }
   0xb   : > { %p2636_p13 = por %p2635_p12, %p2634_p11 }
   0xc   : > { %p2617_p7 = pneg %p2417_p6 }
   0xe   : > { %p2629_p9 = pnand %p2627_p8, %p2617_p7 }
  0x10   : > { %p2630_p10 = pneg %p2629_p9 }
  0x12   : > { %p2637_p0 = pnand %p2636_p13, %p2630_p10 }
  0x14   : > { %2640 = shalt.err (!%p2637_p0)
}
  0x15   : > { %s2670_s11 = smov 256   ;;  %s2671_s12 = smov 16  }
  0x16   : > { %2419 = dma.hbm_to_vmem [thread:$0]  (!%p2417_p6), %s3495_s4, 8192, %s264_s9, [#allocation3], %s2670_s11, %s2670_s11, %s2671_s12  }
  0x17   : > { %331 = sbr.rel (%p2735_p3) target bundleno = 655 (0x28f), region = 40 }
  0x1c   : > { %2654 = dma.done.wait (%p2739_p4), [#allocation3], 8192  }
  0x1d   : > { %2656 = vsyncadd (%p2739_p4), [#allocation3], 4294959104  ;;  %v2672_v0 = vmov 0   ;;  %p400_p1 = scmp.lt.s32.totalorder %s2659_s24, 1  ;;  %v2451_v1 = vld [vmem:[#allocation2 + $0xe4] ss:$16 sps:$4 sm:$0xff]  }
  0x1e   : > { %705 = vmatprep.mubr.bf16.mxu0 %v2672_v0  ;;  %778 = vmatprep.mubr.bf16.mxu1 %v2672_v0  ;;  %v2453_v2 = vld [vmem:[#allocation2 + $0xec] ss:$16 sps:$4 sm:$0xff]   ;;  %v2455_v3 = vld [vmem:[#allocation2 + $0xe0] ss:$16 sps:$4 sm:$0xff]   ;;  %v2456_v4 = vld [vmem:[#allocation2 + $0xe8] ss:$16 sps:$4 sm:$0xff]  }
  0x1f   : > { %681 = vmatprep.subr.bf16.mxu0 %v2451_v1  ;;  %s3548_s24 = smov (!%p400_p1, %s2659_s24), 1  ;;  %754 = vmatprep.subr.bf16.mxu1 %v2453_v2  ;;  %v2457_v5 = vld [vmem:[#allocation2 + $0xc4] ss:$16 sps:$4 sm:$0xff]   ;;  %v2459_v6 = vld [vmem:[#allocation2 + $0xcc] ss:$16 sps:$4 sm:$0xff]   ;;  %vm527_vm0 = vcmask 1046528  }
  0x20   : > { %682 = vmatpush1.bf16.msra.mxu0 %v2455_v3  ;;  %755 = vmatpush1.bf16.msra.mxu1 %v2456_v4  ;;  %v2461_v7 = vld [vmem:[#allocation2 + $0xc0] ss:$16 sps:$4 sm:$0xff]   ;;  %v2462_v8 = vld [vmem:[#allocation2 + $0xc8] ss:$16 sps:$4 sm:$0xff]   ;;  %v2463_v9 = vld [vmem:[#allocation2 + $0xa4] ss:$16 sps:$4 sm:$0xff]   ;;  %s3450_s12 = scalar_lea.vmem %s3496_s5, %s3548_s24 }
  0x21   : > { %683 = vmatprep.subr.bf16.mxu0 %v2457_v5  ;;  %756 = vmatprep.subr.bf16.mxu1 %v2459_v6  ;;  %s2763_s15 = sshll.u32 %s3548_s24, 5  ;;  %v2465_v10 = vld [vmem:[#allocation2 + $0xac] ss:$16 sps:$4 sm:$0xff]   ;;  %v2467_v11 = vld [vmem:[#allocation2 + $0xa0] ss:$16 sps:$4 sm:$0xff]   ;;  %vm660_vm1 = vcmask 523264  }
  0x22   : > { %v2468_v12 = vld [vmem:[#allocation2 + $0xa8] ss:$16 sps:$4 sm:$0xff]   ;;  %v2469_v13 = vld [vmem:[#allocation2 + $0x84] ss:$16 sps:$4 sm:$0xff]   ;;  %v2471_v14 = vld [vmem:[#allocation2 + $0x8c] ss:$16 sps:$4 sm:$0xff]   ;;  %s408_s18 = scalar_lea.vmem %s3491_s0, %s2763_s15  ;;  %s428_s29 = scalar_lea.vmem %s3493_s2, %s2763_s15 }
  0x23   : > { %s2400_s19 = sadd.s32 16, %s2763_s15  ;;  %v2473_v15 = vld [vmem:[#allocation2 + $0x80] ss:$16 sps:$4 sm:$0xff]   ;;  %v2474_v16 = vld [vmem:[#allocation2 + $0x88] ss:$16 sps:$4 sm:$0xff]   ;;  %vm1057_vm2 = vcmask 1045504   ;;  %s3459_s15 = scalar_lea.vmem %s3497_s6, %s3548_s24 }
  0x24   : > { %684 = vmatpush1.bf16.msra.mxu0 %v2461_v7  ;;  %757 = vmatpush1.bf16.msra.mxu1 %v2462_v8  ;;  %v2770_v17 = vld [vmem:[%s408_s18] sm:$0xff]   ;;  %v2772_v18 = vld [vmem:[%s408_s18 + $0x8] sm:$0xff]   ;;  %s418_s22 = scalar_lea.vmem %s3492_s1, %s2400_s19  ;;  %vm1375_vm3 = vcmask 1044480   ;;  %s438_s9 = scalar_lea.vmem %s3494_s3, %s2400_s19 }
  0x25   : > { %685 = vmatprep.subr.bf16.mxu0 %v2463_v9  ;;  %758 = vmatprep.subr.bf16.mxu1 %v2465_v10  ;;  %v2479_v19 = vld [vmem:[#allocation2 + $0x64] ss:$16 sps:$4 sm:$0xff]   ;;  %v492_v20 = vunpack.c.l.bf16 %v2770_v17  ;;  %v493_v21 = vunpack.c.h.bf16 %v2770_v17  ;;  %v2782_v22 = vunpack.c.l.bf16 %v2772_v18  ;;  %v2482_v23 = vld [vmem:[#allocation2 + $0x6c] ss:$16 sps:$4 sm:$0xff]   ;;  %v462_v24 = vld [vmem:[%s418_s22] sm:$0x3]  ;;  %v2785_v25 = vunpack.c.h.bf16 %v2772_v18  ;;  %s3468_s18 = scalar_lea.vmem %s3498_s7, %s3548_s24 }
  0x26   : > { %v2477_v34 = vld [vmem:[#allocation2 + $0x60] ss:$16 sps:$4 sm:$0xff]   ;;  %v2480_v38 = vld [vmem:[#allocation2 + $0x68] ss:$16 sps:$4 sm:$0xff]   ;;  %v2796_v39 = vunpack.c.l.bf16 %v462_v24  ;;  %v2485_v40 = vld [vmem:[#allocation2 + $0x44] ss:$16 sps:$4 sm:$0xff]  }
  0x27   : > { %v528_v26 = vrot.slane %v492_v20, 1  ;;  %v529_v27 = vrot.slane %v493_v21, 1  ;;  %v531_v28 = vrot.slane %v2782_v22, 1  ;;  %v1058_v29 = vrot.slane %v492_v20, 2  ;;  %v2488_v43 = vld [vmem:[#allocation2 + $0x4c] ss:$16 sps:$4 sm:$0xff]  }
  0x28   : > { %686 = vmatpush1.bf16.msra.mxu0 %v2467_v11  ;;  %759 = vmatpush1.bf16.msra.mxu1 %v2468_v12  ;;  %v1059_v30 = vrot.slane %v493_v21, 2  ;;  %v1061_v31 = vrot.slane %v2782_v22, 2  ;;  %v1376_v32 = vrot.slane %v492_v20, 3  ;;  %v1377_v33 = vrot.slane %v493_v21, 3  ;;  %v2799_v44 = vld [vmem:[%s428_s29] sm:$0xff]   ;;  %v2804_v48 = vld [vmem:[%s428_s29 + $0x8] sm:$0xff]  }
  0x29   : > { %687 = vmatprep.subr.bf16.mxu0 %v2469_v13  ;;  %760 = vmatprep.subr.bf16.mxu1 %v2471_v14  ;;  %v530_v35 = vsel %vm527_vm0, %v528_v26, %v529_v27  ;;  %v532_v36 = vsel %vm527_vm0, %v529_v27, %v531_v28  ;;  %v1379_v37 = vrot.slane %v2782_v22, 3  ;;  %v533_v42 = vrot.slane %v2785_v25, 1  ;;  %v2483_v57 = vld [vmem:[#allocation2 + $0x40] ss:$16 sps:$4 sm:$0xff]   ;;  %v2486_v58 = vld [vmem:[#allocation2 + $0x48] ss:$16 sps:$4 sm:$0xff]  }
  0x2a   : > { %v559_v41 = vpack.c.bf16 %v532_v36, %v530_v35  ;;  %v1060_v45 = vsel %vm1057_vm2, %v1058_v29, %v1059_v30  ;;  %v1062_v46 = vsel %vm1057_vm2, %v1059_v30, %v1061_v31  ;;  %v535_v47 = vrot.slane %v2796_v39, 1  ;;  %v2493_v61 = vld [vmem:[#allocation2 + $0x24] ss:$16 sps:$4 sm:$0xff]   ;;  %v2496_v3 = vld [vmem:[#allocation2 + $0x2c] ss:$16 sps:$4 sm:$0xff]  }
  0x2b   : > { %v2806_v49 = vpack.c.bf16 %v1062_v46, %v1060_v45  ;;  %v1378_v50 = vsel %vm1375_vm3, %v1376_v32, %v1377_v33  ;;  %v1380_v51 = vsel %vm1375_vm3, %v1377_v33, %v1379_v37  ;;  %v2815_v52 = vunpack.c.l.bf16 %v2799_v44  ;;  %v479_v4 = vld [vmem:[%s438_s9] sm:$0x3]  ;;  %v2499_v20 = vld [vmem:[#allocation2 + $0x4] ss:$16 sps:$4 sm:$0xff]   ;;  %v2502_v21 = vld [vmem:[#allocation2 + $0xc] ss:$16 sps:$4 sm:$0xff]  }
  0x2c   : > { %688 = vmatpush1.bf16.msra.mxu0 %v2473_v15  ;;  %761 = vmatpush1.bf16.msra.mxu1 %v2474_v16  ;;  %v2818_v53 = vunpack.c.h.bf16 %v2799_v44  ;;  %v1063_v54 = vrot.slane %v2785_v25, 2  ;;  %v534_v55 = vsel %vm527_vm0, %v531_v28, %v533_v42  ;;  %v536_v56 = vsel %vm527_vm0, %v533_v42, %v535_v47  ;;  %v2491_v11 = vld [vmem:[#allocation2 + $0x20] ss:$16 sps:$4 sm:$0xff]   ;;  %v2494_v15 = vld [vmem:[#allocation2 + $0x28] ss:$16 sps:$4 sm:$0xff]  }
  0x2d   : > { %919 = vmatprep.subr.bf16.mxu0 %v2479_v19  ;;  %992 = vmatprep.subr.bf16.mxu1 %v2482_v23  ;;  %v2829_v59 = vunpack.c.l.bf16 %v2804_v48  ;;  %v1065_v60 = vrot.slane %v2796_v39, 2  ;;  %v2835_v62 = vunpack.c.h.bf16 %v2804_v48  ;;  %v546_v1 = vrot.slane %v2815_v52, 1  ;;  %v2500_v35 = vld [vmem:[#allocation2 + $0x8] ss:$16 sps:$4 sm:$0xff]   ;;  %v2505_v42 = vld [vmem:[#allocation2 + $0x164] ss:$16 sps:$4 sm:$0xff]  }
  0x2e   : > { %v1064_v63 = vsel %vm1057_vm2, %v1061_v31, %v1063_v54  ;;  %v547_v2 = vrot.slane %v2818_v53, 1  ;;  %v2841_v6 = vpack.c.bf16 %v1380_v51, %v1378_v50  ;;  %v560_v7 = vpack.c.bf16 %v536_v56, %v534_v55  ;;  %v2497_v31 = vld [vmem:[#allocation2] ss:$16 sps:$4 sm:$0xff]  }
  0x2f   : > { %2311 = vmatmul.mubr.msk.bf16.vlgmr.msra.gmra.mxu0 %vm660_vm1, %v559_v41  ;;  %2315 = vmatmul.mubr.msk.bf16.vlgmr.msra.gmra.mxu1 %vm660_vm1, %v559_v41  ;;  %v1066_v5 = vsel %vm1057_vm2, %v1063_v54, %v1065_v60  ;;  %v549_v8 = vrot.slane %v2829_v59, 1  ;;  %v1071_v10 = vrot.slane %v2815_v52, 2  ;;  %v501_v12 = vunpack.c.l.bf16 %v479_v4  ;;  %v2503_v60 = vld [vmem:[#allocation2 + $0x160] ss:$16 sps:$4 sm:$0xff]  }
  0x30   : > { %920 = vmatpush1.bf16.msra.mxu0 %v2477_v34  ;;  %993 = vmatpush1.bf16.msra.mxu1 %v2480_v38  ;;  %v2844_v9 = vpack.c.bf16 %v1066_v5, %v1064_v63  ;;  %v1072_v13 = vrot.slane %v2818_v53, 2  ;;  %v1074_v14 = vrot.slane %v2829_v59, 2  ;;  %v1076_v16 = vrot.slane %v2835_v62, 2  ;;  %v2514_v63 = vld [vmem:[#allocation2 + $0x14c] ss:$16 sps:$4 sm:$0xff]  }
  0x31   : > { %715 = vmatprep.mubr.bf16.mxu0 %v2672_v0  ;;  %788 = vmatprep.mubr.bf16.mxu1 %v2672_v0  ;;  %v548_v19 = vsel %vm527_vm0, %v546_v1, %v547_v2  ;;  %v1078_v26 = vrot.slane %v501_v12, 2  ;;  %v550_v27 = vsel %vm527_vm0, %v547_v2, %v549_v8  ;;  %v1381_v30 = vrot.slane %v2785_v25, 3  ;;  %v2512_v1 = vld [vmem:[#allocation2 + $0x148] ss:$16 sps:$4 sm:$0xff]   ;;  %v2517_v2 = vld [vmem:[#allocation2 + $0x124] ss:$16 sps:$4 sm:$0xff]  }
  0x32   : > { %921 = vmatprep.subr.bf16.mxu0 %v2485_v40  ;;  %994 = vmatprep.subr.bf16.mxu1 %v2488_v43  ;;  %v1073_v23 = vsel %vm1057_vm2, %v1071_v10, %v1072_v13  ;;  %v1075_v24 = vsel %vm1057_vm2, %v1072_v13, %v1074_v14  ;;  %v1077_v29 = vsel %vm1057_vm2, %v1074_v14, %v1076_v16  ;;  %v1383_v33 = vrot.slane %v2796_v39, 3  ;;  %v2508_v39 = vld [vmem:[#allocation2 + $0x16c] ss:$16 sps:$4 sm:$0xff]   ;;  %v2515_v4 = vld [vmem:[#allocation2 + $0x120] ss:$16 sps:$4 sm:$0xff]  }
  0x33   : > { %v2858_v28 = vpack.c.bf16 %v1075_v24, %v1073_v23  ;;  %v1079_v32 = vsel %vm1057_vm2, %v1076_v16, %v1078_v26  ;;  %v1389_v34 = vrot.slane %v2815_v52, 3  ;;  %v1382_v25 = vsel %vm1375_vm3, %v1379_v37, %v1381_v30  ;;  %v2518_v5 = vld [vmem:[#allocation2 + $0x128] ss:$16 sps:$4 sm:$0xff]   ;;  %v2535_v14 = vld [vmem:[#allocation2 + $0x1c4] ss:$16 sps:$4 sm:$0xff]  }
  0x34   : > { %922 = vmatpush1.bf16.msra.mxu0 %v2483_v57  ;;  %995 = vmatpush1.bf16.msra.mxu1 %v2486_v58  ;;  %v2867_v36 = vpack.c.bf16 %v1079_v32, %v1077_v29  ;;  %v1390_v38 = vrot.slane %v2818_v53, 3  ;;  %v1392_v40 = vrot.slane %v2829_v59, 3  ;;  %v561_v41 = vpack.c.bf16 %v550_v27, %v548_v19  ;;  %v2509_v59 = vld [vmem:[#allocation2 + $0x140] ss:$16 sps:$4 sm:$0xff]   ;;  %v2524_v10 = vld [vmem:[#allocation2 + $0x108] ss:$16 sps:$4 sm:$0xff]  }
  0x35   : > { %923 = vmatprep.subr.bf16.mxu0 %v2493_v61  ;;  %996 = vmatprep.subr.bf16.mxu1 %v2496_v3  ;;  %v1384_v43 = vsel %vm1375_vm3, %v1381_v30, %v1383_v33  ;;  %v1394_v45 = vrot.slane %v2835_v62, 3  ;;  %v1396_v37 = vrot.slane %v501_v12, 3  ;;  %v551_v50 = vrot.slane %v2835_v62, 1  ;;  %v2506_v61 = vld [vmem:[#allocation2 + $0x168] ss:$16 sps:$4 sm:$0xff]  }
  0x36   : > { %v2876_v46 = vpack.c.bf16 %v1384_v43, %v1382_v25  ;;  %v1391_v47 = vsel %vm1375_vm3, %v1389_v34, %v1390_v38  ;;  %v1393_v22 = vsel %vm1375_vm3, %v1390_v38, %v1392_v40  ;;  %v553_v51 = vrot.slane %v501_v12, 1  ;;  %v2511_v62 = vld [vmem:[#allocation2 + $0x144] ss:$16 sps:$4 sm:$0xff]   ;;  %v2520_v3 = vld [vmem:[#allocation2 + $0x12c] ss:$16 sps:$4 sm:$0xff]  }
  0x37   : > { %2312 = vmatmul.mubr.msk.bf16.gmra.mxu0 %vm660_vm1, %v560_v7  ;;  %2316 = vmatmul.mubr.msk.bf16.gmra.mxu1 %vm660_vm1, %v560_v7  ;;  %v2881_v52 = vpack.c.bf16 %v1393_v22, %v1391_v47  ;;  %v1395_v53 = vsel %vm1375_vm3, %v1392_v40, %v1394_v45  ;;  %v1397_v54 = vsel %vm1375_vm3, %v1394_v45, %v1396_v37  ;;  %v2523_v7 = vld [vmem:[#allocation2 + $0x104] ss:$16 sps:$4 sm:$0xff]   ;;  %v2532_v12 = vld [vmem:[#allocation2 + $0x1ec] ss:$16 sps:$4 sm:$0xff]   ;;  %v2530_v13 = vld [vmem:[#allocation2 + $0x1e8] ss:$16 sps:$4 sm:$0xff]  }
  0x38   : > { %725 = vmatprep.mubr.bf16.mxu0 %v2672_v0  ;;  %798 = vmatprep.mubr.bf16.mxu1 %v2672_v0  ;;  %v2885_v55 = vpack.c.bf16 %v1397_v54, %v1395_v53  ;;  %v552_v56 = vsel %vm527_vm0, %v549_v8, %v551_v50  ;;  %v554_v57 = vsel %vm527_vm0, %v551_v50, %v553_v51  ;;  %v2521_v8 = vld [vmem:[#allocation2 + $0x100] ss:$16 sps:$4 sm:$0xff]   ;;  %v2536_v16 = vld [vmem:[#allocation2 + $0x1c8] ss:$16 sps:$4 sm:$0xff]   ;;  %v2544_v19 = vld [vmem:[#allocation2 + $0x1ac] ss:$16 sps:$4 sm:$0xff]  }
  0x39   : > { %924 = vmatpush1.bf16.msra.mxu0 %v2491_v11  ;;  %997 = vmatpush1.bf16.msra.mxu1 %v2494_v15  ;;  %v562_v58 = vpack.c.bf16 %v554_v57, %v552_v56  ;;  %v2529_v11 = vld [vmem:[#allocation2 + $0x1e4] ss:$16 sps:$4 sm:$0xff]   ;;  %v2538_v15 = vld [vmem:[#allocation2 + $0x1cc] ss:$16 sps:$4 sm:$0xff]   ;;  %v2545_v24 = vld [vmem:[#allocation2 + $0x180] ss:$16 sps:$4 sm:$0xff]  }
  0x3a   : > { %925 = vmatprep.subr.bf16.mxu0 %v2499_v20  ;;  %998 = vmatprep.subr.bf16.mxu1 %v2502_v21  ;;  %v2539_v20 = vld [vmem:[#allocation2 + $0x1a0] ss:$16 sps:$4 sm:$0xff]   ;;  %v2542_v21 = vld [vmem:[#allocation2 + $0x1a8] ss:$16 sps:$4 sm:$0xff]   ;;  %v2547_v23 = vld [vmem:[#allocation2 + $0x184] ss:$16 sps:$4 sm:$0xff]  }
  0x3b   : > { %v2548_v26 = vld [vmem:[#allocation2 + $0x188] ss:$16 sps:$4 sm:$0xff]  }
  0x3d   : > { %926 = vmatpush1.bf16.msra.mxu0 %v2497_v31  ;;  %999 = vmatpush1.bf16.msra.mxu1 %v2500_v35 }
  0x3e   : > { %1205 = vmatprep.subr.bf16.mxu0 %v2505_v42  ;;  %1278 = vmatprep.subr.bf16.mxu1 %v2508_v39 }
  0x3f   : > { %2313 = vmatmul.mubr.msk.bf16.gmra.mxu0 %vm660_vm1, %v561_v41  ;;  %2317 = vmatmul.mubr.msk.bf16.gmra.mxu1 %vm660_vm1, %v561_v41 }
  0x40   : > { %735 = vmatprep.mubr.bf16.mxu0 %v2672_v0  ;;  %808 = vmatprep.mubr.bf16.mxu1 %v2672_v0 }
  0x47   : > { %2314 = vmatmul.mubr.msk.bf16.gmra.mxu0 %vm660_vm1, %v562_v58  ;;  %2318 = vmatmul.mubr.msk.bf16.gmra.mxu1 %vm660_vm1, %v562_v58 }
  0x48   : > { %943 = vmatprep.mubr.bf16.mxu0 %v2672_v0  ;;  %1016 = vmatprep.mubr.bf16.mxu1 %v2672_v0 }
  0x4f   : > { %2335 = vmatmul.mubr.msk.bf16.vlgmr.msra.gmra.mxu0 %vm660_vm1, %v2770_v17  ;;  %2339 = vmatmul.mubr.msk.bf16.vlgmr.msra.gmra.mxu1 %vm660_vm1, %v2770_v17  ;;  %v2526_v17 = vld [vmem:[#allocation2 + $0x10c] ss:$16 sps:$4 sm:$0xff]  }
  0x50   : > { %1206 = vmatpush1.bf16.msra.mxu0 %v2503_v60  ;;  %1279 = vmatpush1.bf16.msra.mxu1 %v2506_v61 }
  0x51   : > { %953 = vmatprep.mubr.bf16.mxu0 %v2672_v0  ;;  %1026 = vmatprep.mubr.bf16.mxu1 %v2672_v0 }
  0x52   : > { %1207 = vmatprep.subr.bf16.mxu0 %v2511_v62  ;;  %1280 = vmatprep.subr.bf16.mxu1 %v2514_v63 }
  0x54   : > { %1208 = vmatpush1.bf16.msra.mxu0 %v2509_v59  ;;  %1281 = vmatpush1.bf16.msra.mxu1 %v2512_v1 }
  0x55   : > { %1209 = vmatprep.subr.bf16.mxu0 %v2517_v2  ;;  %1282 = vmatprep.subr.bf16.mxu1 %v2520_v3 }
  0x57   : > { %2336 = vmatmul.mubr.msk.bf16.gmra.mxu0 %vm660_vm1, %v2772_v18  ;;  %2340 = vmatmul.mubr.msk.bf16.gmra.mxu1 %vm660_vm1, %v2772_v18  ;;  %v2527_v18 = vld [vmem:[#allocation2 + $0x1e0] ss:$16 sps:$4 sm:$0xff]  }
  0x58   : > { %963 = vmatprep.mubr.bf16.mxu0 %v2672_v0  ;;  %1036 = vmatprep.mubr.bf16.mxu1 %v2672_v0 }
  0x59   : > { %1210 = vmatpush1.bf16.msra.mxu0 %v2515_v4  ;;  %1283 = vmatpush1.bf16.msra.mxu1 %v2518_v5 }
  0x5a   : > { %1211 = vmatprep.subr.bf16.mxu0 %v2523_v7  ;;  %1284 = vmatprep.subr.bf16.mxu1 %v2526_v17 }
  0x5d   : > { %1212 = vmatpush1.bf16.msra.mxu0 %v2521_v8  ;;  %1285 = vmatpush1.bf16.msra.mxu1 %v2524_v10 }
  0x5e   : > { %1523 = vmatprep.subr.bf16.mxu0 %v2529_v11  ;;  %1596 = vmatprep.subr.bf16.mxu1 %v2532_v12 }
  0x5f   : > { %2337 = vmatmul.mubr.msk.bf16.gmra.mxu0 %vm660_vm1, %v2799_v44  ;;  %2341 = vmatmul.mubr.msk.bf16.gmra.mxu1 %vm660_vm1, %v2799_v44  ;;  %v2533_v44 = vld [vmem:[#allocation2 + $0x1c0] ss:$16 sps:$4 sm:$0xff]  }
  0x60   : > { %973 = vmatprep.mubr.bf16.mxu0 %v2672_v0  ;;  %1046 = vmatprep.mubr.bf16.mxu1 %v2672_v0 }
  0x67   : > { %2338 = vmatmul.mubr.msk.bf16.gmra.mxu0 %vm660_vm1, %v2804_v48  ;;  %2342 = vmatmul.mubr.msk.bf16.gmra.mxu1 %vm660_vm1, %v2804_v48  ;;  %v2541_v48 = vld [vmem:[#allocation2 + $0x1a4] ss:$16 sps:$4 sm:$0xff]  }
  0x68   : > { %1229 = vmatprep.mubr.bf16.mxu0 %v2672_v0  ;;  %1302 = vmatprep.mubr.bf16.mxu1 %v2672_v0 }
  0x6f   : > { %2359 = vmatmul.mubr.msk.bf16.vlgmr.msra.gmra.mxu0 %vm660_vm1, %v2806_v49  ;;  %2363 = vmatmul.mubr.msk.bf16.vlgmr.msra.gmra.mxu1 %vm660_vm1, %v2806_v49  ;;  %v2550_v49 = vld [vmem:[#allocation2 + $0x18c] ss:$16 sps:$4 sm:$0xff]  }
  0x70   : > { %1524 = vmatpush1.bf16.msra.mxu0 %v2527_v18  ;;  %1597 = vmatpush1.bf16.msra.mxu1 %v2530_v13 }
  0x71   : > { %1239 = vmatprep.mubr.bf16.mxu0 %v2672_v0  ;;  %1312 = vmatprep.mubr.bf16.mxu1 %v2672_v0 }
  0x72   : > { %1525 = vmatprep.subr.bf16.mxu0 %v2535_v14  ;;  %1598 = vmatprep.subr.bf16.mxu1 %v2538_v15 }
  0x74   : > { %1526 = vmatpush1.bf16.msra.mxu0 %v2533_v44  ;;  %1599 = vmatpush1.bf16.msra.mxu1 %v2536_v16 }
  0x75   : > { %1527 = vmatprep.subr.bf16.mxu0 %v2541_v48  ;;  %1600 = vmatprep.subr.bf16.mxu1 %v2544_v19 }
  0x77   : > { %2360 = vmatmul.mubr.msk.bf16.gmra.mxu0 %vm660_vm1, %v2844_v9  ;;  %2364 = vmatmul.mubr.msk.bf16.gmra.mxu1 %vm660_vm1, %v2844_v9 }
  0x78   : > { %1249 = vmatprep.mubr.bf16.mxu0 %v2672_v0  ;;  %1322 = vmatprep.mubr.bf16.mxu1 %v2672_v0 }
  0x79   : > { %1528 = vmatpush1.bf16.msra.mxu0 %v2539_v20  ;;  %1601 = vmatpush1.bf16.msra.mxu1 %v2542_v21 }
  0x7a   : > { %1529 = vmatprep.subr.bf16.mxu0 %v2547_v23  ;;  %1602 = vmatprep.subr.bf16.mxu1 %v2550_v49 }
  0x7d   : > { %1530 = vmatpush1.bf16.msra.mxu0 %v2545_v24  ;;  %1603 = vmatpush1.bf16.msra.mxu1 %v2548_v26 }
  0x7f   : > { %2361 = vmatmul.mubr.msk.bf16.gmra.mxu0 %vm660_vm1, %v2858_v28  ;;  %2365 = vmatmul.mubr.msk.bf16.gmra.mxu1 %vm660_vm1, %v2858_v28 }
  0x80   : > { %1259 = vmatprep.mubr.bf16.mxu0 %v2672_v0  ;;  %1332 = vmatprep.mubr.bf16.mxu1 %v2672_v0 }
  0x87   : > { %2362 = vmatmul.mubr.msk.bf16.gmra.mxu0 %vm660_vm1, %v2867_v36  ;;  %2366 = vmatmul.mubr.msk.bf16.gmra.mxu1 %vm660_vm1, %v2867_v36 }
  0x88   : > { %1547 = vmatprep.mubr.bf16.mxu0 %v2672_v0  ;;  %1620 = vmatprep.mubr.bf16.mxu1 %v2672_v0 }
  0x8f   : > { %2383 = vmatmul.mubr.msk.bf16.vlgmr.msra.gmra.mxu0 %vm660_vm1, %v2841_v6  ;;  %2387 = vmatmul.mubr.msk.bf16.vlgmr.msra.gmra.mxu1 %vm660_vm1, %v2841_v6 }
  0x90   : > { %1557 = vmatprep.mubr.bf16.mxu0 %v2672_v0  ;;  %1630 = vmatprep.mubr.bf16.mxu1 %v2672_v0 }
  0x97   : > { %2384 = vmatmul.mubr.msk.bf16.gmra.mxu0 %vm660_vm1, %v2876_v46  ;;  %2388 = vmatmul.mubr.msk.bf16.gmra.mxu1 %vm660_vm1, %v2876_v46 }
  0x98   : > { %1567 = vmatprep.mubr.bf16.mxu0 %v2672_v0  ;;  %1640 = vmatprep.mubr.bf16.mxu1 %v2672_v0 }
  0x9f   : > { %2385 = vmatmul.mubr.msk.bf16.gmra.mxu0 %vm660_vm1, %v2881_v52  ;;  %2389 = vmatmul.mubr.msk.bf16.gmra.mxu1 %vm660_vm1, %v2881_v52 }
  0xa0   : > { %1577 = vmatprep.mubr.bf16.mxu0 %v2672_v0  ;;  %1650 = vmatprep.mubr.bf16.mxu1 %v2672_v0 }
  0xa7   : > { %2386 = vmatmul.mubr.msk.bf16.gmra.mxu0 %vm660_vm1, %v2885_v55  ;;  %2390 = vmatmul.mubr.msk.bf16.gmra.mxu1 %vm660_vm1, %v2885_v55 }
  0xef   : > { %v707_v6 = vpop.f32.mrf.mxu0  ;;  %v780_v9 = vpop.f32.mrf.mxu1 }
  0xf1   : > { %v709_v27 = vpop.f32.mrf.mxu0  ;;  %v782_v28 = vpop.f32.mrf.mxu1 }
  0xf3   : > { %v711_v29 = vpop.f32.mrf.mxu0  ;;  %v784_v30 = vpop.f32.mrf.mxu1 }
  0xf5   : > { %v713_v31 = vpop.f32.mrf.mxu0  ;;  %v786_v32 = vpop.f32.mrf.mxu1 }
  0xf7   : > { %v717_v33 = vpop.f32.mrf.mxu0  ;;  %v790_v34 = vpop.f32.mrf.mxu1 }
  0xf9   : > { %v719_v35 = vpop.f32.mrf.mxu0  ;;  %v792_v36 = vpop.f32.mrf.mxu1 }
  0xfb   : > { %v721_v25 = vpop.f32.mrf.mxu0  ;;  %v794_v0 = vpop.f32.mrf.mxu1 }
  0xfd   : > { %v723_v38 = vpop.f32.mrf.mxu0  ;;  %v796_v40 = vpop.f32.mrf.mxu1 }
  0xff   : > { %v727_v41 = vpop.f32.mrf.mxu0  ;;  %v800_v42 = vpop.f32.mrf.mxu1 }
 0x101   : > { %v2969_v39 = vpop.f32.mrf.mxu0  ;;  %v2971_v43 = vpop.f32.mrf.mxu1 }
 0x103   : > { %v2973_v45 = vpop.f32.mrf.mxu0  ;;  %v2975_v46 = vpop.f32.mrf.mxu1 }
 0x105   : > { %v2977_v47 = vpop.f32.mrf.mxu0  ;;  %v2979_v22 = vpop.f32.mrf.mxu1 }
 0x107   : > { %v2981_v37 = vpop.f32.mrf.mxu0  ;;  %v2983_v50 = vpop.f32.mrf.mxu1 }
 0x109   : > { %v2985_v51 = vpop.f32.mrf.mxu0  ;;  %v2987_v52 = vpop.f32.mrf.mxu1 }
 0x10b   : > { %v2989_v53 = vpop.f32.mrf.mxu0  ;;  %v2991_v54 = vpop.f32.mrf.mxu1 }
 0x10d   : > { %v2993_v55 = vpop.f32.mrf.mxu0  ;;  %v2995_v56 = vpop.f32.mrf.mxu1 }
 0x10f   : > { %v945_v57 = vpop.f32.mrf.mxu0  ;;  %v1018_v58 = vpop.f32.mrf.mxu1 }
 0x110   : > { %v2997_v60 = vadd.f32 %v945_v57, %v707_v6  ;;  %v2999_v61 = vadd.f32 %v1018_v58, %v780_v9 }
 0x111   : > { %v947_v62 = vpop.f32.mrf.mxu0  ;;  %v1020_v63 = vpop.f32.mrf.mxu1 }
 0x112   : > { %v3001_v59 = vadd.f32 %v947_v62, %v709_v27  ;;  %v3003_v1 = vadd.f32 %v1020_v63, %v782_v28 }
 0x113   : > { %v949_v2 = vpop.f32.mrf.mxu0  ;;  %v1022_v3 = vpop.f32.mrf.mxu1 }
 0x114   : > { %v3005_v4 = vadd.f32 %v949_v2, %v711_v29  ;;  %v3007_v5 = vadd.f32 %v1022_v3, %v784_v30 }
 0x115   : > { %v951_v7 = vpop.f32.mrf.mxu0  ;;  %v1024_v17 = vpop.f32.mrf.mxu1 }
 0x116   : > { %v3009_v8 = vadd.f32 %v951_v7, %v713_v31  ;;  %v3011_v10 = vadd.f32 %v1024_v17, %v786_v32 }
 0x117   : > { %v955_v11 = vpop.f32.mrf.mxu0  ;;  %v1028_v12 = vpop.f32.mrf.mxu1 }
 0x118   : > { %v3013_v18 = vadd.f32 %v955_v11, %v717_v33  ;;  %v3015_v13 = vadd.f32 %v1028_v12, %v790_v34 }
 0x119   : > { %v957_v14 = vpop.f32.mrf.mxu0  ;;  %v1030_v15 = vpop.f32.mrf.mxu1 }
 0x11a   : > { %3501 = vst [vmem:[#allocation5_spill] sm:$0xff] %v3015_v13  ;;  %v3017_v44 = vadd.f32 %v957_v14, %v719_v35  ;;  %v3019_v16 = vadd.f32 %v1030_v15, %v792_v36 }
 0x11b   : > { %v959_v48 = vpop.f32.mrf.mxu0  ;;  %v1032_v19 = vpop.f32.mrf.mxu1 }
 0x11c   : > { %3502 = vst [vmem:[#allocation6_spill] sm:$0xff] %v3017_v44  ;;  %3503 = vst [vmem:[#allocation7_spill] sm:$0xff] %v3019_v16  ;;  %v3021_v20 = vadd.f32 %v959_v48, %v721_v25  ;;  %v3023_v21 = vadd.f32 %v1032_v19, %v794_v0 }
 0x11d   : > { %v961_v23 = vpop.f32.mrf.mxu0  ;;  %v1034_v49 = vpop.f32.mrf.mxu1 }
 0x11e   : > { %3504 = vst [vmem:[#allocation8_spill] sm:$0xff] %v3021_v20  ;;  %3505 = vst [vmem:[#allocation9_spill] sm:$0xff] %v3023_v21  ;;  %v3025_v24 = vadd.f32 %v961_v23, %v723_v38  ;;  %v3027_v26 = vadd.f32 %v1034_v49, %v796_v40  ;;  %v1885_v21 = vlaneseq }
 0x11f   : > { %v965_v6 = vpop.f32.mrf.mxu0  ;;  %v1038_v9 = vpop.f32.mrf.mxu1 }
 0x120   : > { %3506 = vst [vmem:[#allocation10_spill] sm:$0xff] %v3025_v24  ;;  %3507 = vst [vmem:[#allocation11_spill] sm:$0xff] %v3027_v26  ;;  %v3029_v27 = vadd.f32 %v965_v6, %v727_v41  ;;  %v3031_v28 = vadd.f32 %v1038_v9, %v800_v42  ;;  %v1897_v44 = vand.u32 127, %v1885_v21 }
 0x121   : > { %v967_v29 = vpop.f32.mrf.mxu0  ;;  %v1040_v30 = vpop.f32.mrf.mxu1 }
 0x122   : > { %3508 = vst [vmem:[#allocation12_spill] sm:$0xff] %v3029_v27  ;;  %3509 = vst [vmem:[#allocation13_spill] sm:$0xff] %v3031_v28 }
 0x123   : > { %v969_v31 = vpop.f32.mrf.mxu0  ;;  %v1042_v32 = vpop.f32.mrf.mxu1 }
 0x125   : > { %v971_v33 = vpop.f32.mrf.mxu0  ;;  %v1044_v34 = vpop.f32.mrf.mxu1 }
 0x127   : > { %v975_v35 = vpop.f32.mrf.mxu0  ;;  %v1048_v36 = vpop.f32.mrf.mxu1 }
 0x129   : > { %v977_v25 = vpop.f32.mrf.mxu0  ;;  %v1050_v0 = vpop.f32.mrf.mxu1 }
 0x12b   : > { %v979_v38 = vpop.f32.mrf.mxu0  ;;  %v1052_v57 = vpop.f32.mrf.mxu1 }
 0x12d   : > { %v981_v40 = vpop.f32.mrf.mxu0  ;;  %v1054_v58 = vpop.f32.mrf.mxu1 }
 0x12f   : > { %v1231_v62 = vpop.f32.mrf.mxu0  ;;  %v1304_v63 = vpop.f32.mrf.mxu1 }
 0x131   : > { %v1233_v41 = vpop.f32.mrf.mxu0  ;;  %v1306_v2 = vpop.f32.mrf.mxu1 }
 0x133   : > { %v1235_v42 = vpop.f32.mrf.mxu0  ;;  %v1308_v3 = vpop.f32.mrf.mxu1 }
 0x135   : > { %v1237_v7 = vpop.f32.mrf.mxu0  ;;  %v1310_v17 = vpop.f32.mrf.mxu1 }
 0x137   : > { %v1241_v11 = vpop.f32.mrf.mxu0  ;;  %v1314_v12 = vpop.f32.mrf.mxu1 }
 0x139   : > { %v1243_v14 = vpop.f32.mrf.mxu0  ;;  %v1316_v15 = vpop.f32.mrf.mxu1 }
 0x13b   : > { %v1245_v48 = vpop.f32.mrf.mxu0  ;;  %v1318_v19 = vpop.f32.mrf.mxu1 }
 0x13d   : > { %v3033_v23 = vpop.f32.mrf.mxu0  ;;  %v3035_v49 = vpop.f32.mrf.mxu1 }
 0x13e   : > { %3510 = vst [vmem:[#allocation14_spill] sm:$0xff] %v3033_v23  ;;  %3511 = vst [vmem:[#allocation15_spill] sm:$0xff] %v3035_v49 }
 0x13f   : > { %v3037_v6 = vpop.f32.mrf.mxu0  ;;  %v3039_v9 = vpop.f32.mrf.mxu1 }
 0x140   : > { %3512 = vst [vmem:[#allocation16_spill] sm:$0xff] %v3037_v6  ;;  %3513 = vst [vmem:[#allocation17_spill] sm:$0xff] %v3039_v9  ;;  %v1886_v6 = vshrl.u32 %v1885_v21, 7  ;;  %v3073_v21 = vadd.f32 %v1042_v32, %v2975_v46  ;;  %v1346_v32 = vadd.f32 %v1306_v2, %v3003_v1  ;;  %v3526_v2 = vld [vmem:[#allocation9_spill] sm:$0xff] }
 0x141   : > { %v3041_v28 = vpop.f32.mrf.mxu0  ;;  %v3043_v27 = vpop.f32.mrf.mxu1 }
 0x142   : > { %3514 = vst [vmem:[#allocation18_spill] sm:$0xff] %v3041_v28  ;;  %3515 = vst [vmem:[#allocation19_spill] sm:$0xff] %v3043_v27  ;;  %v968_v27 = vadd.f32 %v967_v29, %v2969_v39  ;;  %v3079_v39 = vadd.f32 %v1044_v34, %v2979_v22  ;;  %v3085_v29 = vadd.f32 %v1048_v36, %v2983_v50 }
 0x143   : > { %v3045_v26 = vpop.f32.mrf.mxu0  ;;  %v3047_v24 = vpop.f32.mrf.mxu1  ;;  %v3101_v22 = vadd.f32 %v1052_v57, %v2991_v54  ;;  %v1345_v50 = vadd.f32 %v1304_v63, %v2999_v61  ;;  %v1347_v34 = vadd.f32 %v1235_v42, %v3005_v4  ;;  %v1349_v54 = vadd.f32 %v1308_v3, %v3007_v5  ;;  %v3525_v63 = vld [vmem:[#allocation8_spill] sm:$0xff] }
 0x144   : > { %3516 = vst [vmem:[#allocation20_spill] sm:$0xff] %v3045_v26  ;;  %3517 = vst [vmem:[#allocation21_spill] sm:$0xff] %v3047_v24  ;;  %v1041_v26 = vadd.f32 %v1040_v30, %v2971_v43  ;;  %v3082_v43 = vadd.f32 %v975_v35, %v2981_v37  ;;  %v1343_v37 = vadd.f32 %v1231_v62, %v2997_v60  ;;  %v3524_v62 = vld [vmem:[#allocation7_spill] sm:$0xff] }
 0x145   : > { %v3049_v20 = vpop.f32.mrf.mxu0  ;;  %v3051_v16 = vpop.f32.mrf.mxu1  ;;  %v1348_v61 = vadd.f32 %v1237_v7, %v3009_v8  ;;  %v1351_v36 = vadd.f32 %v1241_v11, %v3013_v18  ;;  %v1354_v5 = vadd.f32 %v1316_v15, %v3524_v62  ;;  %v1357_v8 = vadd.f32 %v1318_v19, %v3526_v2  ;;  %v3527_v11 = vld [vmem:[#allocation10_spill] sm:$0xff]  ;;  %v3533_v19 = vld [vmem:[#allocation13_spill] sm:$0xff] }
 0x146   : > { %3518 = vst [vmem:[#allocation22_spill] sm:$0xff] %v3049_v20  ;;  %3519 = vst [vmem:[#allocation23_spill] sm:$0xff] %v3051_v16  ;;  %v3067_v20 = vadd.s32 24, %v1886_v6  ;;  %v3069_v16 = vadd.s32 128, %v1897_v44  ;;  %v3088_v44 = vadd.f32 %v977_v25, %v2985_v51  ;;  %v3106_v51 = vadd.f32 %v981_v40, %v2993_v55 }
 0x147   : > { %v3053_v23 = vpop.f32.mrf.mxu0  ;;  %v3055_v49 = vpop.f32.mrf.mxu1  ;;  %v1350_v55 = vadd.f32 %v1310_v17, %v3011_v10 }
 0x148   : > { %3520 = vst [vmem:[#allocation24_spill] sm:$0xff] %v3055_v49  ;;  %v970_v49 = vadd.f32 %v969_v31, %v2973_v45  ;;  %v3091_v45 = vadd.f32 %v1050_v0, %v2987_v52  ;;  %v3109_v52 = vadd.f32 %v1054_v58, %v2995_v56  ;;  %v1344_v31 = vadd.f32 %v1233_v41, %v3001_v59  ;;  %v3522_v56 = vld [vmem:[#allocation5_spill] sm:$0xff]  ;;  %v3523_v58 = vld [vmem:[#allocation6_spill] sm:$0xff] }
 0x149   : > { %v3057_v9 = vpop.f32.mrf.mxu0  ;;  %v3059_v28 = vpop.f32.mrf.mxu1  ;;  %v1353_v25 = vadd.f32 %v1314_v12, %v3522_v56  ;;  %v1352_v4 = vadd.f32 %v1243_v14, %v3523_v58  ;;  %v1355_v41 = vadd.f32 %v1245_v48, %v3525_v63  ;;  %v3528_v12 = vld [vmem:[#allocation14_spill] sm:$0xff]  ;;  %v3531_v14 = vld [vmem:[#allocation12_spill] sm:$0xff] }
 0x14a   : > { %3521 = vst [vmem:[#allocation25_spill] sm:$0xff] %v3057_v9  ;;  %v3076_v9 = vadd.f32 %v971_v33, %v2977_v47  ;;  %v3098_v47 = vadd.f32 %v979_v38, %v2989_v53  ;;  %v1356_v6 = vadd.f32 %v3528_v12, %v3527_v11  ;;  %v3535_v56 = vld [vmem:[#allocation18_spill] sm:$0xff] }
 0x14b   : > { %v3063_v24 = vpop.f32.mrf.mxu0  ;;  %v3065_v13 = vpop.f32.mrf.mxu1  ;;  %v3537_v62 = vld [vmem:[#allocation20_spill] sm:$0xff] }
 0x14c   : > { %v3143_v63 = vadd.f32 %v3537_v62, %v970_v49 }
 0x14d   : > { %v3093_v46 = vpop.f32.mrf.mxu0  ;;  %v3095_v30 = vpop.f32.mrf.mxu1 }
 0x14f   : > { %v1549_v33 = vpop.f32.mrf.mxu0  ;;  %v1622_v53 = vpop.f32.mrf.mxu1 }
 0x150   : > { %v1661_v35 = vadd.f32 %v1549_v33, %v1343_v37  ;;  %v1663_v60 = vadd.f32 %v1622_v53, %v1345_v50  ;;  %v3529_v37 = vld [vmem:[#allocation11_spill] sm:$0xff] }
 0x151   : > { %v1551_v0 = vpop.f32.mrf.mxu0  ;;  %v1624_v59 = vpop.f32.mrf.mxu1  ;;  %v3530_v50 = vld [vmem:[#allocation15_spill] sm:$0xff] }
 0x152   : > { %v1693_v38 = vmul.f32 %v1661_v35, %v1661_v35  ;;  %v1701_v1 = vmul.f32 %v1663_v60, %v1663_v60  ;;  %v1662_v57 = vadd.f32 %v1551_v0, %v1344_v31  ;;  %v1664_v40 = vadd.f32 %v1624_v59, %v1346_v32  ;;  %v3532_v32 = vld [vmem:[#allocation16_spill] sm:$0xff]  ;;  %v3534_v35 = vld [vmem:[#allocation17_spill] sm:$0xff]  ;;  %v3536_v59 = vld [vmem:[#allocation19_spill] sm:$0xff] }
 0x153   : > { %v1553_v42 = vpop.f32.mrf.mxu0  ;;  %v1626_v10 = vpop.f32.mrf.mxu1  ;;  %v1358_v31 = vadd.f32 %v3530_v50, %v3529_v37  ;;  %v1359_v15 = vadd.f32 %v3532_v32, %v3531_v14  ;;  %v1361_v60 = vadd.f32 %v3534_v35, %v3533_v19  ;;  %v3134_v0 = vadd.f32 %v3535_v56, %v968_v27  ;;  %v3538_v27 = vld [vmem:[#allocation21_spill] sm:$0xff] }
 0x154   : > { %v3123_v3 = vadd.f32 %v1701_v1, %v1693_v38  ;;  %v1694_v18 = vmul.f32 %v1662_v57, %v1662_v57  ;;  %v1702_v7 = vmul.f32 %v1664_v40, %v1664_v40  ;;  %v1665_v17 = vadd.f32 %v1553_v42, %v1347_v34 }
 0x155   : > { %v1667_v33 = vadd.f32 %v1626_v10, %v1349_v54  ;;  %v1555_v48 = vpop.f32.mrf.mxu0  ;;  %v1628_v53 = vpop.f32.mrf.mxu1  ;;  %v3137_v34 = vadd.f32 %v3536_v59, %v1041_v26  ;;  %v3147_v11 = vadd.f32 %v3538_v27, %v3073_v21  ;;  %v3539_v26 = vld [vmem:[#allocation22_spill] sm:$0xff]  ;;  %v3162_v21 = vadd.f32 %v3053_v23, %v3082_v43 }
 0x156   : > { %2551 = vrsqrt.f32 %v3123_v3  ;;  %v3140_v38 = vadd.f32 %v1702_v7, %v1694_v18  ;;  %v1695_v1 = vmul.f32 %v1665_v17, %v1665_v17  ;;  %v1666_v40 = vadd.f32 %v1555_v48, %v1348_v61  ;;  %v3540_v18 = vld [vmem:[#allocation23_spill] sm:$0xff]  ;;  %v3542_v48 = vld [vmem:[#allocation25_spill] sm:$0xff] }
 0x157   : > { %v1703_v57 = vmul.f32 %v1667_v33, %v1667_v33  ;;  %v1559_v58 = vpop.f32.mrf.mxu0  ;;  %v1632_v54 = vpop.f32.mrf.mxu1  ;;  %v1668_v2 = vadd.f32 %v1628_v53, %v1350_v55  ;;  %v3151_v12 = vadd.f32 %v3539_v26, %v3076_v9  ;;  %v3155_v7 = vadd.f32 %v3540_v18, %v3079_v39  ;;  %v3541_v39 = vld [vmem:[#allocation24_spill] sm:$0xff] }
 0x158   : > { %v1669_v42 = vadd.f32 %v1559_v58, %v1351_v36  ;;  %v1671_v10 = vadd.f32 %v1632_v54, %v1353_v25  ;;  %2553 = vrsqrt.f32 %v3140_v38  ;;  %v1696_v55 = vmul.f32 %v1666_v40, %v1666_v40 }
 0x159   : > { %v1561_v61 = vpop.f32.mrf.mxu0  ;;  %v1634_v49 = vpop.f32.mrf.mxu1  ;;  %v3158_v17 = vadd.f32 %v1703_v57, %v1695_v1  ;;  %v1704_v36 = vmul.f32 %v1668_v2, %v1668_v2  ;;  %v3166_v33 = vadd.f32 %v3541_v39, %v3085_v29  ;;  %v3170_v53 = vadd.f32 %v3542_v48, %v3088_v44 }
 0x15a   : > { %v1697_v25 = vmul.f32 %v1669_v42, %v1669_v42  ;;  %v1705_v37 = vmul.f32 %v1671_v10, %v1671_v10  ;;  %v1670_v9 = vadd.f32 %v1561_v61, %v1352_v4  ;;  %v1672_v50 = vadd.f32 %v1634_v49, %v1354_v5 }
 0x15b   : > { %v1563_v14 = vpop.f32.mrf.mxu0  ;;  %v1636_v32 = vpop.f32.mrf.mxu1  ;;  %2555 = vrsqrt.f32 %v3158_v17  ;;  %v3173_v19 = vadd.f32 %v1704_v36, %v1696_v55  ;;  %v3179_v59 = vadd.f32 %v3059_v28, %v3091_v45  ;;  %v3183_v29 = vadd.f32 %v3063_v24, %v3098_v47 }
 0x15c   : > { %v3175_v35 = vadd.f32 %v1705_v37, %v1697_v25  ;;  %v1698_v23 = vmul.f32 %v1670_v9, %v1670_v9  ;;  %v1706_v43 = vmul.f32 %v1672_v50, %v1672_v50  ;;  %v1673_v4 = vadd.f32 %v1563_v14, %v1355_v41 }
 0x15d   : > { %v1565_v5 = vpop.f32.mrf.mxu0  ;;  %v1638_v56 = vpop.f32.mrf.mxu1  ;;  %2557 = vrsqrt.f32 %v3173_v19  ;;  %v1675_v44 = vadd.f32 %v1636_v32, %v1357_v8  ;;  %v3188_v1 = vadd.f32 %v3065_v13, %v3101_v22  ;;  %v3194_v24 = vadd.f32 %v3093_v46, %v3106_v51 }
 0x15e   : > { %v3190_v57 = vadd.f32 %v1706_v43, %v1698_v23  ;;  %v1699_v41 = vmul.f32 %v1673_v4, %v1673_v4  ;;  %v1674_v40 = vadd.f32 %v1565_v5, %v1356_v6  ;;  %v1676_v28 = vadd.f32 %v1638_v56, %v1358_v31 }
 0x15f   : > { %v1569_v58 = vpop.f32.mrf.mxu0  ;;  %v1642_v54 = vpop.f32.mrf.mxu1  ;;  %v1707_v62 = vmul.f32 %v1675_v44, %v1675_v44  ;;  %v3198_v47 = vadd.f32 %v3095_v30, %v3109_v52  ;;  %2559 = vrsqrt.f32 %v3175_v35  ;;  %vm1719_vm4 = vcmp.eq.f32.partialorder %v3123_v3, inf }
 0x160   : > { %v1677_v45 = vadd.f32 %v1569_v58, %v1359_v15  ;;  %v1679_v2 = vadd.f32 %v1642_v54, %v1361_v60  ;;  %v1700_v13 = vmul.f32 %v1674_v40, %v1674_v40  ;;  %v1708_v42 = vmul.f32 %v1676_v28, %v1676_v28 }
 0x161   : > { %v1571_v22 = vpop.f32.mrf.mxu0  ;;  %v1644_v8 = vpop.f32.mrf.mxu1  ;;  %v3201_v6 = vadd.f32 %v1707_v62, %v1699_v41  ;;  %2561 = vrsqrt.f32 %v3190_v57  ;;  %vm1726_vm5 = vcmp.eq.f32.partialorder %v3140_v38, inf  ;;  %v1729_v37 = vand.u32 2147483648, %v3140_v38 }
 0x162   : > { %v1789_v10 = vmul.f32 %v1677_v45, %v1677_v45  ;;  %v1797_v31 = vmul.f32 %v1679_v2, %v1679_v2  ;;  %v1678_v46 = vadd.f32 %v1571_v22, %v3134_v0  ;;  %v1680_v30 = vadd.f32 %v1644_v8, %v3137_v34 }
 0x163   : > { %v2552_v15 = vpop.eup %2551  ;;  %v1573_v51 = vpop.f32.mrf.mxu0  ;;  %2563 = vrsqrt.f32 %v3201_v6  ;;  %v3209_v27 = vadd.f32 %v1708_v42, %v1700_v13  ;;  %v1722_v34 = vand.u32 2147483648, %v3123_v3  ;;  %v1736_v50 = vand.u32 2147483648, %v3158_v17 }
 0x164   : > { %v1646_v52 = vpop.f32.mrf.mxu1  ;;  %v1718_v60 = vmul.f32 %v2552_v15, %v3123_v3  ;;  %v3211_v26 = vadd.f32 %v1797_v31, %v1789_v10  ;;  %v1790_v18 = vmul.f32 %v1678_v46, %v1678_v46  ;;  %v1798_v61 = vmul.f32 %v1680_v30, %v1680_v30 }
 0x165   : > { %v1681_v49 = vadd.f32 %v1573_v51, %v3143_v63  ;;  %v1683_v55 = vadd.f32 %v1646_v52, %v3147_v11  ;;  %v1575_v36 = vpop.f32.mrf.mxu0  ;;  %v2554_v25 = vpop.eup %2553  ;;  %2565 = vrsqrt.f32 %v3209_v27  ;;  %vm1721_vm6 = vcmp.eq.f32.partialorder %v3123_v3, 0.0 }
 0x166   : > { %v1648_v0 = vpop.f32.mrf.mxu1  ;;  %v1725_v9 = vmul.f32 %v2554_v25, %v3140_v38  ;;  %2567 = vrsqrt.f32 %v3211_v26  ;;  %v3222_v63 = vadd.f32 %v1798_v61, %v1790_v18  ;;  %vm1728_vm7 = vcmp.eq.f32.partialorder %v3140_v38, 0.0 }
 0x167   : > { %v1579_v11 = vpop.f32.mrf.mxu0  ;;  %v1791_v32 = vmul.f32 %v1681_v49, %v1681_v49  ;;  %v1799_v39 = vmul.f32 %v1683_v55, %v1683_v55  ;;  %v1682_v48 = vadd.f32 %v1575_v36, %v3151_v12  ;;  %v1684_v23 = vadd.f32 %v1648_v0, %v3155_v7 }
 0x168   : > { %v1652_v14 = vpop.f32.mrf.mxu1  ;;  %v2556_v43 = vpop.eup %2555  ;;  %v1720_v4 = vsel %vm1719_vm4, %v3123_v3, %v1718_v60  ;;  %vm1733_vm8 = vcmp.eq.f32.partialorder %v3158_v17, inf  ;;  %vm1740_vm9 = vcmp.eq.f32.partialorder %v3173_v19, inf  ;;  %v1743_v5 = vand.u32 2147483648, %v3173_v19 }
 0x169   : > { %2569 = vrsqrt.f32 %v3222_v63  ;;  %v1581_v56 = vpop.f32.mrf.mxu0  ;;  %v1727_v12 = vsel %vm1726_vm5, %v3140_v38, %v1725_v9  ;;  %v1818_v7 = vand.u32 2147483648, %v3211_v26  ;;  %v3239_v41 = vadd.f32 %v1799_v39, %v1791_v32 }
 0x16a   : > { %v1654_v44 = vpop.f32.mrf.mxu1  ;;  %v1792_v40 = vmul.f32 %v1682_v48, %v1682_v48  ;;  %vm1735_vm10 = vcmp.eq.f32.partialorder %v3158_v17, 0.0  ;;  %vm1742_vm11 = vcmp.eq.f32.partialorder %v3173_v19, 0.0  ;;  %v2558_v58 = vpop.eup %2557  ;;  %v1800_v54 = vmul.f32 %v1684_v23, %v1684_v23 }
 0x16b   : > { %v1685_v62 = vadd.f32 %v1579_v11, %v3162_v21  ;;  %v1687_v28 = vadd.f32 %v1652_v14, %v3166_v33  ;;  %v1686_v45 = vadd.f32 %v1581_v56, %v3170_v53  ;;  %v1583_v2 = vpop.f32.mrf.mxu0  ;;  %v1732_v22 = vmul.f32 %v2556_v43, %v3158_v17 }
 0x16c   : > { %v1656_v13 = vpop.f32.mrf.mxu1  ;;  %v1739_v8 = vmul.f32 %v2558_v58, %v3173_v19  ;;  %v1825_v42 = vand.u32 2147483648, %v3222_v63  ;;  %2571 = vrsqrt.f32 %v3239_v41  ;;  %vm1747_vm12 = vcmp.eq.f32.partialorder %v3175_v35, inf  ;;  %v2560_v53 = vpop.eup %2559 }
 0x16d   : > { %v3251_v10 = vadd.f32 %v1800_v54, %v1792_v40  ;;  %v1793_v31 = vmul.f32 %v1685_v62, %v1685_v62  ;;  %v1801_v21 = vmul.f32 %v1687_v28, %v1687_v28  ;;  %v1794_v15 = vmul.f32 %v1686_v45, %v1686_v45  ;;  %v1585_v33 = vpop.f32.mrf.mxu0 }
 0x16e   : > { %vm1749_vm13 = vcmp.eq.f32.partialorder %v3175_v35, 0.0  ;;  %vm1815_vm14 = vcmp.eq.f32.partialorder %v3211_v26, inf  ;;  %v1688_v46 = vadd.f32 %v1654_v44, %v3179_v59  ;;  %v1689_v30 = vadd.f32 %v1583_v2, %v3183_v29  ;;  %v1658_v60 = vpop.f32.mrf.mxu1  ;;  %v2562_v55 = vpop.eup %2561 }
 0x16f   : > { %v1691_v51 = vadd.f32 %v1656_v13, %v3188_v1  ;;  %v1690_v52 = vadd.f32 %v1585_v33, %v3194_v24  ;;  %v1832_v18 = vand.u32 2147483648, %v3239_v41  ;;  %2573 = vrsqrt.f32 %v3251_v10 }
 0x170   : > { %v1839_v61 = vand.u32 2147483648, %v3251_v10  ;;  %v3262_v49 = vadd.f32 %v1801_v21, %v1793_v31  ;;  %vm1822_vm15 = vcmp.eq.f32.partialorder %v3222_v63, inf  ;;  %v1802_v36 = vmul.f32 %v1688_v46, %v1688_v46  ;;  %v2564_v25 = vpop.eup %2563 }
 0x171   : > { %v1795_v59 = vmul.f32 %v1689_v30, %v1689_v30  ;;  %v1803_v0 = vmul.f32 %v1691_v51, %v1691_v51  ;;  %v1796_v29 = vmul.f32 %v1690_v52, %v1690_v52  ;;  %v1692_v1 = vadd.f32 %v1658_v60, %v3198_v47 }
 0x172   : > { %2575 = vrsqrt.f32 %v3262_v49  ;;  %v1723_v24 = vsel %vm1721_vm6, %v1722_v34, %v1720_v4  ;;  %v1730_v9 = vsel %vm1728_vm7, %v1729_v37, %v1727_v12  ;;  %v3275_v11 = vadd.f32 %v1802_v36, %v1794_v15  ;;  %v2566_v39 = vpop.eup %2565 }
 0x173   : > { %v3277_v14 = vadd.f32 %v1803_v0, %v1795_v59  ;;  %v1734_v32 = vsel %vm1733_vm8, %v3158_v17, %v1732_v22  ;;  %v1741_v47 = vsel %vm1740_vm9, %v3173_v19, %v1739_v8  ;;  %v1804_v3 = vmul.f32 %v1692_v1, %v1692_v1  ;;  %v2568_v48 = vpop.eup %2567 }
 0x174   : > { %v1737_v38 = vsel %vm1735_vm10, %v1736_v50, %v1734_v32  ;;  %v1744_v34 = vsel %vm1742_vm11, %v1743_v5, %v1741_v47  ;;  %v1746_v37 = vmul.f32 %v2560_v53, %v3175_v35  ;;  %2577 = vrsqrt.f32 %v3275_v11 }
 0x175   : > { %v1750_v23 = vand.u32 2147483648, %v3175_v35  ;;  %v1753_v43 = vmul.f32 %v2562_v55, %v3190_v57  ;;  %vm1754_vm0 = vcmp.eq.f32.partialorder %v3190_v57, inf  ;;  %v1814_v4 = vmul.f32 %v2568_v48, %v3211_v26 }
 0x176   : > { %vm1817_vm1 = vcmp.eq.f32.partialorder %v3211_v26, 0.0  ;;  %2579 = vrsqrt.f32 %v3277_v14  ;;  %v3299_v17 = vadd.f32 %v1804_v3, %v1796_v29  ;;  %v1748_v19 = vsel %vm1747_vm12, %v3175_v35, %v1746_v37  ;;  %v2570_v50 = vpop.eup %2569 }
 0x177   : > { %vm1824_vm2 = vcmp.eq.f32.partialorder %v3222_v63, 0.0  ;;  %v1751_v5 = vsel %vm1749_vm13, %v1750_v23, %v1748_v19  ;;  %v1755_v56 = vsel %vm1754_vm0, %v3190_v57, %v1753_v43  ;;  %vm1756_vm3 = vcmp.eq.f32.partialorder %v3190_v57, 0.0 }
 0x178   : > { %v1757_v44 = vand.u32 2147483648, %v3190_v57  ;;  %v1816_v12 = vsel %vm1815_vm14, %v3211_v26, %v1814_v4  ;;  %v1821_v40 = vmul.f32 %v2570_v50, %v3222_v63  ;;  %vm1829_vm4 = vcmp.eq.f32.partialorder %v3239_v41, inf }
 0x179   : > { %vm1836_vm5 = vcmp.eq.f32.partialorder %v3251_v10, inf  ;;  %2581 = vrsqrt.f32 %v3299_v17  ;;  %v1760_v35 = vmul.f32 %v2564_v25, %v3201_v6  ;;  %vm1761_vm6 = vcmp.eq.f32.partialorder %v3201_v6, inf  ;;  %v2572_v54 = vpop.eup %2571 }
 0x17a   : > { %v1758_v58 = vsel %vm1756_vm3, %v1757_v44, %v1755_v56  ;;  %vm1763_vm7 = vcmp.eq.f32.partialorder %v3201_v6, 0.0  ;;  %v1764_v57 = vand.u32 2147483648, %v3201_v6  ;;  %v1823_v62 = vsel %vm1822_vm15, %v3222_v63, %v1821_v40 }
 0x17b   : > { %v1762_v28 = vsel %vm1761_vm6, %v3201_v6, %v1760_v35  ;;  %v1767_v45 = vmul.f32 %v2566_v39, %v3209_v27  ;;  %vm1768_vm8 = vcmp.eq.f32.partialorder %v3209_v27, inf  ;;  %v1828_v2 = vmul.f32 %v2572_v54, %v3239_v41 }
 0x17c   : > { %v1765_v13 = vsel %vm1763_vm7, %v1764_v57, %v1762_v28  ;;  %vm1770_vm9 = vcmp.eq.f32.partialorder %v3209_v27, 0.0  ;;  %v1771_v22 = vand.u32 2147483648, %v3209_v27  ;;  %v1773_v31 = vmul.f32 0.10206208, %v1723_v24  ;;  %v2574_v33 = vpop.eup %2573 }
 0x17d   : > { %v1769_v8 = vsel %vm1768_vm8, %v3209_v27, %v1767_v45  ;;  %v1774_v21 = vmul.f32 0.10206208, %v1730_v9  ;;  %v1775_v15 = vmul.f32 0.10206208, %v1737_v38  ;;  %v1776_v46 = vmul.f32 0.10206208, %v1744_v34 }
 0x17e   : > { %v1772_v53 = vsel %vm1770_vm9, %v1771_v22, %v1769_v8  ;;  %v1777_v6 = vmul.f32 0.10206208, %v1751_v5  ;;  %v1778_v30 = vmul.f32 0.10206208, %v1758_v58  ;;  %v1835_v51 = vmul.f32 %v2574_v33, %v3251_v10 }
 0x17f   : > { %v1779_v52 = vmul.f32 0.10206208, %v1765_v13  ;;  %v1780_v60 = vmul.f32 0.10206208, %v1772_v53  ;;  %v3332_v55 = vadd.f32 1e-07, %v1773_v31  ;;  %v2576_v36 = vpop.eup %2575  ;;  %v1819_v29 = vsel %vm1817_vm1, %v1818_v7, %v1816_v12 }
 0x180   : > { %v3334_v59 = vadd.f32 1e-07, %v1774_v21  ;;  %v3336_v0 = vadd.f32 1e-07, %v1775_v15  ;;  %v3338_v27 = vadd.f32 1e-07, %v1776_v46  ;;  %v1826_v9 = vsel %vm1824_vm2, %v1825_v42, %v1823_v62 }
 0x181   : > { %v3344_v25 = vadd.f32 1e-07, %v1777_v6  ;;  %v3346_v1 = vadd.f32 1e-07, %v1778_v30  ;;  %v3348_v24 = vadd.f32 1e-07, %v1779_v52  ;;  %v1830_v47 = vsel %vm1829_vm4, %v3239_v41, %v1828_v2  ;;  %v2578_v7 = vpop.eup %2577 }
 0x182   : > { %v3354_v32 = vadd.f32 1e-07, %v1780_v60  ;;  %vm1831_vm10 = vcmp.eq.f32.partialorder %v3239_v41, 0.0  ;;  %v1837_v26 = vsel %vm1836_vm5, %v3251_v10, %v1835_v51  ;;  %vm1838_vm11 = vcmp.eq.f32.partialorder %v3251_v10, 0.0 }
 0x183   : > { %v1833_v39 = vsel %vm1831_vm10, %v1832_v18, %v1830_v47  ;;  %v1842_v63 = vmul.f32 %v2576_v36, %v3262_v49  ;;  %vm1843_vm12 = vcmp.eq.f32.partialorder %v3262_v49, inf  ;;  %v2580_v42 = vpop.eup %2579  ;;  %v1840_v3 = vsel %vm1838_vm11, %v1839_v61, %v1837_v26 }
 0x184   : > { %vm1845_vm13 = vcmp.eq.f32.partialorder %v3262_v49, 0.0  ;;  %v1846_v38 = vand.u32 2147483648, %v3262_v49  ;;  %v1849_v34 = vmul.f32 %v2578_v7, %v3275_v11  ;;  %vm1850_vm14 = vcmp.eq.f32.partialorder %v3275_v11, inf }
 0x185   : > { %v1844_v37 = vsel %vm1843_vm12, %v3262_v49, %v1842_v63  ;;  %vm1852_vm15 = vcmp.eq.f32.partialorder %v3275_v11, 0.0  ;;  %v1853_v41 = vand.u32 2147483648, %v3275_v11  ;;  %vm1904_vm0 = vcmp.lt.s32.totalorder %v3069_v16, 129 }
 0x186   : > { %v2582_v18 = vpop.eup %2581  ;;  %v1847_v48 = vsel %vm1845_vm13, %v1846_v38, %v1844_v37  ;;  %v1851_v10 = vsel %vm1850_vm14, %v3275_v11, %v1849_v34  ;;  %v1856_v61 = vmul.f32 %v2580_v42, %v3277_v14  ;;  %vm1857_vm1 = vcmp.eq.f32.partialorder %v3277_v14, inf }
 0x187   : > { %v1854_v23 = vsel %vm1852_vm15, %v1853_v41, %v1851_v10  ;;  %vm1859_vm2 = vcmp.eq.f32.partialorder %v3277_v14, 0.0  ;;  %v1860_v49 = vand.u32 2147483648, %v3277_v14  ;;  %v1863_v43 = vmul.f32 %v2582_v18, %v3299_v17 }
 0x188   : > { %v1858_v4 = vsel %vm1857_vm1, %v3277_v14, %v1856_v61  ;;  %vm1864_vm3 = vcmp.eq.f32.partialorder %v3299_v17, inf  ;;  %vm1866_vm4 = vcmp.eq.f32.partialorder %v3299_v17, 0.0  ;;  %v1867_v19 = vand.u32 2147483648, %v3299_v17 }
 0x189   : > { %v1861_v11 = vsel %vm1859_vm2, %v1860_v49, %v1858_v4  ;;  %v1865_v50 = vsel %vm1864_vm3, %v3299_v17, %v1863_v43  ;;  %v1869_v5 = vmul.f32 0.10206208, %v1819_v29  ;;  %v1870_v56 = vmul.f32 0.10206208, %v1826_v9 }
 0x18a   : > { %v1868_v44 = vsel %vm1866_vm4, %v1867_v19, %v1865_v50  ;;  %v1871_v12 = vmul.f32 0.10206208, %v1833_v39  ;;  %v1872_v40 = vmul.f32 0.10206208, %v1840_v3  ;;  %v1873_v35 = vmul.f32 0.10206208, %v1847_v48 }
 0x18b   : > { %v1874_v58 = vmul.f32 0.10206208, %v1854_v23  ;;  %v1875_v57 = vmul.f32 0.10206208, %v1861_v11  ;;  %v1876_v54 = vmul.f32 0.10206208, %v1868_v44 }
 0x18c   : > { %v1877_v62 = vadd.f32 1e-07, %v1869_v5  ;;  %v1878_v14 = vadd.f32 1e-07, %v1870_v56  ;;  %v1879_v28 = vadd.f32 1e-07, %v1871_v12 }
 0x18d   : > { %v1880_v45 = vadd.f32 1e-07, %v1872_v40  ;;  %v1881_v2 = vadd.f32 1e-07, %v1873_v35  ;;  %v1882_v13 = vadd.f32 1e-07, %v1874_v58 }
 0x18e   : > { %v1883_v22 = vadd.f32 1e-07, %v1875_v57  ;;  %v1884_v8 = vadd.f32 1e-07, %v1876_v54  ;;  %v1929_v31 = vsub.f32 %v3332_v55, %v1877_v62  ;;  %v1930_v17 = vsub.f32 %v3334_v59, %v1878_v14 }
 0x18f   : > { %v1931_v21 = vsub.f32 %v3336_v0, %v1879_v28  ;;  %v1932_v15 = vsub.f32 %v3338_v27, %v1880_v45  ;;  %v1933_v33 = vsub.f32 %v3344_v25, %v1881_v2  ;;  %v1934_v53 = vsub.f32 %v3346_v1, %v1882_v13 }
 0x190   : > { %v2673_v46 = vmov 0.0   ;;  %v1935_v30 = vsub.f32 %v3348_v24, %v1883_v22  ;;  %v1936_v51 = vsub.f32 %v3354_v32, %v1884_v8  ;;  %2583 = vrcp.f32 %v1877_v62 }
 0x191   : > { %v3398_v6 = vsel %vm1904_vm0, 1.0, %v2673_v46  ;;  %2585 = vrcp.f32 %v1878_v14  ;;  %v1987_v52 = vmul.f32 %v1930_v17, %v1930_v17  ;;  %v1989_v60 = vmul.f32 %v1932_v15, %v1932_v15 }
 0x192   : > { %vm1902_vm5 = vcmp.lt.s32.totalorder %v3067_v20, 29  ;;  %2587 = vrcp.f32 %v1879_v28  ;;  %v1986_v36 = vmul.f32 %v1929_v31, %v1929_v31  ;;  %v1988_v29 = vmul.f32 %v1931_v21, %v1931_v21 }
 0x193   : > { %2589 = vrcp.f32 %v1880_v45  ;;  %v1995_v9 = vmul.f32 %v3398_v6, %v1987_v52  ;;  %v1991_v47 = vmul.f32 %v1934_v53, %v1934_v53  ;;  %v1992_v26 = vmul.f32 %v1935_v30, %v1935_v30  ;;  %vm1912_vm6 = vmand %vm1902_vm5, %vm1904_vm0 }
 0x194   : > { %2591 = vrcp.f32 %v1881_v2  ;;  %v1937_v7 = vadd.f32 %v1877_v62, %v3332_v55  ;;  %v1997_v39 = vmul.f32 %v3398_v6, %v1989_v60  ;;  %v1938_v42 = vadd.f32 %v1878_v14, %v3334_v59 }
 0x195   : > { %2593 = vrcp.f32 %v1882_v13  ;;  %v2002_v63 = vadd.f32 %v1995_v9, %v1986_v36  ;;  %v1939_v3 = vadd.f32 %v1879_v28, %v3336_v0  ;;  %v1940_v38 = vadd.f32 %v1880_v45, %v3338_v27 }
 0x196   : > { %2595 = vrcp.f32 %v1883_v22  ;;  %v1941_v34 = vadd.f32 %v1881_v2, %v3344_v25  ;;  %v1942_v41 = vadd.f32 %v1882_v13, %v3346_v1  ;;  %v1943_v18 = vadd.f32 %v1883_v22, %v3348_v24 }
 0x197   : > { %2597 = vrcp.f32 %v1884_v8  ;;  %v2003_v37 = vadd.f32 %v2002_v63, %v1988_v29  ;;  %v3419_v48 = vsel %vm1902_vm5, 1.0, %v2673_v46  ;;  %v1990_v10 = vmul.f32 %v1933_v33, %v1933_v33 }
 0x198   : > { %v1944_v61 = vadd.f32 %v1884_v8, %v3354_v32  ;;  %v2024_v23 = vmul.f32 %v1938_v42, %v1938_v42  ;;  %v1993_v49 = vmul.f32 %v1936_v51, %v1936_v51  ;;  %v1999_v16 = vmul.f32 %v3398_v6, %v1991_v47 }
 0x199   : > { %v2004_v43 = vadd.f32 %v2003_v37, %v1997_v39  ;;  %v2026_v4 = vmul.f32 %v1940_v38, %v1940_v38  ;;  %v3424_v19 = vsel %vm1912_vm6, 1.0, %v2673_v46  ;;  %v2023_v11 = vmul.f32 %v1937_v7, %v1937_v7 }
 0x19a   : > { %v2032_v50 = vmul.f32 %v3398_v6, %v2024_v23  ;;  %v2000_v5 = vmul.f32 %v3419_v48, %v1992_v26  ;;  %v2025_v56 = vmul.f32 %v1939_v3, %v1939_v3  ;;  %v2028_v44 = vmul.f32 %v1942_v41, %v1942_v41 }
 0x19b   : > { %v2005_v20 = vadd.f32 %v2004_v43, %v1990_v10  ;;  %v2034_v12 = vmul.f32 %v3398_v6, %v2026_v4  ;;  %v2001_v58 = vmul.f32 %v3424_v19, %v1993_v49  ;;  %v2029_v62 = vmul.f32 %v1943_v18, %v1943_v18 }
 0x19c   : > { %v2039_v40 = vadd.f32 %v2032_v50, %v2023_v11  ;;  %v2027_v13 = vmul.f32 %v1941_v34, %v1941_v34  ;;  %v2030_v22 = vmul.f32 %v1944_v61, %v1944_v61  ;;  %v2036_v17 = vmul.f32 %v3398_v6, %v2028_v44 }
 0x19d   : > { %v2584_v35 = vpop.eup %2583  ;;  %v2006_v57 = vadd.f32 %v2005_v20, %v1999_v16  ;;  %vm454_vm7 = vcmask 0  }
 0x19e   : > { %v2586_v54 = vpop.eup %2585  ;;  %v2040_v14 = vadd.f32 %v2039_v40, %v2025_v56  ;;  %v1953_v28 = vmul.f32 %v2584_v35, %v3332_v55  ;;  %v2037_v55 = vmul.f32 %v3419_v48, %v2029_v62  ;;  %455 = vst.msk [vmem:[%s3450_s12] sm:$0x1] %vm454_vm7, %v2673_v46  ;;  %456 = vst.msk [vmem:[%s3459_s15] sm:$0x1] %vm454_vm7, %v2673_v46 }
 0x19f   : > { %v2588_v45 = vpop.eup %2587  ;;  %v2007_v2 = vadd.f32 %v2006_v57, %v2000_v5  ;;  %v1954_v8 = vmul.f32 %v2586_v54, %v3334_v59  ;;  %457 = vst.msk [vmem:[%s3468_s18] sm:$0x1] %vm454_vm7, %v2673_v46 }
 0x1a0   : > { %v2590_v31 = vpop.eup %2589  ;;  %v2041_v21 = vadd.f32 %v2040_v14, %v2034_v12  ;;  %v1955_v15 = vmul.f32 %v2588_v45, %v3336_v0  ;;  %2599 = vlog2.f32 %v1953_v28  ;;  %v2038_v0 = vmul.f32 %v3424_v19, %v2030_v22 }
 0x1a1   : > { %v2592_v33 = vpop.eup %2591  ;;  %v2008_v53 = vadd.f32 %v2007_v2, %v2001_v58  ;;  %v1956_v30 = vmul.f32 %v2590_v31, %v3338_v27  ;;  %2601 = vlog2.f32 %v1954_v8 }
 0x1a2   : > { %v2594_v51 = vpop.eup %2593  ;;  %v2042_v52 = vadd.f32 %v2041_v21, %v2027_v13  ;;  %v1957_v60 = vmul.f32 %v2592_v33, %v3344_v25  ;;  %2603 = vlog2.f32 %v1955_v15 }
 0x1a3   : > { %v2596_v59 = vpop.eup %2595  ;;  %2009 = vadd.xlane.f32.xlu0 %v2008_v53  ;;  %v1958_v36 = vmul.f32 %v2594_v51, %v3346_v1  ;;  %2605 = vlog2.f32 %v1956_v30 }
 0x1a4   : > { %v2598_v29 = vpop.eup %2597  ;;  %v2043_v9 = vadd.f32 %v2042_v52, %v2036_v17  ;;  %v1959_v47 = vmul.f32 %v2596_v59, %v3348_v24  ;;  %2607 = vlog2.f32 %v1957_v60 }
 0x1a5   : > { %v1960_v27 = vmul.f32 %v2598_v29, %v3354_v32  ;;  %2609 = vlog2.f32 %v1958_v36  ;;  %v1985_v29 = vld [vmem:[%s3450_s12] sm:$0x1] }
 0x1a6   : > { %v2044_v26 = vadd.f32 %v2043_v9, %v2037_v55  ;;  %2611 = vlog2.f32 %v1959_v47  ;;  %v2022_v47 = vld [vmem:[%s3459_s15] sm:$0x1] }
 0x1a7   : > { %2613 = vlog2.f32 %v1960_v27 }
 0x1a8   : > { %v2045_v25 = vadd.f32 %v2044_v26, %v2038_v0 }
 0x1aa   : > { %2046 = vadd.xlane.f32.xlu0 %v2045_v25  ;;  %v2058_v25 = vld [vmem:[%s3468_s18] sm:$0x1] }
 0x1ad   : > { %v2600_v7 = vpop.eup %2599 }
 0x1ae   : > { %v2602_v39 = vpop.eup %2601  ;;  %v1962_v1 = vmul.f32 0.6931472, %v2600_v7 }
 0x1af   : > { %v2604_v63 = vpop.eup %2603  ;;  %v1964_v42 = vmul.f32 0.6931472, %v2602_v39 }
 0x1b0   : > { %v2606_v3 = vpop.eup %2605  ;;  %v1966_v38 = vmul.f32 0.6931472, %v2604_v63  ;;  %v1977_v32 = vand.u32 2147483647, %v1962_v1 }
 0x1b1   : > { %v2608_v34 = vpop.eup %2607  ;;  %v1968_v37 = vmul.f32 0.6931472, %v2606_v3  ;;  %v1978_v41 = vand.u32 2147483647, %v1964_v42 }
 0x1b2   : > { %v2610_v24 = vpop.eup %2609  ;;  %v1970_v16 = vmul.f32 0.6931472, %v2608_v34  ;;  %v1979_v4 = vand.u32 2147483647, %v1966_v38 }
 0x1b3   : > { %v2612_v18 = vpop.eup %2611  ;;  %v1972_v10 = vmul.f32 0.6931472, %v2610_v24  ;;  %v1980_v61 = vand.u32 2147483647, %v1968_v37  ;;  %v2060_v23 = vmul.f32 %v3398_v6, %v1978_v41 }
 0x1b4   : > { %v2614_v49 = vpop.eup %2613  ;;  %v1974_v43 = vmul.f32 0.6931472, %v2612_v18  ;;  %v1981_v12 = vand.u32 2147483647, %v1970_v16 }
 0x1b5   : > { %v1976_v11 = vmul.f32 0.6931472, %v2614_v49  ;;  %v1982_v50 = vand.u32 2147483647, %v1972_v10  ;;  %v2062_v5 = vmul.f32 %v3398_v6, %v1980_v61  ;;  %v2067_v20 = vadd.f32 %v2060_v23, %v1977_v32 }
 0x1b6   : > { %v1983_v56 = vand.u32 2147483647, %v1974_v43 }
 0x1b7   : > { %v2068_v44 = vadd.f32 %v2067_v20, %v1979_v4  ;;  %v1984_v40 = vand.u32 2147483647, %v1976_v11  ;;  %v2064_v35 = vmul.f32 %v3398_v6, %v1982_v50 }
 0x1b8   : > { %v2065_v57 = vmul.f32 %v3419_v48, %v1983_v56 }
 0x1b9   : > { %v2069_v58 = vadd.f32 %v2068_v44, %v2062_v5  ;;  %v2066_v62 = vmul.f32 %v3424_v19, %v1984_v40 }
 0x1bb   : > { %v2070_v54 = vadd.f32 %v2069_v58, %v1981_v12 }
 0x1bd   : > { %v2071_v14 = vadd.f32 %v2070_v54, %v2064_v35 }
 0x1bf   : > { %v2072_v28 = vadd.f32 %v2071_v14, %v2065_v57 }
 0x1c1   : > { %v2073_v45 = vadd.f32 %v2072_v28, %v2066_v62 }
 0x1c3   : > { %2074 = vadd.xlane.f32.xlu1 %v2073_v45 }
 0x22c   : > { %v2010_v6 = vpop.xlane.xlu0 %2009 }
 0x22d   : > { %v2011_v48 = vrot.slane %v2010_v6, 4 }
 0x22f   : > { %v2012_v19 = vadd.f32 %v2011_v48, %v2010_v6 }
 0x231   : > { %v2013_v2 = vrot.slane %v2012_v19, 2 }
 0x233   : > { %v2047_v13 = vpop.xlane.xlu0 %2046  ;;  %v2014_v22 = vadd.f32 %v2013_v2, %v2012_v19 }
 0x234   : > { %v2048_v8 = vrot.slane %v2047_v13, 4 }
 0x235   : > { %v2015_v31 = vrot.slane %v2014_v22, 1 }
 0x236   : > { %v2049_v17 = vadd.f32 %v2048_v8, %v2047_v13 }
 0x237   : > { %v2016_v21 = vadd.f32 %v2015_v31, %v2014_v22 }
 0x238   : > { %v2050_v15 = vrot.slane %v2049_v17, 2 }
 0x239   : > { %2406 = vpush %v2016_v21 }
 0x23a   : > { %v2051_v33 = vadd.f32 %v2050_v15, %v2049_v17 }
 0x23c   : > { %v2052_v53 = vrot.slane %v2051_v33, 1 }
 0x23e   : > { %v2053_v30 = vadd.f32 %v2052_v53, %v2051_v33 }
 0x240   : > { %2408 = vpush %v2053_v30 }
 0x24c   : > { %v2075_v46 = vpop.xlane.xlu1 %2074 }
 0x24d   : > { %v2076_v51 = vrot.slane %v2075_v46, 4 }
 0x24f   : > { %v2077_v55 = vadd.f32 %v2076_v51, %v2075_v46 }
 0x251   : > { %v2078_v52 = vrot.slane %v2077_v55, 2 }
 0x253   : > { %v2079_v60 = vadd.f32 %v2078_v52, %v2077_v55 }
 0x255   : > { %v2080_v59 = vrot.slane %v2079_v60, 1 }
 0x257   : > { %v2081_v36 = vadd.f32 %v2080_v59, %v2079_v60 }
 0x259   : > { %2410 = vpush %v2081_v36 }
 0x26a   : > { %s2407_s24 = spop %2406 }
 0x26b   : > { %v2018_v0 = vstv %s2407_s24 }
 0x26c   : > { %v2019_v9 = vadd.f32 %v2018_v0, %v1985_v29 }
 0x26e   : > { %2021 = vst.msk [vmem:[%s3450_s12] sm:$0x1] %vm454_vm7, %v2019_v9 }
 0x271   : > { %s2409_s19 = spop %2408 }
 0x272   : > { %v2055_v27 = vstv %s2409_s19 }
 0x273   : > { %v2056_v26 = vadd.f32 %v2055_v27, %v2022_v47 }
 0x275   : > { %2057 = vst.msk [vmem:[%s3459_s15] sm:$0x1] %vm454_vm7, %v2056_v26 }
 0x28a   : > { %s2411_s20 = spop %2410 }
 0x28b   : > { %v2083_v7 = vstv %s2411_s20 }
 0x28c   : > { %v2084_v39 = vadd.f32 %v2083_v7, %v2058_v25 }
 0x28e   : > { %2085 = vst.msk [vmem:[%s3468_s18] sm:$0x1] %vm454_vm7, %v2084_v39 }
 0x28f PF: > { %s19_s26 = sadd.s32 1, %s2667_s26   ;;  %s3543_s24 = smov %s2663_s25 }
 0x290   : > { %p16_p2 = scmp.ge.s32.totalorder %s19_s26, 4   ;;  %s3544_s25 = smov %s3546_s28 }
 0x292   :  { %18 = sbr.rel (!%p16_p2) target bundleno = 2 (0x2), region = 115 }
 0x297   :  { %2127 = vsyncpa [#allocation3], 1 }
 0x298   :  { %2129 = vsyncpa [#allocation3 + $0x1], 1 }

</bundles_post_ra>
